<compile_context>
chip_gen: v6e
topology: v6e:2x2x1
jax: 0.10.0
libtpu: 0.0.40
codegen_flags: <defaults>
</compile_context>

<pallas_src>
import math
import jax
import jax.numpy as jnp
from jax.experimental import pallas as pl
from jax.experimental.pallas import tpu as pltpu

# --- model hyper-parameters (small, consistent with the module) ---
NUM_LAYERS = 2
D_MODEL = 32
N_HEADS = 4
HEAD_DIM = D_MODEL // N_HEADS
EXPANSION = 4
FFN_HIDDEN = EXPANSION * D_MODEL
SEQ = 8
BATCH = 2
EPS = 1e-5  # nn.LayerNorm default
NEG_INF = jnp.float32(-1e20)


# ------------------------------------------------------------------
# Fused kernel: last DecoderUnit + final Decoder LayerNorm, one block.
#   x         : (T, D)       flattened tokens, T = B*S
#   bias      : (2, T, T)    additive attention bias [self, "enc-dec"]
#   wqkv      : (2, 3*H, D, hd)   per-head q/k/v weights  (c*H + h)
#   bqkv      : (2, 3*H, 1, hd)   per-head q/k/v biases
#   wo        : (2, H, hd, D)     per-head rows of out-projection
#   bo        : (2, 1, D)
#   norms     : (4, 2, 1, D)      norm1/2/3 of the unit + final Decoder norm
# ------------------------------------------------------------------
def decoder_fused_kernel(x_ref, bias_ref, wqkv_ref, bqkv_ref, wo_ref, bo_ref,
                         norm_ref, w1_ref, b1_ref, w2_ref, b2_ref, o_ref):
    x = x_ref[...]  # (T, D)
    inv_scale = 1.0 / math.sqrt(float(D_MODEL))  # scaled by sqrt(d_model), not head_dim

    def layernorm(v, idx):
        mu = jnp.mean(v, axis=-1, keepdims=True)
        var = jnp.mean((v - mu) ** 2, axis=-1, keepdims=True)
        return (v - mu) * jax.lax.rsqrt(var + EPS) * norm_ref[idx, 0] + norm_ref[idx, 1]

    def mha(inp, m):
        bias = bias_ref[m]               # (T, T) additive mask (0 / -1e20)
        out = jnp.zeros_like(inp)        # (T, D) f32 accumulator
        for h in range(N_HEADS):         # static unroll; per-head weights, no lane slicing/concat
            q = jnp.dot(inp, wqkv_ref[m, h],
                        preferred_element_type=jnp.float32) + bqkv_ref[m, h]
            k = jnp.dot(inp, wqkv_ref[m, N_HEADS + h],
                        preferred_element_type=jnp.float32) + bqkv_ref[m, N_HEADS + h]
            v = jnp.dot(inp, wqkv_ref[m, 2 * N_HEADS + h],
                        preferred_element_type=jnp.float32) + bqkv_ref[m, 2 * N_HEADS + h]
            # scores = q @ k^T (contract head dim), then scale + additive mask bias
            s = jax.lax.dot_general(q, k, (((1,), (1,)), ((), ())),
                                    preferred_element_type=jnp.float32) * inv_scale + bias
            s = s - jnp.max(s, axis=-1, keepdims=True)
            p = jnp.exp(s)
            p = p / jnp.sum(p, axis=-1, keepdims=True)
            oh = jnp.dot(p, v, preferred_element_type=jnp.float32)           # (T, hd)
            out = out + jnp.dot(oh, wo_ref[m, h],                            # accumulate through Wo
                                preferred_element_type=jnp.float32)
        return out + bo_ref[m]

    sa = mha(x, 0)                   # self-attention (gets Decoder's src_mask: arg-swap bug preserved)
    n1 = layernorm(sa + x, 0)
    ca = mha(n1, 1)                  # "enc-dec" attention attends to n1 itself (enc_output unused)
    n2 = layernorm(ca + n1, 1)
    hdn = jnp.maximum(
        jnp.dot(n2, w1_ref[...], preferred_element_type=jnp.float32) + b1_ref[...], 0.0)
    f = jnp.dot(hdn, w2_ref[...], preferred_element_type=jnp.float32) + b2_ref[...]
    n3 = layernorm(f + n2, 2)
    o_ref[...] = layernorm(n3, 3)    # fused final Decoder LayerNorm


def decoder_fused_pallas(x2d, bias, wqkv, bqkv, wo, bo, norms, w1, b1, w2, b2):
    T, D = x2d.shape
    H = FFN_HIDDEN

    def full(shape):
        return pl.BlockSpec(shape, lambda i, _n=len(shape): (0,) * _n)

    return pl.pallas_call(
        decoder_fused_kernel,
        out_shape=jax.ShapeDtypeStruct((T, D), jnp.float32),
        grid_spec=pltpu.PrefetchScalarGridSpec(
            num_scalar_prefetch=0,
            grid=(1,),  # single block: whole problem fits trivially in VMEM
            in_specs=[
                full((T, D)),                            # x (flattened tokens)
                full((2, T, T)),                         # additive mask biases
                full((2, 3 * N_HEADS, D, HEAD_DIM)),     # per-head q/k/v weights
                full((2, 3 * N_HEADS, 1, HEAD_DIM)),     # per-head q/k/v biases
                full((2, N_HEADS, HEAD_DIM, D)),         # per-head out-projection rows
                full((2, 1, D)),                         # out-projection biases
                full((4, 2, 1, D)),                      # layernorms (3 unit + 1 final)
                full((D, H)),                            # ffn W1
                full((1, H)),                            # ffn b1
                full((H, D)),                            # ffn W2
                full((1, D)),                            # ffn b2
            ],
            out_specs=full((T, D)),
        ),
        compiler_params=pltpu.CompilerParams(dimension_semantics=("arbitrary",)),
    )(x2d, bias, wqkv, bqkv, wo, bo, norms, w1, b1, w2, b2)


# ------------------------------------------------------------------
# Wrapper-side helpers (plain JAX, negligible cost)
# ------------------------------------------------------------------
def _mask_to_bias(mask, B, S):
    """Additive attention bias over the flattened (B*S) token axis.

    0 where attention is allowed, -1e20 where masked or cross-batch.  Exactly
    reproduces the per-batch masked_fill + softmax (cross-batch weights underflow
    to 0.0 and s + (-1e20) rounds to -1e20 in f32)."""
    if mask is None:
        within = jnp.zeros((S, S), jnp.float32)
    else:
        within = jnp.where(mask == 0.0, NEG_INF, jnp.float32(0.0))
    tiled = jnp.tile(within, (B, B))                                     # (B*S, B*S)
    same_batch = jnp.kron(jnp.eye(B, dtype=jnp.float32),
                          jnp.ones((S, S), jnp.float32))
    return jnp.where(same_batch > 0.5, tiled, NEG_INF)


def decoder_forward(x, enc_output, tgt_mask, src_mask, params):
    del enc_output  # never consumed by DecoderUnit in the reference module
    B, S, D = x.shape
    T = B * S
    # arg-swap bug: self-attention gets src_mask, "enc-dec" attention gets tgt_mask
    bias = jnp.stack([_mask_to_bias(src_mask, B, S),
                      _mask_to_bias(tgt_mask, B, S)])                    # (2, T, T)
    # Only the LAST layer's output is ever consumed (loop overwrites `output`,
    # each layer reads the ORIGINAL input) -> run just that layer.
    lp = params["layers"][-1]
    wqkv = lp["wqkv"].reshape(2, 3 * N_HEADS, D, HEAD_DIM)
    bqkv = lp["bqkv"].reshape(2, 3 * N_HEADS, 1, HEAD_DIM)
    norms = jnp.concatenate(
        [lp["norm_w"],
         jnp.stack([params["norm_gamma"], params["norm_beta"]])[None]], axis=0)  # (4,2,1,D)
    out2d = decoder_fused_pallas(x.reshape(T, D), bias, wqkv, bqkv,
                                 lp["wo"], lp["bo"], norms,
                                 lp["ffn_w1"], lp["ffn_b1"], lp["ffn_w2"], lp["ffn_b2"])
    return out2d.reshape(B, S, D)


# ------------------------------------------------------------------
# Pure-JAX reference (mirrors the PyTorch module structure, bugs included)
# ------------------------------------------------------------------
def ref_decoder_forward(x, enc_output, tgt_mask, src_mask, params):
    del enc_output
    m_self = src_mask   # arg-swap bug preserved
    m_cross = tgt_mask

    def layernorm(v, g, b):
        mu = jnp.mean(v, axis=-1, keepdims=True)
        var = jnp.mean((v - mu) ** 2, axis=-1, keepdims=True)
        return (v - mu) * jax.lax.rsqrt(var + EPS) * g + b

    def mha(inp, lp, m, mask):
        outs = []
        for h in range(N_HEADS):
            q = inp @ lp["wqkv"][m, 0, h] + lp["bqkv"][m, 0, h]
            k = inp @ lp["wqkv"][m, 1, h] + lp["bqkv"][m, 1, h]
            v = inp @ lp["wqkv"][m, 2, h] + lp["bqkv"][m, 2, h]
            s = q @ jnp.swapaxes(k, -1, -2) / math.sqrt(float(D_MODEL))
            if mask is not None:
                s = jnp.where(mask == 0.0, -1e20, s)
            w = jax.nn.softmax(s, axis=-1)
            outs.append(w @ v)
        cat = jnp.concatenate(outs, axis=-1)
        wo_full = lp["wo"][m].reshape(D_MODEL, D_MODEL)
        return cat @ wo_full + lp["bo"][m]

    out = None
    for lp in params["layers"]:  # each layer sees the ORIGINAL input; output overwritten
        sa = mha(x, lp, 0, m_self)
        n1 = layernorm(sa + x, lp["norm_w"][0, 0], lp["norm_w"][0, 1])
        ca = mha(n1, lp, 1, m_cross)
        n2 = layernorm(ca + n1, lp["norm_w"][1, 0], lp["norm_w"][1, 1])
        f = jnp.maximum(n2 @ lp["ffn_w1"] + lp["ffn_b1"], 0.0) @ lp["ffn_w2"] + lp["ffn_b2"]
        out = layernorm(f + n2, lp["norm_w"][2, 0], lp["norm_w"][2, 1])
    return layernorm(out, params["norm_gamma"], params["norm_beta"])


# ------------------------------------------------------------------
# Deterministic parameter init (synthetic; no checkpoint loading)
# ------------------------------------------------------------------
def init_params(key):
    layers = []
    ln_init = jnp.tile(
        jnp.stack([jnp.ones((1, D_MODEL), jnp.float32),
                   jnp.zeros((1, D_MODEL), jnp.float32)])[None],
        (3, 1, 1, 1))  # (3, 2, 1, D): gamma=1, beta=0 (torch default)
    for _ in range(NUM_LAYERS):
        key, k1, k2, k3, k4, k5, k6, k7, k8 = jax.random.split(key, 9)
        layers.append(dict(
            # per-head weights, matching SelfAttention's Linear(d_model, head_dim) per head
            wqkv=0.05 * jax.random.normal(k1, (2, 3, N_HEADS, D_MODEL, HEAD_DIM), jnp.float32),
            bqkv=0.05 * jax.random.normal(k2, (2, 3, N_HEADS, 1, HEAD_DIM), jnp.float32),
            wo=0.05 * jax.random.normal(k3, (2, N_HEADS, HEAD_DIM, D_MODEL), jnp.float32),
            bo=0.05 * jax.random.normal(k4, (2, 1, D_MODEL), jnp.float32),
            norm_w=ln_init,
            ffn_w1=0.05 * jax.random.normal(k5, (D_MODEL, FFN_HIDDEN), jnp.float32),
            ffn_b1=0.05 * jax.random.normal(k6, (1, FFN_HIDDEN), jnp.float32),
            ffn_w2=0.05 * jax.random.normal(k7, (FFN_HIDDEN, D_MODEL), jnp.float32),
            ffn_b2=0.05 * jax.random.normal(k8, (1, D_MODEL), jnp.float32),
        ))
    return dict(layers=layers,
                norm_gamma=jnp.ones((1, D_MODEL), jnp.float32),
                norm_beta=jnp.zeros((1, D_MODEL), jnp.float32))


if __name__ == "__main__":
    key = jax.random.PRNGKey(0)
    kx, ke, kp = jax.random.split(key, 3)
    x = jax.random.normal(kx, (BATCH, SEQ, D_MODEL), jnp.float32)
    enc_output = jax.random.normal(ke, (BATCH, SEQ, D_MODEL), jnp.float32)  # unused (bug preserved)
    tgt_mask = jnp.tril(jnp.ones((SEQ, SEQ), jnp.float32))  # causal
    src_mask = None
    params = init_params(kp)

    out = decoder_forward(x, enc_output, tgt_mask, src_mask, params)
    out = jax.block_until_ready(out)

    ref = ref_decoder_forward(x, enc_output, tgt_mask, src_mask, params)
    assert out.shape == (BATCH, SEQ, D_MODEL)
    if not bool(jnp.allclose(out, ref, atol=1e-4, rtol=1e-4)):
        raise AssertionError("Pallas kernel output mismatches pure-JAX reference")
    print("KERNEL_OK")
</pallas_src>

<mosaic_0001>
module attributes {stable_mosaic.version = 11 : i64} {
  func.func @decoder_fused_kernel(%arg0: i32, %arg1: memref<16x32xf32, #tpu.memory_space<vmem>>, %arg2: memref<2x16x16xf32, #tpu.memory_space<vmem>>, %arg3: memref<2x12x32x8xf32, #tpu.memory_space<vmem>>, %arg4: memref<2x12x1x8xf32, #tpu.memory_space<vmem>>, %arg5: memref<2x4x8x32xf32, #tpu.memory_space<vmem>>, %arg6: memref<2x1x32xf32, #tpu.memory_space<vmem>>, %arg7: memref<4x2x1x32xf32, #tpu.memory_space<vmem>>, %arg8: memref<32x128xf32, #tpu.memory_space<vmem>>, %arg9: memref<1x128xf32, #tpu.memory_space<vmem>>, %arg10: memref<128x32xf32, #tpu.memory_space<vmem>>, %arg11: memref<1x32xf32, #tpu.memory_space<vmem>>, %arg12: memref<16x32xf32, #tpu.memory_space<vmem>>) attributes {dimension_semantics = [#tpu.dimension_semantics<arbitrary>], iteration_bounds = array<i64: 1>, scalar_prefetch = 0 : i64, scratch_operands = 0 : i64, tpu.core_type = #tpu.core_type<tc>, window_params = [{pipeline_mode = #tpu.pipeline_mode<synchronous>, transform_indices = @transform_0, window_bounds = array<i64: 16, 32>}, {pipeline_mode = #tpu.pipeline_mode<synchronous>, transform_indices = @transform_1, window_bounds = array<i64: 2, 16, 16>}, {pipeline_mode = #tpu.pipeline_mode<synchronous>, transform_indices = @transform_2, window_bounds = array<i64: 2, 12, 32, 8>}, {pipeline_mode = #tpu.pipeline_mode<synchronous>, transform_indices = @transform_3, window_bounds = array<i64: 2, 12, 1, 8>}, {pipeline_mode = #tpu.pipeline_mode<synchronous>, transform_indices = @transform_4, window_bounds = array<i64: 2, 4, 8, 32>}, {pipeline_mode = #tpu.pipeline_mode<synchronous>, transform_indices = @transform_5, window_bounds = array<i64: 2, 1, 32>}, {pipeline_mode = #tpu.pipeline_mode<synchronous>, transform_indices = @transform_6, window_bounds = array<i64: 4, 2, 1, 32>}, {pipeline_mode = #tpu.pipeline_mode<synchronous>, transform_indices = @transform_7, window_bounds = array<i64: 32, 128>}, {pipeline_mode = #tpu.pipeline_mode<synchronous>, transform_indices = @transform_8, window_bounds = array<i64: 1, 128>}, {pipeline_mode = #tpu.pipeline_mode<synchronous>, transform_indices = @transform_9, window_bounds = array<i64: 128, 32>}, {pipeline_mode = #tpu.pipeline_mode<synchronous>, transform_indices = @transform_10, window_bounds = array<i64: 1, 32>}, {pipeline_mode = #tpu.pipeline_mode<synchronous>, transform_indices = @transform_11, window_bounds = array<i64: 16, 32>}]} {
    %c0 = arith.constant 0 : index
    %c0_0 = arith.constant 0 : index
    %0 = vector.load %arg1[%c0, %c0_0] : memref<16x32xf32, #tpu.memory_space<vmem>>, vector<16x32xf32>
    %c0_1 = arith.constant 0 : index
    %c0_2 = arith.constant 0 : index
    %c0_3 = arith.constant 0 : index
    %1 = vector.load %arg2[%c0_1, %c0_2, %c0_3] : memref<2x16x16xf32, #tpu.memory_space<vmem>>, vector<1x16x16xf32>
    %2 = vector.shape_cast %1 : vector<1x16x16xf32> to vector<16x16xf32>
    %cst = arith.constant 0.000000e+00 : f32
    %3 = vector.broadcast %cst : f32 to vector<16x32xf32>
    %c0_4 = arith.constant 0 : index
    %c0_5 = arith.constant 0 : index
    %c0_6 = arith.constant 0 : index
    %c0_7 = arith.constant 0 : index
    %4 = vector.load %arg3[%c0_4, %c0_5, %c0_6, %c0_7] : memref<2x12x32x8xf32, #tpu.memory_space<vmem>>, vector<1x1x32x8xf32>
    %5 = vector.shape_cast %4 : vector<1x1x32x8xf32> to vector<32x8xf32>
    %cst_8 = arith.constant dense<0.000000e+00> : vector<16x8xf32>
    %6 = tpu.matmul %0, %5, %cst_8 {dimension_numbers = #tpu.dot_dimension_numbers<[1], [0], [0], [1], [0, 0, 1, 1], [], []>} : vector<16x32xf32>, vector<32x8xf32>, vector<16x8xf32> -> vector<16x8xf32>
    %c0_9 = arith.constant 0 : index
    %c0_10 = arith.constant 0 : index
    %c0_11 = arith.constant 0 : index
    %c0_12 = arith.constant 0 : index
    %7 = vector.load %arg4[%c0_9, %c0_10, %c0_11, %c0_12] : memref<2x12x1x8xf32, #tpu.memory_space<vmem>>, vector<1x1x1x8xf32>
    %8 = vector.shape_cast %7 : vector<1x1x1x8xf32> to vector<1x8xf32>
    %9 = vector.broadcast %8 : vector<1x8xf32> to vector<16x8xf32>
    %10 = arith.addf %6, %9 : vector<16x8xf32>
    %c0_13 = arith.constant 0 : index
    %c4 = arith.constant 4 : index
    %c0_14 = arith.constant 0 : index
    %c0_15 = arith.constant 0 : index
    %11 = vector.load %arg3[%c0_13, %c4, %c0_14, %c0_15] : memref<2x12x32x8xf32, #tpu.memory_space<vmem>>, vector<1x1x32x8xf32>
    %12 = vector.shape_cast %11 : vector<1x1x32x8xf32> to vector<32x8xf32>
    %cst_16 = arith.constant dense<0.000000e+00> : vector<16x8xf32>
    %13 = tpu.matmul %0, %12, %cst_16 {dimension_numbers = #tpu.dot_dimension_numbers<[1], [0], [0], [1], [0, 0, 1, 1], [], []>} : vector<16x32xf32>, vector<32x8xf32>, vector<16x8xf32> -> vector<16x8xf32>
    %c0_17 = arith.constant 0 : index
    %c4_18 = arith.constant 4 : index
    %c0_19 = arith.constant 0 : index
    %c0_20 = arith.constant 0 : index
    %14 = vector.load %arg4[%c0_17, %c4_18, %c0_19, %c0_20] : memref<2x12x1x8xf32, #tpu.memory_space<vmem>>, vector<1x1x1x8xf32>
    %15 = vector.shape_cast %14 : vector<1x1x1x8xf32> to vector<1x8xf32>
    %16 = vector.broadcast %15 : vector<1x8xf32> to vector<16x8xf32>
    %17 = arith.addf %13, %16 : vector<16x8xf32>
    %c0_21 = arith.constant 0 : index
    %c8 = arith.constant 8 : index
    %c0_22 = arith.constant 0 : index
    %c0_23 = arith.constant 0 : index
    %18 = vector.load %arg3[%c0_21, %c8, %c0_22, %c0_23] : memref<2x12x32x8xf32, #tpu.memory_space<vmem>>, vector<1x1x32x8xf32>
    %19 = vector.shape_cast %18 : vector<1x1x32x8xf32> to vector<32x8xf32>
    %cst_24 = arith.constant dense<0.000000e+00> : vector<16x8xf32>
    %20 = tpu.matmul %0, %19, %cst_24 {dimension_numbers = #tpu.dot_dimension_numbers<[1], [0], [0], [1], [0, 0, 1, 1], [], []>} : vector<16x32xf32>, vector<32x8xf32>, vector<16x8xf32> -> vector<16x8xf32>
    %c0_25 = arith.constant 0 : index
    %c8_26 = arith.constant 8 : index
    %c0_27 = arith.constant 0 : index
    %c0_28 = arith.constant 0 : index
    %21 = vector.load %arg4[%c0_25, %c8_26, %c0_27, %c0_28] : memref<2x12x1x8xf32, #tpu.memory_space<vmem>>, vector<1x1x1x8xf32>
    %22 = vector.shape_cast %21 : vector<1x1x1x8xf32> to vector<1x8xf32>
    %23 = vector.broadcast %22 : vector<1x8xf32> to vector<16x8xf32>
    %24 = arith.addf %20, %23 : vector<16x8xf32>
    %cst_29 = arith.constant dense<0.000000e+00> : vector<16x16xf32>
    %25 = tpu.matmul %10, %17, %cst_29 {dimension_numbers = #tpu.dot_dimension_numbers<[1], [1], [0], [0], [0, 0, 1, 0], [], []>} : vector<16x8xf32>, vector<16x8xf32>, vector<16x16xf32> -> vector<16x16xf32>
    %cst_30 = arith.constant 0.176776692 : f32
    %26 = vector.broadcast %cst_30 : f32 to vector<16x16xf32>
    %27 = arith.mulf %25, %26 : vector<16x16xf32>
    %28 = arith.addf %27, %2 : vector<16x16xf32>
    %cst_31 = arith.constant dense<0xFF800000> : vector<16xf32>
    %29 = vector.multi_reduction <maximumf>, %28, %cst_31 [1] : vector<16x16xf32> to vector<16xf32>
    %30 = vector.shape_cast %29 : vector<16xf32> to vector<16x1xf32>
    %31 = vector.broadcast %30 : vector<16x1xf32> to vector<16x16xf32>
    %32 = arith.subf %28, %31 : vector<16x16xf32>
    %33 = math.exp %32 : vector<16x16xf32>
    %cst_32 = arith.constant dense<0.000000e+00> : vector<16xf32>
    %34 = vector.multi_reduction <add>, %33, %cst_32 [1] : vector<16x16xf32> to vector<16xf32>
    %35 = vector.shape_cast %34 : vector<16xf32> to vector<16x1xf32>
    %36 = vector.broadcast %35 : vector<16x1xf32> to vector<16x16xf32>
    %37 = arith.divf %33, %36 : vector<16x16xf32>
    %cst_33 = arith.constant dense<0.000000e+00> : vector<16x8xf32>
    %38 = tpu.matmul %37, %24, %cst_33 {dimension_numbers = #tpu.dot_dimension_numbers<[1], [0], [0], [1], [0, 0, 1, 1], [], []>} : vector<16x16xf32>, vector<16x8xf32>, vector<16x8xf32> -> vector<16x8xf32>
    %c0_34 = arith.constant 0 : index
    %c0_35 = arith.constant 0 : index
    %c0_36 = arith.constant 0 : index
    %c0_37 = arith.constant 0 : index
    %39 = vector.load %arg5[%c0_34, %c0_35, %c0_36, %c0_37] : memref<2x4x8x32xf32, #tpu.memory_space<vmem>>, vector<1x1x8x32xf32>
    %40 = vector.shape_cast %39 : vector<1x1x8x32xf32> to vector<8x32xf32>
    %cst_38 = arith.constant dense<0.000000e+00> : vector<16x32xf32>
    %41 = tpu.matmul %38, %40, %cst_38 {dimension_numbers = #tpu.dot_dimension_numbers<[1], [0], [0], [1], [0, 0, 1, 1], [], []>} : vector<16x8xf32>, vector<8x32xf32>, vector<16x32xf32> -> vector<16x32xf32>
    %42 = arith.addf %3, %41 : vector<16x32xf32>
    %c0_39 = arith.constant 0 : index
    %c1 = arith.constant 1 : index
    %c0_40 = arith.constant 0 : index
    %c0_41 = arith.constant 0 : index
    %43 = vector.load %arg3[%c0_39, %c1, %c0_40, %c0_41] : memref<2x12x32x8xf32, #tpu.memory_space<vmem>>, vector<1x1x32x8xf32>
    %44 = vector.shape_cast %43 : vector<1x1x32x8xf32> to vector<32x8xf32>
    %cst_42 = arith.constant dense<0.000000e+00> : vector<16x8xf32>
    %45 = tpu.matmul %0, %44, %cst_42 {dimension_numbers = #tpu.dot_dimension_numbers<[1], [0], [0], [1], [0, 0, 1, 1], [], []>} : vector<16x32xf32>, vector<32x8xf32>, vector<16x8xf32> -> vector<16x8xf32>
    %c0_43 = arith.constant 0 : index
    %c1_44 = arith.constant 1 : index
    %c0_45 = arith.constant 0 : index
    %c0_46 = arith.constant 0 : index
    %46 = vector.load %arg4[%c0_43, %c1_44, %c0_45, %c0_46] : memref<2x12x1x8xf32, #tpu.memory_space<vmem>>, vector<1x1x1x8xf32>
    %47 = vector.shape_cast %46 : vector<1x1x1x8xf32> to vector<1x8xf32>
    %48 = vector.broadcast %47 : vector<1x8xf32> to vector<16x8xf32>
    %49 = arith.addf %45, %48 : vector<16x8xf32>
    %c0_47 = arith.constant 0 : index
    %c5 = arith.constant 5 : index
    %c0_48 = arith.constant 0 : index
    %c0_49 = arith.constant 0 : index
    %50 = vector.load %arg3[%c0_47, %c5, %c0_48, %c0_49] : memref<2x12x32x8xf32, #tpu.memory_space<vmem>>, vector<1x1x32x8xf32>
    %51 = vector.shape_cast %50 : vector<1x1x32x8xf32> to vector<32x8xf32>
    %cst_50 = arith.constant dense<0.000000e+00> : vector<16x8xf32>
    %52 = tpu.matmul %0, %51, %cst_50 {dimension_numbers = #tpu.dot_dimension_numbers<[1], [0], [0], [1], [0, 0, 1, 1], [], []>} : vector<16x32xf32>, vector<32x8xf32>, vector<16x8xf32> -> vector<16x8xf32>
    %c0_51 = arith.constant 0 : index
    %c5_52 = arith.constant 5 : index
    %c0_53 = arith.constant 0 : index
    %c0_54 = arith.constant 0 : index
    %53 = vector.load %arg4[%c0_51, %c5_52, %c0_53, %c0_54] : memref<2x12x1x8xf32, #tpu.memory_space<vmem>>, vector<1x1x1x8xf32>
    %54 = vector.shape_cast %53 : vector<1x1x1x8xf32> to vector<1x8xf32>
    %55 = vector.broadcast %54 : vector<1x8xf32> to vector<16x8xf32>
    %56 = arith.addf %52, %55 : vector<16x8xf32>
    %c0_55 = arith.constant 0 : index
    %c9 = arith.constant 9 : index
    %c0_56 = arith.constant 0 : index
    %c0_57 = arith.constant 0 : index
    %57 = vector.load %arg3[%c0_55, %c9, %c0_56, %c0_57] : memref<2x12x32x8xf32, #tpu.memory_space<vmem>>, vector<1x1x32x8xf32>
    %58 = vector.shape_cast %57 : vector<1x1x32x8xf32> to vector<32x8xf32>
    %cst_58 = arith.constant dense<0.000000e+00> : vector<16x8xf32>
    %59 = tpu.matmul %0, %58, %cst_58 {dimension_numbers = #tpu.dot_dimension_numbers<[1], [0], [0], [1], [0, 0, 1, 1], [], []>} : vector<16x32xf32>, vector<32x8xf32>, vector<16x8xf32> -> vector<16x8xf32>
    %c0_59 = arith.constant 0 : index
    %c9_60 = arith.constant 9 : index
    %c0_61 = arith.constant 0 : index
    %c0_62 = arith.constant 0 : index
    %60 = vector.load %arg4[%c0_59, %c9_60, %c0_61, %c0_62] : memref<2x12x1x8xf32, #tpu.memory_space<vmem>>, vector<1x1x1x8xf32>
    %61 = vector.shape_cast %60 : vector<1x1x1x8xf32> to vector<1x8xf32>
    %62 = vector.broadcast %61 : vector<1x8xf32> to vector<16x8xf32>
    %63 = arith.addf %59, %62 : vector<16x8xf32>
    %cst_63 = arith.constant dense<0.000000e+00> : vector<16x16xf32>
    %64 = tpu.matmul %49, %56, %cst_63 {dimension_numbers = #tpu.dot_dimension_numbers<[1], [1], [0], [0], [0, 0, 1, 0], [], []>} : vector<16x8xf32>, vector<16x8xf32>, vector<16x16xf32> -> vector<16x16xf32>
    %cst_64 = arith.constant 0.176776692 : f32
    %65 = vector.broadcast %cst_64 : f32 to vector<16x16xf32>
    %66 = arith.mulf %64, %65 : vector<16x16xf32>
    %67 = arith.addf %66, %2 : vector<16x16xf32>
    %cst_65 = arith.constant dense<0xFF800000> : vector<16xf32>
    %68 = vector.multi_reduction <maximumf>, %67, %cst_65 [1] : vector<16x16xf32> to vector<16xf32>
    %69 = vector.shape_cast %68 : vector<16xf32> to vector<16x1xf32>
    %70 = vector.broadcast %69 : vector<16x1xf32> to vector<16x16xf32>
    %71 = arith.subf %67, %70 : vector<16x16xf32>
    %72 = math.exp %71 : vector<16x16xf32>
    %cst_66 = arith.constant dense<0.000000e+00> : vector<16xf32>
    %73 = vector.multi_reduction <add>, %72, %cst_66 [1] : vector<16x16xf32> to vector<16xf32>
    %74 = vector.shape_cast %73 : vector<16xf32> to vector<16x1xf32>
    %75 = vector.broadcast %74 : vector<16x1xf32> to vector<16x16xf32>
    %76 = arith.divf %72, %75 : vector<16x16xf32>
    %cst_67 = arith.constant dense<0.000000e+00> : vector<16x8xf32>
    %77 = tpu.matmul %76, %63, %cst_67 {dimension_numbers = #tpu.dot_dimension_numbers<[1], [0], [0], [1], [0, 0, 1, 1], [], []>} : vector<16x16xf32>, vector<16x8xf32>, vector<16x8xf32> -> vector<16x8xf32>
    %c0_68 = arith.constant 0 : index
    %c1_69 = arith.constant 1 : index
    %c0_70 = arith.constant 0 : index
    %c0_71 = arith.constant 0 : index
    %78 = vector.load %arg5[%c0_68, %c1_69, %c0_70, %c0_71] : memref<2x4x8x32xf32, #tpu.memory_space<vmem>>, vector<1x1x8x32xf32>
    %79 = vector.shape_cast %78 : vector<1x1x8x32xf32> to vector<8x32xf32>
    %cst_72 = arith.constant dense<0.000000e+00> : vector<16x32xf32>
    %80 = tpu.matmul %77, %79, %cst_72 {dimension_numbers = #tpu.dot_dimension_numbers<[1], [0], [0], [1], [0, 0, 1, 1], [], []>} : vector<16x8xf32>, vector<8x32xf32>, vector<16x32xf32> -> vector<16x32xf32>
    %81 = arith.addf %42, %80 : vector<16x32xf32>
    %c0_73 = arith.constant 0 : index
    %c2 = arith.constant 2 : index
    %c0_74 = arith.constant 0 : index
    %c0_75 = arith.constant 0 : index
    %82 = vector.load %arg3[%c0_73, %c2, %c0_74, %c0_75] : memref<2x12x32x8xf32, #tpu.memory_space<vmem>>, vector<1x1x32x8xf32>
    %83 = vector.shape_cast %82 : vector<1x1x32x8xf32> to vector<32x8xf32>
    %cst_76 = arith.constant dense<0.000000e+00> : vector<16x8xf32>
    %84 = tpu.matmul %0, %83, %cst_76 {dimension_numbers = #tpu.dot_dimension_numbers<[1], [0], [0], [1], [0, 0, 1, 1], [], []>} : vector<16x32xf32>, vector<32x8xf32>, vector<16x8xf32> -> vector<16x8xf32>
    %c0_77 = arith.constant 0 : index
    %c2_78 = arith.constant 2 : index
    %c0_79 = arith.constant 0 : index
    %c0_80 = arith.constant 0 : index
    %85 = vector.load %arg4[%c0_77, %c2_78, %c0_79, %c0_80] : memref<2x12x1x8xf32, #tpu.memory_space<vmem>>, vector<1x1x1x8xf32>
    %86 = vector.shape_cast %85 : vector<1x1x1x8xf32> to vector<1x8xf32>
    %87 = vector.broadcast %86 : vector<1x8xf32> to vector<16x8xf32>
    %88 = arith.addf %84, %87 : vector<16x8xf32>
    %c0_81 = arith.constant 0 : index
    %c6 = arith.constant 6 : index
    %c0_82 = arith.constant 0 : index
    %c0_83 = arith.constant 0 : index
    %89 = vector.load %arg3[%c0_81, %c6, %c0_82, %c0_83] : memref<2x12x32x8xf32, #tpu.memory_space<vmem>>, vector<1x1x32x8xf32>
    %90 = vector.shape_cast %89 : vector<1x1x32x8xf32> to vector<32x8xf32>
    %cst_84 = arith.constant dense<0.000000e+00> : vector<16x8xf32>
    %91 = tpu.matmul %0, %90, %cst_84 {dimension_numbers = #tpu.dot_dimension_numbers<[1], [0], [0], [1], [0, 0, 1, 1], [], []>} : vector<16x32xf32>, vector<32x8xf32>, vector<16x8xf32> -> vector<16x8xf32>
    %c0_85 = arith.constant 0 : index
    %c6_86 = arith.constant 6 : index
    %c0_87 = arith.constant 0 : index
    %c0_88 = arith.constant 0 : index
    %92 = vector.load %arg4[%c0_85, %c6_86, %c0_87, %c0_88] : memref<2x12x1x8xf32, #tpu.memory_space<vmem>>, vector<1x1x1x8xf32>
    %93 = vector.shape_cast %92 : vector<1x1x1x8xf32> to vector<1x8xf32>
    %94 = vector.broadcast %93 : vector<1x8xf32> to vector<16x8xf32>
    %95 = arith.addf %91, %94 : vector<16x8xf32>
    %c0_89 = arith.constant 0 : index
    %c10 = arith.constant 10 : index
    %c0_90 = arith.constant 0 : index
    %c0_91 = arith.constant 0 : index
    %96 = vector.load %arg3[%c0_89, %c10, %c0_90, %c0_91] : memref<2x12x32x8xf32, #tpu.memory_space<vmem>>, vector<1x1x32x8xf32>
    %97 = vector.shape_cast %96 : vector<1x1x32x8xf32> to vector<32x8xf32>
    %cst_92 = arith.constant dense<0.000000e+00> : vector<16x8xf32>
    %98 = tpu.matmul %0, %97, %cst_92 {dimension_numbers = #tpu.dot_dimension_numbers<[1], [0], [0], [1], [0, 0, 1, 1], [], []>} : vector<16x32xf32>, vector<32x8xf32>, vector<16x8xf32> -> vector<16x8xf32>
    %c0_93 = arith.constant 0 : index
    %c10_94 = arith.constant 10 : index
    %c0_95 = arith.constant 0 : index
    %c0_96 = arith.constant 0 : index
    %99 = vector.load %arg4[%c0_93, %c10_94, %c0_95, %c0_96] : memref<2x12x1x8xf32, #tpu.memory_space<vmem>>, vector<1x1x1x8xf32>
    %100 = vector.shape_cast %99 : vector<1x1x1x8xf32> to vector<1x8xf32>
    %101 = vector.broadcast %100 : vector<1x8xf32> to vector<16x8xf32>
    %102 = arith.addf %98, %101 : vector<16x8xf32>
    %cst_97 = arith.constant dense<0.000000e+00> : vector<16x16xf32>
    %103 = tpu.matmul %88, %95, %cst_97 {dimension_numbers = #tpu.dot_dimension_numbers<[1], [1], [0], [0], [0, 0, 1, 0], [], []>} : vector<16x8xf32>, vector<16x8xf32>, vector<16x16xf32> -> vector<16x16xf32>
    %cst_98 = arith.constant 0.176776692 : f32
    %104 = vector.broadcast %cst_98 : f32 to vector<16x16xf32>
    %105 = arith.mulf %103, %104 : vector<16x16xf32>
    %106 = arith.addf %105, %2 : vector<16x16xf32>
    %cst_99 = arith.constant dense<0xFF800000> : vector<16xf32>
    %107 = vector.multi_reduction <maximumf>, %106, %cst_99 [1] : vector<16x16xf32> to vector<16xf32>
    %108 = vector.shape_cast %107 : vector<16xf32> to vector<16x1xf32>
    %109 = vector.broadcast %108 : vector<16x1xf32> to vector<16x16xf32>
    %110 = arith.subf %106, %109 : vector<16x16xf32>
    %111 = math.exp %110 : vector<16x16xf32>
    %cst_100 = arith.constant dense<0.000000e+00> : vector<16xf32>
    %112 = vector.multi_reduction <add>, %111, %cst_100 [1] : vector<16x16xf32> to vector<16xf32>
    %113 = vector.shape_cast %112 : vector<16xf32> to vector<16x1xf32>
    %114 = vector.broadcast %113 : vector<16x1xf32> to vector<16x16xf32>
    %115 = arith.divf %111, %114 : vector<16x16xf32>
    %cst_101 = arith.constant dense<0.000000e+00> : vector<16x8xf32>
    %116 = tpu.matmul %115, %102, %cst_101 {dimension_numbers = #tpu.dot_dimension_numbers<[1], [0], [0], [1], [0, 0, 1, 1], [], []>} : vector<16x16xf32>, vector<16x8xf32>, vector<16x8xf32> -> vector<16x8xf32>
    %c0_102 = arith.constant 0 : index
    %c2_103 = arith.constant 2 : index
    %c0_104 = arith.constant 0 : index
    %c0_105 = arith.constant 0 : index
    %117 = vector.load %arg5[%c0_102, %c2_103, %c0_104, %c0_105] : memref<2x4x8x32xf32, #tpu.memory_space<vmem>>, vector<1x1x8x32xf32>
    %118 = vector.shape_cast %117 : vector<1x1x8x32xf32> to vector<8x32xf32>
    %cst_106 = arith.constant dense<0.000000e+00> : vector<16x32xf32>
    %119 = tpu.matmul %116, %118, %cst_106 {dimension_numbers = #tpu.dot_dimension_numbers<[1], [0], [0], [1], [0, 0, 1, 1], [], []>} : vector<16x8xf32>, vector<8x32xf32>, vector<16x32xf32> -> vector<16x32xf32>
    %120 = arith.addf %81, %119 : vector<16x32xf32>
    %c0_107 = arith.constant 0 : index
    %c3 = arith.constant 3 : index
    %c0_108 = arith.constant 0 : index
    %c0_109 = arith.constant 0 : index
    %121 = vector.load %arg3[%c0_107, %c3, %c0_108, %c0_109] : memref<2x12x32x8xf32, #tpu.memory_space<vmem>>, vector<1x1x32x8xf32>
    %122 = vector.shape_cast %121 : vector<1x1x32x8xf32> to vector<32x8xf32>
    %cst_110 = arith.constant dense<0.000000e+00> : vector<16x8xf32>
    %123 = tpu.matmul %0, %122, %cst_110 {dimension_numbers = #tpu.dot_dimension_numbers<[1], [0], [0], [1], [0, 0, 1, 1], [], []>} : vector<16x32xf32>, vector<32x8xf32>, vector<16x8xf32> -> vector<16x8xf32>
    %c0_111 = arith.constant 0 : index
    %c3_112 = arith.constant 3 : index
    %c0_113 = arith.constant 0 : index
    %c0_114 = arith.constant 0 : index
    %124 = vector.load %arg4[%c0_111, %c3_112, %c0_113, %c0_114] : memref<2x12x1x8xf32, #tpu.memory_space<vmem>>, vector<1x1x1x8xf32>
    %125 = vector.shape_cast %124 : vector<1x1x1x8xf32> to vector<1x8xf32>
    %126 = vector.broadcast %125 : vector<1x8xf32> to vector<16x8xf32>
    %127 = arith.addf %123, %126 : vector<16x8xf32>
    %c0_115 = arith.constant 0 : index
    %c7 = arith.constant 7 : index
    %c0_116 = arith.constant 0 : index
    %c0_117 = arith.constant 0 : index
    %128 = vector.load %arg3[%c0_115, %c7, %c0_116, %c0_117] : memref<2x12x32x8xf32, #tpu.memory_space<vmem>>, vector<1x1x32x8xf32>
    %129 = vector.shape_cast %128 : vector<1x1x32x8xf32> to vector<32x8xf32>
    %cst_118 = arith.constant dense<0.000000e+00> : vector<16x8xf32>
    %130 = tpu.matmul %0, %129, %cst_118 {dimension_numbers = #tpu.dot_dimension_numbers<[1], [0], [0], [1], [0, 0, 1, 1], [], []>} : vector<16x32xf32>, vector<32x8xf32>, vector<16x8xf32> -> vector<16x8xf32>
    %c0_119 = arith.constant 0 : index
    %c7_120 = arith.constant 7 : index
    %c0_121 = arith.constant 0 : index
    %c0_122 = arith.constant 0 : index
    %131 = vector.load %arg4[%c0_119, %c7_120, %c0_121, %c0_122] : memref<2x12x1x8xf32, #tpu.memory_space<vmem>>, vector<1x1x1x8xf32>
    %132 = vector.shape_cast %131 : vector<1x1x1x8xf32> to vector<1x8xf32>
    %133 = vector.broadcast %132 : vector<1x8xf32> to vector<16x8xf32>
    %134 = arith.addf %130, %133 : vector<16x8xf32>
    %c0_123 = arith.constant 0 : index
    %c11 = arith.constant 11 : index
    %c0_124 = arith.constant 0 : index
    %c0_125 = arith.constant 0 : index
    %135 = vector.load %arg3[%c0_123, %c11, %c0_124, %c0_125] : memref<2x12x32x8xf32, #tpu.memory_space<vmem>>, vector<1x1x32x8xf32>
    %136 = vector.shape_cast %135 : vector<1x1x32x8xf32> to vector<32x8xf32>
    %cst_126 = arith.constant dense<0.000000e+00> : vector<16x8xf32>
    %137 = tpu.matmul %0, %136, %cst_126 {dimension_numbers = #tpu.dot_dimension_numbers<[1], [0], [0], [1], [0, 0, 1, 1], [], []>} : vector<16x32xf32>, vector<32x8xf32>, vector<16x8xf32> -> vector<16x8xf32>
    %c0_127 = arith.constant 0 : index
    %c11_128 = arith.constant 11 : index
    %c0_129 = arith.constant 0 : index
    %c0_130 = arith.constant 0 : index
    %138 = vector.load %arg4[%c0_127, %c11_128, %c0_129, %c0_130] : memref<2x12x1x8xf32, #tpu.memory_space<vmem>>, vector<1x1x1x8xf32>
    %139 = vector.shape_cast %138 : vector<1x1x1x8xf32> to vector<1x8xf32>
    %140 = vector.broadcast %139 : vector<1x8xf32> to vector<16x8xf32>
    %141 = arith.addf %137, %140 : vector<16x8xf32>
    %cst_131 = arith.constant dense<0.000000e+00> : vector<16x16xf32>
    %142 = tpu.matmul %127, %134, %cst_131 {dimension_numbers = #tpu.dot_dimension_numbers<[1], [1], [0], [0], [0, 0, 1, 0], [], []>} : vector<16x8xf32>, vector<16x8xf32>, vector<16x16xf32> -> vector<16x16xf32>
    %cst_132 = arith.constant 0.176776692 : f32
    %143 = vector.broadcast %cst_132 : f32 to vector<16x16xf32>
    %144 = arith.mulf %142, %143 : vector<16x16xf32>
    %145 = arith.addf %144, %2 : vector<16x16xf32>
    %cst_133 = arith.constant dense<0xFF800000> : vector<16xf32>
    %146 = vector.multi_reduction <maximumf>, %145, %cst_133 [1] : vector<16x16xf32> to vector<16xf32>
    %147 = vector.shape_cast %146 : vector<16xf32> to vector<16x1xf32>
    %148 = vector.broadcast %147 : vector<16x1xf32> to vector<16x16xf32>
    %149 = arith.subf %145, %148 : vector<16x16xf32>
    %150 = math.exp %149 : vector<16x16xf32>
    %cst_134 = arith.constant dense<0.000000e+00> : vector<16xf32>
    %151 = vector.multi_reduction <add>, %150, %cst_134 [1] : vector<16x16xf32> to vector<16xf32>
    %152 = vector.shape_cast %151 : vector<16xf32> to vector<16x1xf32>
    %153 = vector.broadcast %152 : vector<16x1xf32> to vector<16x16xf32>
    %154 = arith.divf %150, %153 : vector<16x16xf32>
    %cst_135 = arith.constant dense<0.000000e+00> : vector<16x8xf32>
    %155 = tpu.matmul %154, %141, %cst_135 {dimension_numbers = #tpu.dot_dimension_numbers<[1], [0], [0], [1], [0, 0, 1, 1], [], []>} : vector<16x16xf32>, vector<16x8xf32>, vector<16x8xf32> -> vector<16x8xf32>
    %c0_136 = arith.constant 0 : index
    %c3_137 = arith.constant 3 : index
    %c0_138 = arith.constant 0 : index
    %c0_139 = arith.constant 0 : index
    %156 = vector.load %arg5[%c0_136, %c3_137, %c0_138, %c0_139] : memref<2x4x8x32xf32, #tpu.memory_space<vmem>>, vector<1x1x8x32xf32>
    %157 = vector.shape_cast %156 : vector<1x1x8x32xf32> to vector<8x32xf32>
    %cst_140 = arith.constant dense<0.000000e+00> : vector<16x32xf32>
    %158 = tpu.matmul %155, %157, %cst_140 {dimension_numbers = #tpu.dot_dimension_numbers<[1], [0], [0], [1], [0, 0, 1, 1], [], []>} : vector<16x8xf32>, vector<8x32xf32>, vector<16x32xf32> -> vector<16x32xf32>
    %159 = arith.addf %120, %158 : vector<16x32xf32>
    %c0_141 = arith.constant 0 : index
    %c0_142 = arith.constant 0 : index
    %c0_143 = arith.constant 0 : index
    %160 = vector.load %arg6[%c0_141, %c0_142, %c0_143] : memref<2x1x32xf32, #tpu.memory_space<vmem>>, vector<1x1x32xf32>
    %161 = vector.shape_cast %160 : vector<1x1x32xf32> to vector<1x32xf32>
    %162 = vector.broadcast %161 : vector<1x32xf32> to vector<16x32xf32>
    %163 = arith.addf %159, %162 : vector<16x32xf32>
    %164 = arith.addf %163, %0 : vector<16x32xf32>
    %cst_144 = arith.constant dense<0.000000e+00> : vector<16xf32>
    %165 = vector.multi_reduction <add>, %164, %cst_144 [1] : vector<16x32xf32> to vector<16xf32>
    %166 = vector.shape_cast %165 : vector<16xf32> to vector<16x1xf32>
    %cst_145 = arith.constant 3.200000e+01 : f32
    %167 = vector.broadcast %cst_145 : f32 to vector<16x1xf32>
    %168 = arith.divf %166, %167 : vector<16x1xf32>
    %169 = vector.broadcast %168 : vector<16x1xf32> to vector<16x32xf32>
    %170 = arith.subf %164, %169 : vector<16x32xf32>
    %171 = arith.mulf %170, %170 : vector<16x32xf32>
    %cst_146 = arith.constant dense<0.000000e+00> : vector<16xf32>
    %172 = vector.multi_reduction <add>, %171, %cst_146 [1] : vector<16x32xf32> to vector<16xf32>
    %173 = vector.shape_cast %172 : vector<16xf32> to vector<16x1xf32>
    %cst_147 = arith.constant 3.200000e+01 : f32
    %174 = vector.broadcast %cst_147 : f32 to vector<16x1xf32>
    %175 = arith.divf %173, %174 : vector<16x1xf32>
    %176 = vector.broadcast %168 : vector<16x1xf32> to vector<16x32xf32>
    %177 = arith.subf %164, %176 : vector<16x32xf32>
    %cst_148 = arith.constant 9.99999974E-6 : f32
    %178 = vector.broadcast %cst_148 : f32 to vector<16x1xf32>
    %179 = arith.addf %175, %178 : vector<16x1xf32>
    %180 = math.rsqrt %179 : vector<16x1xf32>
    %181 = vector.broadcast %180 : vector<16x1xf32> to vector<16x32xf32>
    %182 = arith.mulf %177, %181 : vector<16x32xf32>
    %c0_149 = arith.constant 0 : index
    %c0_150 = arith.constant 0 : index
    %c0_151 = arith.constant 0 : index
    %c0_152 = arith.constant 0 : index
    %183 = vector.load %arg7[%c0_149, %c0_150, %c0_151, %c0_152] : memref<4x2x1x32xf32, #tpu.memory_space<vmem>>, vector<1x1x1x32xf32>
    %184 = vector.shape_cast %183 : vector<1x1x1x32xf32> to vector<1x32xf32>
    %185 = vector.broadcast %184 : vector<1x32xf32> to vector<16x32xf32>
    %186 = arith.mulf %182, %185 : vector<16x32xf32>
    %c0_153 = arith.constant 0 : index
    %c1_154 = arith.constant 1 : index
    %c0_155 = arith.constant 0 : index
    %c0_156 = arith.constant 0 : index
    %187 = vector.load %arg7[%c0_153, %c1_154, %c0_155, %c0_156] : memref<4x2x1x32xf32, #tpu.memory_space<vmem>>, vector<1x1x1x32xf32>
    %188 = vector.shape_cast %187 : vector<1x1x1x32xf32> to vector<1x32xf32>
    %189 = vector.broadcast %188 : vector<1x32xf32> to vector<16x32xf32>
    %190 = arith.addf %186, %189 : vector<16x32xf32>
    %c1_157 = arith.constant 1 : index
    %c0_158 = arith.constant 0 : index
    %c0_159 = arith.constant 0 : index
    %191 = vector.load %arg2[%c1_157, %c0_158, %c0_159] : memref<2x16x16xf32, #tpu.memory_space<vmem>>, vector<1x16x16xf32>
    %192 = vector.shape_cast %191 : vector<1x16x16xf32> to vector<16x16xf32>
    %cst_160 = arith.constant 0.000000e+00 : f32
    %193 = vector.broadcast %cst_160 : f32 to vector<16x32xf32>
    %c1_161 = arith.constant 1 : index
    %c0_162 = arith.constant 0 : index
    %c0_163 = arith.constant 0 : index
    %c0_164 = arith.constant 0 : index
    %194 = vector.load %arg3[%c1_161, %c0_162, %c0_163, %c0_164] : memref<2x12x32x8xf32, #tpu.memory_space<vmem>>, vector<1x1x32x8xf32>
    %195 = vector.shape_cast %194 : vector<1x1x32x8xf32> to vector<32x8xf32>
    %cst_165 = arith.constant dense<0.000000e+00> : vector<16x8xf32>
    %196 = tpu.matmul %190, %195, %cst_165 {dimension_numbers = #tpu.dot_dimension_numbers<[1], [0], [0], [1], [0, 0, 1, 1], [], []>} : vector<16x32xf32>, vector<32x8xf32>, vector<16x8xf32> -> vector<16x8xf32>
    %c1_166 = arith.constant 1 : index
    %c0_167 = arith.constant 0 : index
    %c0_168 = arith.constant 0 : index
    %c0_169 = arith.constant 0 : index
    %197 = vector.load %arg4[%c1_166, %c0_167, %c0_168, %c0_169] : memref<2x12x1x8xf32, #tpu.memory_space<vmem>>, vector<1x1x1x8xf32>
    %198 = vector.shape_cast %197 : vector<1x1x1x8xf32> to vector<1x8xf32>
    %199 = vector.broadcast %198 : vector<1x8xf32> to vector<16x8xf32>
    %200 = arith.addf %196, %199 : vector<16x8xf32>
    %c1_170 = arith.constant 1 : index
    %c4_171 = arith.constant 4 : index
    %c0_172 = arith.constant 0 : index
    %c0_173 = arith.constant 0 : index
    %201 = vector.load %arg3[%c1_170, %c4_171, %c0_172, %c0_173] : memref<2x12x32x8xf32, #tpu.memory_space<vmem>>, vector<1x1x32x8xf32>
    %202 = vector.shape_cast %201 : vector<1x1x32x8xf32> to vector<32x8xf32>
    %cst_174 = arith.constant dense<0.000000e+00> : vector<16x8xf32>
    %203 = tpu.matmul %190, %202, %cst_174 {dimension_numbers = #tpu.dot_dimension_numbers<[1], [0], [0], [1], [0, 0, 1, 1], [], []>} : vector<16x32xf32>, vector<32x8xf32>, vector<16x8xf32> -> vector<16x8xf32>
    %c1_175 = arith.constant 1 : index
    %c4_176 = arith.constant 4 : index
    %c0_177 = arith.constant 0 : index
    %c0_178 = arith.constant 0 : index
    %204 = vector.load %arg4[%c1_175, %c4_176, %c0_177, %c0_178] : memref<2x12x1x8xf32, #tpu.memory_space<vmem>>, vector<1x1x1x8xf32>
    %205 = vector.shape_cast %204 : vector<1x1x1x8xf32> to vector<1x8xf32>
    %206 = vector.broadcast %205 : vector<1x8xf32> to vector<16x8xf32>
    %207 = arith.addf %203, %206 : vector<16x8xf32>
    %c1_179 = arith.constant 1 : index
    %c8_180 = arith.constant 8 : index
    %c0_181 = arith.constant 0 : index
    %c0_182 = arith.constant 0 : index
    %208 = vector.load %arg3[%c1_179, %c8_180, %c0_181, %c0_182] : memref<2x12x32x8xf32, #tpu.memory_space<vmem>>, vector<1x1x32x8xf32>
    %209 = vector.shape_cast %208 : vector<1x1x32x8xf32> to vector<32x8xf32>
    %cst_183 = arith.constant dense<0.000000e+00> : vector<16x8xf32>
    %210 = tpu.matmul %190, %209, %cst_183 {dimension_numbers = #tpu.dot_dimension_numbers<[1], [0], [0], [1], [0, 0, 1, 1], [], []>} : vector<16x32xf32>, vector<32x8xf32>, vector<16x8xf32> -> vector<16x8xf32>
    %c1_184 = arith.constant 1 : index
    %c8_185 = arith.constant 8 : index
    %c0_186 = arith.constant 0 : index
    %c0_187 = arith.constant 0 : index
    %211 = vector.load %arg4[%c1_184, %c8_185, %c0_186, %c0_187] : memref<2x12x1x8xf32, #tpu.memory_space<vmem>>, vector<1x1x1x8xf32>
    %212 = vector.shape_cast %211 : vector<1x1x1x8xf32> to vector<1x8xf32>
    %213 = vector.broadcast %212 : vector<1x8xf32> to vector<16x8xf32>
    %214 = arith.addf %210, %213 : vector<16x8xf32>
    %cst_188 = arith.constant dense<0.000000e+00> : vector<16x16xf32>
    %215 = tpu.matmul %200, %207, %cst_188 {dimension_numbers = #tpu.dot_dimension_numbers<[1], [1], [0], [0], [0, 0, 1, 0], [], []>} : vector<16x8xf32>, vector<16x8xf32>, vector<16x16xf32> -> vector<16x16xf32>
    %cst_189 = arith.constant 0.176776692 : f32
    %216 = vector.broadcast %cst_189 : f32 to vector<16x16xf32>
    %217 = arith.mulf %215, %216 : vector<16x16xf32>
    %218 = arith.addf %217, %192 : vector<16x16xf32>
    %cst_190 = arith.constant dense<0xFF800000> : vector<16xf32>
    %219 = vector.multi_reduction <maximumf>, %218, %cst_190 [1] : vector<16x16xf32> to vector<16xf32>
    %220 = vector.shape_cast %219 : vector<16xf32> to vector<16x1xf32>
    %221 = vector.broadcast %220 : vector<16x1xf32> to vector<16x16xf32>
    %222 = arith.subf %218, %221 : vector<16x16xf32>
    %223 = math.exp %222 : vector<16x16xf32>
    %cst_191 = arith.constant dense<0.000000e+00> : vector<16xf32>
    %224 = vector.multi_reduction <add>, %223, %cst_191 [1] : vector<16x16xf32> to vector<16xf32>
    %225 = vector.shape_cast %224 : vector<16xf32> to vector<16x1xf32>
    %226 = vector.broadcast %225 : vector<16x1xf32> to vector<16x16xf32>
    %227 = arith.divf %223, %226 : vector<16x16xf32>
    %cst_192 = arith.constant dense<0.000000e+00> : vector<16x8xf32>
    %228 = tpu.matmul %227, %214, %cst_192 {dimension_numbers = #tpu.dot_dimension_numbers<[1], [0], [0], [1], [0, 0, 1, 1], [], []>} : vector<16x16xf32>, vector<16x8xf32>, vector<16x8xf32> -> vector<16x8xf32>
    %c1_193 = arith.constant 1 : index
    %c0_194 = arith.constant 0 : index
    %c0_195 = arith.constant 0 : index
    %c0_196 = arith.constant 0 : index
    %229 = vector.load %arg5[%c1_193, %c0_194, %c0_195, %c0_196] : memref<2x4x8x32xf32, #tpu.memory_space<vmem>>, vector<1x1x8x32xf32>
    %230 = vector.shape_cast %229 : vector<1x1x8x32xf32> to vector<8x32xf32>
    %cst_197 = arith.constant dense<0.000000e+00> : vector<16x32xf32>
    %231 = tpu.matmul %228, %230, %cst_197 {dimension_numbers = #tpu.dot_dimension_numbers<[1], [0], [0], [1], [0, 0, 1, 1], [], []>} : vector<16x8xf32>, vector<8x32xf32>, vector<16x32xf32> -> vector<16x32xf32>
    %232 = arith.addf %193, %231 : vector<16x32xf32>
    %c1_198 = arith.constant 1 : index
    %c1_199 = arith.constant 1 : index
    %c0_200 = arith.constant 0 : index
    %c0_201 = arith.constant 0 : index
    %233 = vector.load %arg3[%c1_198, %c1_199, %c0_200, %c0_201] : memref<2x12x32x8xf32, #tpu.memory_space<vmem>>, vector<1x1x32x8xf32>
    %234 = vector.shape_cast %233 : vector<1x1x32x8xf32> to vector<32x8xf32>
    %cst_202 = arith.constant dense<0.000000e+00> : vector<16x8xf32>
    %235 = tpu.matmul %190, %234, %cst_202 {dimension_numbers = #tpu.dot_dimension_numbers<[1], [0], [0], [1], [0, 0, 1, 1], [], []>} : vector<16x32xf32>, vector<32x8xf32>, vector<16x8xf32> -> vector<16x8xf32>
    %c1_203 = arith.constant 1 : index
    %c1_204 = arith.constant 1 : index
    %c0_205 = arith.constant 0 : index
    %c0_206 = arith.constant 0 : index
    %236 = vector.load %arg4[%c1_203, %c1_204, %c0_205, %c0_206] : memref<2x12x1x8xf32, #tpu.memory_space<vmem>>, vector<1x1x1x8xf32>
    %237 = vector.shape_cast %236 : vector<1x1x1x8xf32> to vector<1x8xf32>
    %238 = vector.broadcast %237 : vector<1x8xf32> to vector<16x8xf32>
    %239 = arith.addf %235, %238 : vector<16x8xf32>
    %c1_207 = arith.constant 1 : index
    %c5_208 = arith.constant 5 : index
    %c0_209 = arith.constant 0 : index
    %c0_210 = arith.constant 0 : index
    %240 = vector.load %arg3[%c1_207, %c5_208, %c0_209, %c0_210] : memref<2x12x32x8xf32, #tpu.memory_space<vmem>>, vector<1x1x32x8xf32>
    %241 = vector.shape_cast %240 : vector<1x1x32x8xf32> to vector<32x8xf32>
    %cst_211 = arith.constant dense<0.000000e+00> : vector<16x8xf32>
    %242 = tpu.matmul %190, %241, %cst_211 {dimension_numbers = #tpu.dot_dimension_numbers<[1], [0], [0], [1], [0, 0, 1, 1], [], []>} : vector<16x32xf32>, vector<32x8xf32>, vector<16x8xf32> -> vector<16x8xf32>
    %c1_212 = arith.constant 1 : index
    %c5_213 = arith.constant 5 : index
    %c0_214 = arith.constant 0 : index
    %c0_215 = arith.constant 0 : index
    %243 = vector.load %arg4[%c1_212, %c5_213, %c0_214, %c0_215] : memref<2x12x1x8xf32, #tpu.memory_space<vmem>>, vector<1x1x1x8xf32>
    %244 = vector.shape_cast %243 : vector<1x1x1x8xf32> to vector<1x8xf32>
    %245 = vector.broadcast %244 : vector<1x8xf32> to vector<16x8xf32>
    %246 = arith.addf %242, %245 : vector<16x8xf32>
    %c1_216 = arith.constant 1 : index
    %c9_217 = arith.constant 9 : index
    %c0_218 = arith.constant 0 : index
    %c0_219 = arith.constant 0 : index
    %247 = vector.load %arg3[%c1_216, %c9_217, %c0_218, %c0_219] : memref<2x12x32x8xf32, #tpu.memory_space<vmem>>, vector<1x1x32x8xf32>
    %248 = vector.shape_cast %247 : vector<1x1x32x8xf32> to vector<32x8xf32>
    %cst_220 = arith.constant dense<0.000000e+00> : vector<16x8xf32>
    %249 = tpu.matmul %190, %248, %cst_220 {dimension_numbers = #tpu.dot_dimension_numbers<[1], [0], [0], [1], [0, 0, 1, 1], [], []>} : vector<16x32xf32>, vector<32x8xf32>, vector<16x8xf32> -> vector<16x8xf32>
    %c1_221 = arith.constant 1 : index
    %c9_222 = arith.constant 9 : index
    %c0_223 = arith.constant 0 : index
    %c0_224 = arith.constant 0 : index
    %250 = vector.load %arg4[%c1_221, %c9_222, %c0_223, %c0_224] : memref<2x12x1x8xf32, #tpu.memory_space<vmem>>, vector<1x1x1x8xf32>
    %251 = vector.shape_cast %250 : vector<1x1x1x8xf32> to vector<1x8xf32>
    %252 = vector.broadcast %251 : vector<1x8xf32> to vector<16x8xf32>
    %253 = arith.addf %249, %252 : vector<16x8xf32>
    %cst_225 = arith.constant dense<0.000000e+00> : vector<16x16xf32>
    %254 = tpu.matmul %239, %246, %cst_225 {dimension_numbers = #tpu.dot_dimension_numbers<[1], [1], [0], [0], [0, 0, 1, 0], [], []>} : vector<16x8xf32>, vector<16x8xf32>, vector<16x16xf32> -> vector<16x16xf32>
    %cst_226 = arith.constant 0.176776692 : f32
    %255 = vector.broadcast %cst_226 : f32 to vector<16x16xf32>
    %256 = arith.mulf %254, %255 : vector<16x16xf32>
    %257 = arith.addf %256, %192 : vector<16x16xf32>
    %cst_227 = arith.constant dense<0xFF800000> : vector<16xf32>
    %258 = vector.multi_reduction <maximumf>, %257, %cst_227 [1] : vector<16x16xf32> to vector<16xf32>
    %259 = vector.shape_cast %258 : vector<16xf32> to vector<16x1xf32>
    %260 = vector.broadcast %259 : vector<16x1xf32> to vector<16x16xf32>
    %261 = arith.subf %257, %260 : vector<16x16xf32>
    %262 = math.exp %261 : vector<16x16xf32>
    %cst_228 = arith.constant dense<0.000000e+00> : vector<16xf32>
    %263 = vector.multi_reduction <add>, %262, %cst_228 [1] : vector<16x16xf32> to vector<16xf32>
    %264 = vector.shape_cast %263 : vector<16xf32> to vector<16x1xf32>
    %265 = vector.broadcast %264 : vector<16x1xf32> to vector<16x16xf32>
    %266 = arith.divf %262, %265 : vector<16x16xf32>
    %cst_229 = arith.constant dense<0.000000e+00> : vector<16x8xf32>
    %267 = tpu.matmul %266, %253, %cst_229 {dimension_numbers = #tpu.dot_dimension_numbers<[1], [0], [0], [1], [0, 0, 1, 1], [], []>} : vector<16x16xf32>, vector<16x8xf32>, vector<16x8xf32> -> vector<16x8xf32>
    %c1_230 = arith.constant 1 : index
    %c1_231 = arith.constant 1 : index
    %c0_232 = arith.constant 0 : index
    %c0_233 = arith.constant 0 : index
    %268 = vector.load %arg5[%c1_230, %c1_231, %c0_232, %c0_233] : memref<2x4x8x32xf32, #tpu.memory_space<vmem>>, vector<1x1x8x32xf32>
    %269 = vector.shape_cast %268 : vector<1x1x8x32xf32> to vector<8x32xf32>
    %cst_234 = arith.constant dense<0.000000e+00> : vector<16x32xf32>
    %270 = tpu.matmul %267, %269, %cst_234 {dimension_numbers = #tpu.dot_dimension_numbers<[1], [0], [0], [1], [0, 0, 1, 1], [], []>} : vector<16x8xf32>, vector<8x32xf32>, vector<16x32xf32> -> vector<16x32xf32>
    %271 = arith.addf %232, %270 : vector<16x32xf32>
    %c1_235 = arith.constant 1 : index
    %c2_236 = arith.constant 2 : index
    %c0_237 = arith.constant 0 : index
    %c0_238 = arith.constant 0 : index
    %272 = vector.load %arg3[%c1_235, %c2_236, %c0_237, %c0_238] : memref<2x12x32x8xf32, #tpu.memory_space<vmem>>, vector<1x1x32x8xf32>
    %273 = vector.shape_cast %272 : vector<1x1x32x8xf32> to vector<32x8xf32>
    %cst_239 = arith.constant dense<0.000000e+00> : vector<16x8xf32>
    %274 = tpu.matmul %190, %273, %cst_239 {dimension_numbers = #tpu.dot_dimension_numbers<[1], [0], [0], [1], [0, 0, 1, 1], [], []>} : vector<16x32xf32>, vector<32x8xf32>, vector<16x8xf32> -> vector<16x8xf32>
    %c1_240 = arith.constant 1 : index
    %c2_241 = arith.constant 2 : index
    %c0_242 = arith.constant 0 : index
    %c0_243 = arith.constant 0 : index
    %275 = vector.load %arg4[%c1_240, %c2_241, %c0_242, %c0_243] : memref<2x12x1x8xf32, #tpu.memory_space<vmem>>, vector<1x1x1x8xf32>
    %276 = vector.shape_cast %275 : vector<1x1x1x8xf32> to vector<1x8xf32>
    %277 = vector.broadcast %276 : vector<1x8xf32> to vector<16x8xf32>
    %278 = arith.addf %274, %277 : vector<16x8xf32>
    %c1_244 = arith.constant 1 : index
    %c6_245 = arith.constant 6 : index
    %c0_246 = arith.constant 0 : index
    %c0_247 = arith.constant 0 : index
    %279 = vector.load %arg3[%c1_244, %c6_245, %c0_246, %c0_247] : memref<2x12x32x8xf32, #tpu.memory_space<vmem>>, vector<1x1x32x8xf32>
    %280 = vector.shape_cast %279 : vector<1x1x32x8xf32> to vector<32x8xf32>
    %cst_248 = arith.constant dense<0.000000e+00> : vector<16x8xf32>
    %281 = tpu.matmul %190, %280, %cst_248 {dimension_numbers = #tpu.dot_dimension_numbers<[1], [0], [0], [1], [0, 0, 1, 1], [], []>} : vector<16x32xf32>, vector<32x8xf32>, vector<16x8xf32> -> vector<16x8xf32>
    %c1_249 = arith.constant 1 : index
    %c6_250 = arith.constant 6 : index
    %c0_251 = arith.constant 0 : index
    %c0_252 = arith.constant 0 : index
    %282 = vector.load %arg4[%c1_249, %c6_250, %c0_251, %c0_252] : memref<2x12x1x8xf32, #tpu.memory_space<vmem>>, vector<1x1x1x8xf32>
    %283 = vector.shape_cast %282 : vector<1x1x1x8xf32> to vector<1x8xf32>
    %284 = vector.broadcast %283 : vector<1x8xf32> to vector<16x8xf32>
    %285 = arith.addf %281, %284 : vector<16x8xf32>
    %c1_253 = arith.constant 1 : index
    %c10_254 = arith.constant 10 : index
    %c0_255 = arith.constant 0 : index
    %c0_256 = arith.constant 0 : index
    %286 = vector.load %arg3[%c1_253, %c10_254, %c0_255, %c0_256] : memref<2x12x32x8xf32, #tpu.memory_space<vmem>>, vector<1x1x32x8xf32>
    %287 = vector.shape_cast %286 : vector<1x1x32x8xf32> to vector<32x8xf32>
    %cst_257 = arith.constant dense<0.000000e+00> : vector<16x8xf32>
    %288 = tpu.matmul %190, %287, %cst_257 {dimension_numbers = #tpu.dot_dimension_numbers<[1], [0], [0], [1], [0, 0, 1, 1], [], []>} : vector<16x32xf32>, vector<32x8xf32>, vector<16x8xf32> -> vector<16x8xf32>
    %c1_258 = arith.constant 1 : index
    %c10_259 = arith.constant 10 : index
    %c0_260 = arith.constant 0 : index
    %c0_261 = arith.constant 0 : index
    %289 = vector.load %arg4[%c1_258, %c10_259, %c0_260, %c0_261] : memref<2x12x1x8xf32, #tpu.memory_space<vmem>>, vector<1x1x1x8xf32>
    %290 = vector.shape_cast %289 : vector<1x1x1x8xf32> to vector<1x8xf32>
    %291 = vector.broadcast %290 : vector<1x8xf32> to vector<16x8xf32>
    %292 = arith.addf %288, %291 : vector<16x8xf32>
    %cst_262 = arith.constant dense<0.000000e+00> : vector<16x16xf32>
    %293 = tpu.matmul %278, %285, %cst_262 {dimension_numbers = #tpu.dot_dimension_numbers<[1], [1], [0], [0], [0, 0, 1, 0], [], []>} : vector<16x8xf32>, vector<16x8xf32>, vector<16x16xf32> -> vector<16x16xf32>
    %cst_263 = arith.constant 0.176776692 : f32
    %294 = vector.broadcast %cst_263 : f32 to vector<16x16xf32>
    %295 = arith.mulf %293, %294 : vector<16x16xf32>
    %296 = arith.addf %295, %192 : vector<16x16xf32>
    %cst_264 = arith.constant dense<0xFF800000> : vector<16xf32>
    %297 = vector.multi_reduction <maximumf>, %296, %cst_264 [1] : vector<16x16xf32> to vector<16xf32>
    %298 = vector.shape_cast %297 : vector<16xf32> to vector<16x1xf32>
    %299 = vector.broadcast %298 : vector<16x1xf32> to vector<16x16xf32>
    %300 = arith.subf %296, %299 : vector<16x16xf32>
    %301 = math.exp %300 : vector<16x16xf32>
    %cst_265 = arith.constant dense<0.000000e+00> : vector<16xf32>
    %302 = vector.multi_reduction <add>, %301, %cst_265 [1] : vector<16x16xf32> to vector<16xf32>
    %303 = vector.shape_cast %302 : vector<16xf32> to vector<16x1xf32>
    %304 = vector.broadcast %303 : vector<16x1xf32> to vector<16x16xf32>
    %305 = arith.divf %301, %304 : vector<16x16xf32>
    %cst_266 = arith.constant dense<0.000000e+00> : vector<16x8xf32>
    %306 = tpu.matmul %305, %292, %cst_266 {dimension_numbers = #tpu.dot_dimension_numbers<[1], [0], [0], [1], [0, 0, 1, 1], [], []>} : vector<16x16xf32>, vector<16x8xf32>, vector<16x8xf32> -> vector<16x8xf32>
    %c1_267 = arith.constant 1 : index
    %c2_268 = arith.constant 2 : index
    %c0_269 = arith.constant 0 : index
    %c0_270 = arith.constant 0 : index
    %307 = vector.load %arg5[%c1_267, %c2_268, %c0_269, %c0_270] : memref<2x4x8x32xf32, #tpu.memory_space<vmem>>, vector<1x1x8x32xf32>
    %308 = vector.shape_cast %307 : vector<1x1x8x32xf32> to vector<8x32xf32>
    %cst_271 = arith.constant dense<0.000000e+00> : vector<16x32xf32>
    %309 = tpu.matmul %306, %308, %cst_271 {dimension_numbers = #tpu.dot_dimension_numbers<[1], [0], [0], [1], [0, 0, 1, 1], [], []>} : vector<16x8xf32>, vector<8x32xf32>, vector<16x32xf32> -> vector<16x32xf32>
    %310 = arith.addf %271, %309 : vector<16x32xf32>
    %c1_272 = arith.constant 1 : index
    %c3_273 = arith.constant 3 : index
    %c0_274 = arith.constant 0 : index
    %c0_275 = arith.constant 0 : index
    %311 = vector.load %arg3[%c1_272, %c3_273, %c0_274, %c0_275] : memref<2x12x32x8xf32, #tpu.memory_space<vmem>>, vector<1x1x32x8xf32>
    %312 = vector.shape_cast %311 : vector<1x1x32x8xf32> to vector<32x8xf32>
    %cst_276 = arith.constant dense<0.000000e+00> : vector<16x8xf32>
    %313 = tpu.matmul %190, %312, %cst_276 {dimension_numbers = #tpu.dot_dimension_numbers<[1], [0], [0], [1], [0, 0, 1, 1], [], []>} : vector<16x32xf32>, vector<32x8xf32>, vector<16x8xf32> -> vector<16x8xf32>
    %c1_277 = arith.constant 1 : index
    %c3_278 = arith.constant 3 : index
    %c0_279 = arith.constant 0 : index
    %c0_280 = arith.constant 0 : index
    %314 = vector.load %arg4[%c1_277, %c3_278, %c0_279, %c0_280] : memref<2x12x1x8xf32, #tpu.memory_space<vmem>>, vector<1x1x1x8xf32>
    %315 = vector.shape_cast %314 : vector<1x1x1x8xf32> to vector<1x8xf32>
    %316 = vector.broadcast %315 : vector<1x8xf32> to vector<16x8xf32>
    %317 = arith.addf %313, %316 : vector<16x8xf32>
    %c1_281 = arith.constant 1 : index
    %c7_282 = arith.constant 7 : index
    %c0_283 = arith.constant 0 : index
    %c0_284 = arith.constant 0 : index
    %318 = vector.load %arg3[%c1_281, %c7_282, %c0_283, %c0_284] : memref<2x12x32x8xf32, #tpu.memory_space<vmem>>, vector<1x1x32x8xf32>
    %319 = vector.shape_cast %318 : vector<1x1x32x8xf32> to vector<32x8xf32>
    %cst_285 = arith.constant dense<0.000000e+00> : vector<16x8xf32>
    %320 = tpu.matmul %190, %319, %cst_285 {dimension_numbers = #tpu.dot_dimension_numbers<[1], [0], [0], [1], [0, 0, 1, 1], [], []>} : vector<16x32xf32>, vector<32x8xf32>, vector<16x8xf32> -> vector<16x8xf32>
    %c1_286 = arith.constant 1 : index
    %c7_287 = arith.constant 7 : index
    %c0_288 = arith.constant 0 : index
    %c0_289 = arith.constant 0 : index
    %321 = vector.load %arg4[%c1_286, %c7_287, %c0_288, %c0_289] : memref<2x12x1x8xf32, #tpu.memory_space<vmem>>, vector<1x1x1x8xf32>
    %322 = vector.shape_cast %321 : vector<1x1x1x8xf32> to vector<1x8xf32>
    %323 = vector.broadcast %322 : vector<1x8xf32> to vector<16x8xf32>
    %324 = arith.addf %320, %323 : vector<16x8xf32>
    %c1_290 = arith.constant 1 : index
    %c11_291 = arith.constant 11 : index
    %c0_292 = arith.constant 0 : index
    %c0_293 = arith.constant 0 : index
    %325 = vector.load %arg3[%c1_290, %c11_291, %c0_292, %c0_293] : memref<2x12x32x8xf32, #tpu.memory_space<vmem>>, vector<1x1x32x8xf32>
    %326 = vector.shape_cast %325 : vector<1x1x32x8xf32> to vector<32x8xf32>
    %cst_294 = arith.constant dense<0.000000e+00> : vector<16x8xf32>
    %327 = tpu.matmul %190, %326, %cst_294 {dimension_numbers = #tpu.dot_dimension_numbers<[1], [0], [0], [1], [0, 0, 1, 1], [], []>} : vector<16x32xf32>, vector<32x8xf32>, vector<16x8xf32> -> vector<16x8xf32>
    %c1_295 = arith.constant 1 : index
    %c11_296 = arith.constant 11 : index
    %c0_297 = arith.constant 0 : index
    %c0_298 = arith.constant 0 : index
    %328 = vector.load %arg4[%c1_295, %c11_296, %c0_297, %c0_298] : memref<2x12x1x8xf32, #tpu.memory_space<vmem>>, vector<1x1x1x8xf32>
    %329 = vector.shape_cast %328 : vector<1x1x1x8xf32> to vector<1x8xf32>
    %330 = vector.broadcast %329 : vector<1x8xf32> to vector<16x8xf32>
    %331 = arith.addf %327, %330 : vector<16x8xf32>
    %cst_299 = arith.constant dense<0.000000e+00> : vector<16x16xf32>
    %332 = tpu.matmul %317, %324, %cst_299 {dimension_numbers = #tpu.dot_dimension_numbers<[1], [1], [0], [0], [0, 0, 1, 0], [], []>} : vector<16x8xf32>, vector<16x8xf32>, vector<16x16xf32> -> vector<16x16xf32>
    %cst_300 = arith.constant 0.176776692 : f32
    %333 = vector.broadcast %cst_300 : f32 to vector<16x16xf32>
    %334 = arith.mulf %332, %333 : vector<16x16xf32>
    %335 = arith.addf %334, %192 : vector<16x16xf32>
    %cst_301 = arith.constant dense<0xFF800000> : vector<16xf32>
    %336 = vector.multi_reduction <maximumf>, %335, %cst_301 [1] : vector<16x16xf32> to vector<16xf32>
    %337 = vector.shape_cast %336 : vector<16xf32> to vector<16x1xf32>
    %338 = vector.broadcast %337 : vector<16x1xf32> to vector<16x16xf32>
    %339 = arith.subf %335, %338 : vector<16x16xf32>
    %340 = math.exp %339 : vector<16x16xf32>
    %cst_302 = arith.constant dense<0.000000e+00> : vector<16xf32>
    %341 = vector.multi_reduction <add>, %340, %cst_302 [1] : vector<16x16xf32> to vector<16xf32>
    %342 = vector.shape_cast %341 : vector<16xf32> to vector<16x1xf32>
    %343 = vector.broadcast %342 : vector<16x1xf32> to vector<16x16xf32>
    %344 = arith.divf %340, %343 : vector<16x16xf32>
    %cst_303 = arith.constant dense<0.000000e+00> : vector<16x8xf32>
    %345 = tpu.matmul %344, %331, %cst_303 {dimension_numbers = #tpu.dot_dimension_numbers<[1], [0], [0], [1], [0, 0, 1, 1], [], []>} : vector<16x16xf32>, vector<16x8xf32>, vector<16x8xf32> -> vector<16x8xf32>
    %c1_304 = arith.constant 1 : index
    %c3_305 = arith.constant 3 : index
    %c0_306 = arith.constant 0 : index
    %c0_307 = arith.constant 0 : index
    %346 = vector.load %arg5[%c1_304, %c3_305, %c0_306, %c0_307] : memref<2x4x8x32xf32, #tpu.memory_space<vmem>>, vector<1x1x8x32xf32>
    %347 = vector.shape_cast %346 : vector<1x1x8x32xf32> to vector<8x32xf32>
    %cst_308 = arith.constant dense<0.000000e+00> : vector<16x32xf32>
    %348 = tpu.matmul %345, %347, %cst_308 {dimension_numbers = #tpu.dot_dimension_numbers<[1], [0], [0], [1], [0, 0, 1, 1], [], []>} : vector<16x8xf32>, vector<8x32xf32>, vector<16x32xf32> -> vector<16x32xf32>
    %349 = arith.addf %310, %348 : vector<16x32xf32>
    %c1_309 = arith.constant 1 : index
    %c0_310 = arith.constant 0 : index
    %c0_311 = arith.constant 0 : index
    %350 = vector.load %arg6[%c1_309, %c0_310, %c0_311] : memref<2x1x32xf32, #tpu.memory_space<vmem>>, vector<1x1x32xf32>
    %351 = vector.shape_cast %350 : vector<1x1x32xf32> to vector<1x32xf32>
    %352 = vector.broadcast %351 : vector<1x32xf32> to vector<16x32xf32>
    %353 = arith.addf %349, %352 : vector<16x32xf32>
    %354 = arith.addf %353, %190 : vector<16x32xf32>
    %cst_312 = arith.constant dense<0.000000e+00> : vector<16xf32>
    %355 = vector.multi_reduction <add>, %354, %cst_312 [1] : vector<16x32xf32> to vector<16xf32>
    %356 = vector.shape_cast %355 : vector<16xf32> to vector<16x1xf32>
    %cst_313 = arith.constant 3.200000e+01 : f32
    %357 = vector.broadcast %cst_313 : f32 to vector<16x1xf32>
    %358 = arith.divf %356, %357 : vector<16x1xf32>
    %359 = vector.broadcast %358 : vector<16x1xf32> to vector<16x32xf32>
    %360 = arith.subf %354, %359 : vector<16x32xf32>
    %361 = arith.mulf %360, %360 : vector<16x32xf32>
    %cst_314 = arith.constant dense<0.000000e+00> : vector<16xf32>
    %362 = vector.multi_reduction <add>, %361, %cst_314 [1] : vector<16x32xf32> to vector<16xf32>
    %363 = vector.shape_cast %362 : vector<16xf32> to vector<16x1xf32>
    %cst_315 = arith.constant 3.200000e+01 : f32
    %364 = vector.broadcast %cst_315 : f32 to vector<16x1xf32>
    %365 = arith.divf %363, %364 : vector<16x1xf32>
    %366 = vector.broadcast %358 : vector<16x1xf32> to vector<16x32xf32>
    %367 = arith.subf %354, %366 : vector<16x32xf32>
    %cst_316 = arith.constant 9.99999974E-6 : f32
    %368 = vector.broadcast %cst_316 : f32 to vector<16x1xf32>
    %369 = arith.addf %365, %368 : vector<16x1xf32>
    %370 = math.rsqrt %369 : vector<16x1xf32>
    %371 = vector.broadcast %370 : vector<16x1xf32> to vector<16x32xf32>
    %372 = arith.mulf %367, %371 : vector<16x32xf32>
    %c1_317 = arith.constant 1 : index
    %c0_318 = arith.constant 0 : index
    %c0_319 = arith.constant 0 : index
    %c0_320 = arith.constant 0 : index
    %373 = vector.load %arg7[%c1_317, %c0_318, %c0_319, %c0_320] : memref<4x2x1x32xf32, #tpu.memory_space<vmem>>, vector<1x1x1x32xf32>
    %374 = vector.shape_cast %373 : vector<1x1x1x32xf32> to vector<1x32xf32>
    %375 = vector.broadcast %374 : vector<1x32xf32> to vector<16x32xf32>
    %376 = arith.mulf %372, %375 : vector<16x32xf32>
    %c1_321 = arith.constant 1 : index
    %c1_322 = arith.constant 1 : index
    %c0_323 = arith.constant 0 : index
    %c0_324 = arith.constant 0 : index
    %377 = vector.load %arg7[%c1_321, %c1_322, %c0_323, %c0_324] : memref<4x2x1x32xf32, #tpu.memory_space<vmem>>, vector<1x1x1x32xf32>
    %378 = vector.shape_cast %377 : vector<1x1x1x32xf32> to vector<1x32xf32>
    %379 = vector.broadcast %378 : vector<1x32xf32> to vector<16x32xf32>
    %380 = arith.addf %376, %379 : vector<16x32xf32>
    %c0_325 = arith.constant 0 : index
    %c0_326 = arith.constant 0 : index
    %381 = vector.load %arg8[%c0_325, %c0_326] : memref<32x128xf32, #tpu.memory_space<vmem>>, vector<32x128xf32>
    %cst_327 = arith.constant dense<0.000000e+00> : vector<16x128xf32>
    %382 = tpu.matmul %380, %381, %cst_327 {dimension_numbers = #tpu.dot_dimension_numbers<[1], [0], [0], [1], [0, 0, 1, 1], [], []>} : vector<16x32xf32>, vector<32x128xf32>, vector<16x128xf32> -> vector<16x128xf32>
    %c0_328 = arith.constant 0 : index
    %c0_329 = arith.constant 0 : index
    %383 = vector.load %arg9[%c0_328, %c0_329] : memref<1x128xf32, #tpu.memory_space<vmem>>, vector<1x128xf32>
    %384 = vector.broadcast %383 : vector<1x128xf32> to vector<16x128xf32>
    %385 = arith.addf %382, %384 : vector<16x128xf32>
    %cst_330 = arith.constant 0.000000e+00 : f32
    %386 = vector.broadcast %cst_330 : f32 to vector<16x128xf32>
    %387 = arith.maximumf %385, %386 : vector<16x128xf32>
    %c0_331 = arith.constant 0 : index
    %c0_332 = arith.constant 0 : index
    %388 = vector.load %arg10[%c0_331, %c0_332] : memref<128x32xf32, #tpu.memory_space<vmem>>, vector<128x32xf32>
    %cst_333 = arith.constant dense<0.000000e+00> : vector<16x32xf32>
    %389 = tpu.matmul %387, %388, %cst_333 {dimension_numbers = #tpu.dot_dimension_numbers<[1], [0], [0], [1], [0, 0, 1, 1], [], []>} : vector<16x128xf32>, vector<128x32xf32>, vector<16x32xf32> -> vector<16x32xf32>
    %c0_334 = arith.constant 0 : index
    %c0_335 = arith.constant 0 : index
    %390 = vector.load %arg11[%c0_334, %c0_335] : memref<1x32xf32, #tpu.memory_space<vmem>>, vector<1x32xf32>
    %391 = vector.broadcast %390 : vector<1x32xf32> to vector<16x32xf32>
    %392 = arith.addf %389, %391 : vector<16x32xf32>
    %393 = arith.addf %392, %380 : vector<16x32xf32>
    %cst_336 = arith.constant dense<0.000000e+00> : vector<16xf32>
    %394 = vector.multi_reduction <add>, %393, %cst_336 [1] : vector<16x32xf32> to vector<16xf32>
    %395 = vector.shape_cast %394 : vector<16xf32> to vector<16x1xf32>
    %cst_337 = arith.constant 3.200000e+01 : f32
    %396 = vector.broadcast %cst_337 : f32 to vector<16x1xf32>
    %397 = arith.divf %395, %396 : vector<16x1xf32>
    %398 = vector.broadcast %397 : vector<16x1xf32> to vector<16x32xf32>
    %399 = arith.subf %393, %398 : vector<16x32xf32>
    %400 = arith.mulf %399, %399 : vector<16x32xf32>
    %cst_338 = arith.constant dense<0.000000e+00> : vector<16xf32>
    %401 = vector.multi_reduction <add>, %400, %cst_338 [1] : vector<16x32xf32> to vector<16xf32>
    %402 = vector.shape_cast %401 : vector<16xf32> to vector<16x1xf32>
    %cst_339 = arith.constant 3.200000e+01 : f32
    %403 = vector.broadcast %cst_339 : f32 to vector<16x1xf32>
    %404 = arith.divf %402, %403 : vector<16x1xf32>
    %405 = vector.broadcast %397 : vector<16x1xf32> to vector<16x32xf32>
    %406 = arith.subf %393, %405 : vector<16x32xf32>
    %cst_340 = arith.constant 9.99999974E-6 : f32
    %407 = vector.broadcast %cst_340 : f32 to vector<16x1xf32>
    %408 = arith.addf %404, %407 : vector<16x1xf32>
    %409 = math.rsqrt %408 : vector<16x1xf32>
    %410 = vector.broadcast %409 : vector<16x1xf32> to vector<16x32xf32>
    %411 = arith.mulf %406, %410 : vector<16x32xf32>
    %c2_341 = arith.constant 2 : index
    %c0_342 = arith.constant 0 : index
    %c0_343 = arith.constant 0 : index
    %c0_344 = arith.constant 0 : index
    %412 = vector.load %arg7[%c2_341, %c0_342, %c0_343, %c0_344] : memref<4x2x1x32xf32, #tpu.memory_space<vmem>>, vector<1x1x1x32xf32>
    %413 = vector.shape_cast %412 : vector<1x1x1x32xf32> to vector<1x32xf32>
    %414 = vector.broadcast %413 : vector<1x32xf32> to vector<16x32xf32>
    %415 = arith.mulf %411, %414 : vector<16x32xf32>
    %c2_345 = arith.constant 2 : index
    %c1_346 = arith.constant 1 : index
    %c0_347 = arith.constant 0 : index
    %c0_348 = arith.constant 0 : index
    %416 = vector.load %arg7[%c2_345, %c1_346, %c0_347, %c0_348] : memref<4x2x1x32xf32, #tpu.memory_space<vmem>>, vector<1x1x1x32xf32>
    %417 = vector.shape_cast %416 : vector<1x1x1x32xf32> to vector<1x32xf32>
    %418 = vector.broadcast %417 : vector<1x32xf32> to vector<16x32xf32>
    %419 = arith.addf %415, %418 : vector<16x32xf32>
    %cst_349 = arith.constant dense<0.000000e+00> : vector<16xf32>
    %420 = vector.multi_reduction <add>, %419, %cst_349 [1] : vector<16x32xf32> to vector<16xf32>
    %421 = vector.shape_cast %420 : vector<16xf32> to vector<16x1xf32>
    %cst_350 = arith.constant 3.200000e+01 : f32
    %422 = vector.broadcast %cst_350 : f32 to vector<16x1xf32>
    %423 = arith.divf %421, %422 : vector<16x1xf32>
    %424 = vector.broadcast %423 : vector<16x1xf32> to vector<16x32xf32>
    %425 = arith.subf %419, %424 : vector<16x32xf32>
    %426 = arith.mulf %425, %425 : vector<16x32xf32>
    %cst_351 = arith.constant dense<0.000000e+00> : vector<16xf32>
    %427 = vector.multi_reduction <add>, %426, %cst_351 [1] : vector<16x32xf32> to vector<16xf32>
    %428 = vector.shape_cast %427 : vector<16xf32> to vector<16x1xf32>
    %cst_352 = arith.constant 3.200000e+01 : f32
    %429 = vector.broadcast %cst_352 : f32 to vector<16x1xf32>
    %430 = arith.divf %428, %429 : vector<16x1xf32>
    %431 = vector.broadcast %423 : vector<16x1xf32> to vector<16x32xf32>
    %432 = arith.subf %419, %431 : vector<16x32xf32>
    %cst_353 = arith.constant 9.99999974E-6 : f32
    %433 = vector.broadcast %cst_353 : f32 to vector<16x1xf32>
    %434 = arith.addf %430, %433 : vector<16x1xf32>
    %435 = math.rsqrt %434 : vector<16x1xf32>
    %436 = vector.broadcast %435 : vector<16x1xf32> to vector<16x32xf32>
    %437 = arith.mulf %432, %436 : vector<16x32xf32>
    %c3_354 = arith.constant 3 : index
    %c0_355 = arith.constant 0 : index
    %c0_356 = arith.constant 0 : index
    %c0_357 = arith.constant 0 : index
    %438 = vector.load %arg7[%c3_354, %c0_355, %c0_356, %c0_357] : memref<4x2x1x32xf32, #tpu.memory_space<vmem>>, vector<1x1x1x32xf32>
    %439 = vector.shape_cast %438 : vector<1x1x1x32xf32> to vector<1x32xf32>
    %440 = vector.broadcast %439 : vector<1x32xf32> to vector<16x32xf32>
    %441 = arith.mulf %437, %440 : vector<16x32xf32>
    %c3_358 = arith.constant 3 : index
    %c1_359 = arith.constant 1 : index
    %c0_360 = arith.constant 0 : index
    %c0_361 = arith.constant 0 : index
    %442 = vector.load %arg7[%c3_358, %c1_359, %c0_360, %c0_361] : memref<4x2x1x32xf32, #tpu.memory_space<vmem>>, vector<1x1x1x32xf32>
    %443 = vector.shape_cast %442 : vector<1x1x1x32xf32> to vector<1x32xf32>
    %444 = vector.broadcast %443 : vector<1x32xf32> to vector<16x32xf32>
    %445 = arith.addf %441, %444 : vector<16x32xf32>
    %c0_362 = arith.constant 0 : index
    %c0_363 = arith.constant 0 : index
    %446 = vector.load %arg12[%c0_362, %c0_363] : memref<16x32xf32, #tpu.memory_space<vmem>>, vector<16x32xf32>
    tpu.vector_store %arg12[%c0_362, %c0_363], %445 {strides = array<i32>} : memref<16x32xf32, #tpu.memory_space<vmem>>, vector<16x32xf32>,
    return
  }
  func.func @transform_0(%arg0: i32) -> (i32, i32) {
    %c0_i32 = arith.constant 0 : i32
    %c0_i32_0 = arith.constant 0 : i32
    %c0_i32_1 = arith.constant 0 : i32
    return %c0_i32, %c0_i32_0 : i32, i32
  }
  func.func @transform_1(%arg0: i32) -> (i32, i32, i32) {
    %c0_i32 = arith.constant 0 : i32
    %c0_i32_0 = arith.constant 0 : i32
    %c0_i32_1 = arith.constant 0 : i32
    %c0_i32_2 = arith.constant 0 : i32
    return %c0_i32, %c0_i32_0, %c0_i32_1 : i32, i32, i32
  }
  func.func @transform_2(%arg0: i32) -> (i32, i32, i32, i32) {
    %c0_i32 = arith.constant 0 : i32
    %c0_i32_0 = arith.constant 0 : i32
    %c0_i32_1 = arith.constant 0 : i32
    %c0_i32_2 = arith.constant 0 : i32
    %c0_i32_3 = arith.constant 0 : i32
    return %c0_i32, %c0_i32_0, %c0_i32_1, %c0_i32_2 : i32, i32, i32, i32
  }
  func.func @transform_3(%arg0: i32) -> (i32, i32, i32, i32) {
    %c0_i32 = arith.constant 0 : i32
    %c0_i32_0 = arith.constant 0 : i32
    %c0_i32_1 = arith.constant 0 : i32
    %c0_i32_2 = arith.constant 0 : i32
    %c0_i32_3 = arith.constant 0 : i32
    return %c0_i32, %c0_i32_0, %c0_i32_1, %c0_i32_2 : i32, i32, i32, i32
  }
  func.func @transform_4(%arg0: i32) -> (i32, i32, i32, i32) {
    %c0_i32 = arith.constant 0 : i32
    %c0_i32_0 = arith.constant 0 : i32
    %c0_i32_1 = arith.constant 0 : i32
    %c0_i32_2 = arith.constant 0 : i32
    %c0_i32_3 = arith.constant 0 : i32
    return %c0_i32, %c0_i32_0, %c0_i32_1, %c0_i32_2 : i32, i32, i32, i32
  }
  func.func @transform_5(%arg0: i32) -> (i32, i32, i32) {
    %c0_i32 = arith.constant 0 : i32
    %c0_i32_0 = arith.constant 0 : i32
    %c0_i32_1 = arith.constant 0 : i32
    %c0_i32_2 = arith.constant 0 : i32
    return %c0_i32, %c0_i32_0, %c0_i32_1 : i32, i32, i32
  }
  func.func @transform_6(%arg0: i32) -> (i32, i32, i32, i32) {
    %c0_i32 = arith.constant 0 : i32
    %c0_i32_0 = arith.constant 0 : i32
    %c0_i32_1 = arith.constant 0 : i32
    %c0_i32_2 = arith.constant 0 : i32
    %c0_i32_3 = arith.constant 0 : i32
    return %c0_i32, %c0_i32_0, %c0_i32_1, %c0_i32_2 : i32, i32, i32, i32
  }
  func.func @transform_7(%arg0: i32) -> (i32, i32) {
    %c0_i32 = arith.constant 0 : i32
    %c0_i32_0 = arith.constant 0 : i32
    %c0_i32_1 = arith.constant 0 : i32
    return %c0_i32, %c0_i32_0 : i32, i32
  }
  func.func @transform_8(%arg0: i32) -> (i32, i32) {
    %c0_i32 = arith.constant 0 : i32
    %c0_i32_0 = arith.constant 0 : i32
    %c0_i32_1 = arith.constant 0 : i32
    return %c0_i32, %c0_i32_0 : i32, i32
  }
  func.func @transform_9(%arg0: i32) -> (i32, i32) {
    %c0_i32 = arith.constant 0 : i32
    %c0_i32_0 = arith.constant 0 : i32
    %c0_i32_1 = arith.constant 0 : i32
    return %c0_i32, %c0_i32_0 : i32, i32
  }
  func.func @transform_10(%arg0: i32) -> (i32, i32) {
    %c0_i32 = arith.constant 0 : i32
    %c0_i32_0 = arith.constant 0 : i32
    %c0_i32_1 = arith.constant 0 : i32
    return %c0_i32, %c0_i32_0 : i32, i32
  }
  func.func @transform_11(%arg0: i32) -> (i32, i32) {
    %c0_i32 = arith.constant 0 : i32
    %c0_i32_0 = arith.constant 0 : i32
    %c0_i32_1 = arith.constant 0 : i32
    return %c0_i32, %c0_i32_0 : i32, i32
  }
}

</mosaic_0001>

<bundles_post_ra>
// kernel: tpu_custom_call.1
= control target key start
LH: loop header
LB: loop body
LE: loop exit
PB: predicated region body
PF: predicated region fallthrough
CT: control target
= control target key end

     0   :  { %vm54_vm0 = vcmask 261120   ;;  %s6786_s0 = inlined_call_operand.vmem [shape: f32[16,32], index: 0, kind: input, shape index: {}]   ;;  %s6787_s1 = inlined_call_operand.vmem [shape: f32[2,16,16], index: 1, kind: input, shape index: {}]   ;;  %s6788_s2 = inlined_call_operand.vmem [shape: f32[2,12,32,8], index: 2, kind: input, shape index: {}]   ;;  %s6789_s3 = inlined_call_operand.vmem [shape: f32[2,12,1,8], index: 3, kind: input, shape index: {}]   ;;  %s6790_s4 = inlined_call_operand.vmem [shape: f32[2,4,8,32], index: 4, kind: input, shape index: {}]   ;;  %s6791_s5 = inlined_call_operand.vmem [shape: f32[2,1,32], index: 5, kind: input, shape index: {}]   ;;  %s6792_s6 = inlined_call_operand.vmem [shape: f32[4,2,1,32], index: 6, kind: input, shape index: {}]   ;;  %s6793_s7 = inlined_call_operand.vmem [shape: f32[32,128], index: 7, kind: input, shape index: {}]   ;;  %s6794_s8 = inlined_call_operand.vmem [shape: f32[1,128], index: 8, kind: input, shape index: {}]   ;;  %s6795_s9 = inlined_call_operand.vmem [shape: f32[128,32], index: 9, kind: input, shape index: {}]   ;;  %s6796_s10 = inlined_call_operand.vmem [shape: f32[1,32], index: 10, kind: input, shape index: {}]   ;;  %s6797_s11 = inlined_call_operand.hbm [shape: f32[16,32], index: 11, kind: output, shape index: {}]  }
   0x1   :  { %v46_v0 = vld [vmem:[%s6788_s2 + $0x18] sm:$0xff]  ;;  %v45_v1 = vld [vmem:[%s6788_s2 + $0x10] sm:$0xff]  ;;  %v5990_v2 = vld [vmem:[%s6786_s0] sm:$0xff] }
   0x2   :  { %5351 = vmatprep.subr.mxu0 %v46_v0  ;;  %v44_v3 = vld [vmem:[%s6788_s2 + $0x8] sm:$0xff]  ;;  %5359 = vmatprep.mubr.msk.f32.mxu0 %vm54_vm0, %v5990_v2 }
   0x3   :  { %5352 = vmatpush3.msra.mxu0 %v46_v0 }
   0x4   :  { %5353 = vmatprep.subr.mxu0 %v45_v1 }
   0x5   :  { %16 = vsyncpa [#allocation3], 0  ;;  %5354 = vmatpush3.msra.mxu0 %v45_v1  ;;  %v43_v4 = vld [vmem:[%s6788_s2] sm:$0xff]  ;;  %v6003_v5 = vld [vmem:[%s6786_s0 + $0x8] sm:$0xff]  ;;  %vm312_vm1 = vcmask 64512   ;;  %vm404_vm2 = vcmask 130048  }
   0x6   :  { %5355 = vmatprep.subr.mxu0 %v44_v3  ;;  %v4819_v6 = vld [vmem:[%s6788_s2 + $0x98] sm:$0xff]  ;;  %v4818_v7 = vld [vmem:[%s6788_s2 + $0x90] sm:$0xff]  ;;  %v4817_v8 = vld [vmem:[%s6788_s2 + $0x88] sm:$0xff]  ;;  %s5918_s26 = smov [#allocation2]  }
   0x7   :  { %5356 = vmatpush3.msra.mxu0 %v44_v3  ;;  %v4816_v9 = vld [vmem:[%s6788_s2 + $0x80] sm:$0xff]  ;;  %v4827_v20 = vld [vmem:[%s6788_s2 + $0x118] sm:$0xff]  ;;  %v4826_v21 = vld [vmem:[%s6788_s2 + $0x110] sm:$0xff]  ;;  %s4802_s27 = sshll.u32 %s5918_s26, 4  ;;  %s4803_s27 = int_to_ptr.vmem [resolvable:$true] %s4802_s27 }
   0x8   :  { %5357 = vmatprep.subr.mxu0 %v43_v4  ;;  %v4813_v11 = vld [vmem:[%s6789_s3] ss:$0 sm:$0xff]  ;;  %v4821_v14 = vld [vmem:[%s6789_s3 + $0x4] ss:$0 sm:$0xff]  ;;  %v4825_v22 = vld [vmem:[%s6788_s2 + $0x108] sm:$0xff]  ;;  %s5896_s28 = scalar_lea.vmem %s4803_s27, 256  ;;  %p5901_p1 = scmp.lt.s32.totalorder %s4803_s27, %s4803_s27 }
   0x9   :  { %5358 = vmatpush3.msra.mxu0 %v43_v4  ;;  %v4824_v23 = vld [vmem:[%s6788_s2 + $0x100] sm:$0xff]  ;;  %v6061_v29 = vld [vmem:[%s6787_s1 + $0x8] sm:$0xff]  ;;  %v4849_v49 = vld [vmem:[%s6788_s2 + $0xb8] sm:$0xff]  ;;  %p5897_p0 = scmp.ne.s32.totalorder %s4803_s27, %s5896_s28  ;;  %p5902_p2 = scmp.lt.s32.totalorder %s5896_s28, %s5896_s28 }
   0xa   :  { %5360 = vmatmul.mubr.msk.f32.vlgmr.msra.gmra.mxu0 %vm54_vm0, %v6003_v5  ;;  %5362 = vmatprep.subr.mxu0 %v4819_v6  ;;  %v6056_v26 = vld [vmem:[%s6787_s1] sm:$0xff]  ;;  %v4829_v45 = vld [vmem:[%s6789_s3 + $0x8] ss:$0 sm:$0xff]  ;;  %v4841_v50 = vld [vmem:[%s6788_s2 + $0x38] sm:$0xff] }
   0xb   :  { %5363 = vmatpush3.msra.mxu0 %v4819_v6  ;;  %5370 = vmatprep.mubr.msk.f32.mxu0 %vm54_vm0, %v5990_v2  ;;  %v4840_v51 = vld [vmem:[%s6788_s2 + $0x30] sm:$0xff]  ;;  %v4839_v52 = vld [vmem:[%s6788_s2 + $0x28] sm:$0xff]  ;;  %v4838_v53 = vld [vmem:[%s6788_s2 + $0x20] sm:$0xff]  ;;  %p5903_p3 = por %p5902_p2, %p5901_p1 }
   0xc   :  { %5364 = vmatprep.subr.mxu0 %v4818_v7  ;;  %v4857_v54 = vld [vmem:[%s6788_s2 + $0x138] sm:$0xff]  ;;  %v4856_v55 = vld [vmem:[%s6788_s2 + $0x130] sm:$0xff]  ;;  %v4855_v56 = vld [vmem:[%s6788_s2 + $0x128] sm:$0xff] }
   0xd   :  { %5365 = vmatpush3.msra.mxu0 %v4818_v7  ;;  %v4854_v57 = vld [vmem:[%s6788_s2 + $0x120] sm:$0xff]  ;;  %v4848_v0 = vld [vmem:[%s6788_s2 + $0xb0] sm:$0xff]  ;;  %v4847_v1 = vld [vmem:[%s6788_s2 + $0xa8] sm:$0xff]  ;;  %p5904_p4 = pnand %p5903_p3, %p5897_p0 }
   0xe   :  { %5366 = vmatprep.subr.mxu0 %v4817_v8  ;;  %v4846_v3 = vld [vmem:[%s6788_s2 + $0xa0] sm:$0xff] }
   0xf   :  { %5367 = vmatpush3.msra.mxu0 %v4817_v8  ;;  %v508_v4 = vld [vmem:[%s6790_s4] sm:$0xff] }
  0x10   :  { %5368 = vmatprep.subr.mxu0 %v4816_v9  ;;  %v4843_v7 = vld [vmem:[%s6789_s3 + $0x1] ss:$0 sm:$0xff] }
  0x11   :  { %5369 = vmatpush3.msra.mxu0 %v4816_v9 }
  0x12   :  { %5371 = vmatmul.mubr.msk.f32.vlgmr.msra.gmra.mxu0 %vm54_vm0, %v6003_v5  ;;  %5373 = vmatprep.subr.mxu0 %v4827_v20 }
  0x13   :  { %5381 = vmatprep.mubr.msk.f32.mxu0 %vm54_vm0, %v5990_v2  ;;  %5374 = vmatpush3.msra.mxu0 %v4827_v20 }
  0x14   :  { %5375 = vmatprep.subr.mxu0 %v4826_v21 }
  0x15   :  { %5376 = vmatpush3.msra.mxu0 %v4826_v21 }
  0x16   :  { %5377 = vmatprep.subr.mxu0 %v4825_v22 }
  0x17   :  { %5378 = vmatpush3.msra.mxu0 %v4825_v22 }
  0x18   :  { %5379 = vmatprep.subr.mxu0 %v4824_v23 }
  0x19   :  { %5380 = vmatpush3.msra.mxu0 %v4824_v23 }
  0x1a   :  { %5382 = vmatmul.mubr.msk.f32.vlgmr.msra.gmra.mxu0 %vm54_vm0, %v6003_v5 }
  0xca   :  { %v5361_v10 = vpop.f32.mrf.mxu0 }
  0xcb   :  { %v133_v19 = vadd.f32 %v5361_v10, %v4813_v11 }
  0xcc   :  { %v127_v12 = vpop.f32.mrf.mxu0 }
  0xcd   :  { %v128_v13 = vadd.f32 %v4813_v11, %v127_v12 }
  0xcf   :  { %5388 = vmatprep.mubr.msk.f32.mxu1 %vm312_vm1, %v128_v13  ;;  %v4851_v13 = vld [vmem:[%s6789_s3 + $0x5] ss:$0 sm:$0xff] }
  0xd2   :  { %v5372_v15 = vpop.f32.mrf.mxu0 }
  0xd3   :  { %v221_v16 = vadd.f32 %v5372_v15, %v4821_v14 }
  0xd4   :  { %v215_v17 = vpop.f32.mrf.mxu0 }
  0xd5   :  { %v216_v18 = vadd.f32 %v4821_v14, %v215_v17  ;;  %5384 = vmatprep.subr.msk.mxu1 %vm312_vm1, %v221_v16  ;;  %v4859_v17 = vld [vmem:[%s6789_s3 + $0x9] ss:$0 sm:$0xff] }
  0xd6   :  { %5385 = vmatpush3.xpose.msk.msra.mxu1 %vm312_vm1, %v221_v16 }
  0xd7   :  { %5386 = vmatprep.subr.msk.mxu1 %vm312_vm1, %v216_v18 }
  0xda   :  { %5387 = vmatpush3.xpose.msk.msra.mxu1 %vm312_vm1, %v216_v18  ;;  %v5383_v44 = vpop.f32.mrf.mxu0 }
  0xdb   :  { %v309_v46 = vadd.f32 %v5383_v44, %v4829_v45  ;;  %5398 = vmatprep.subr.mxu1 %v4841_v50  ;;  %v4883_v44 = vld [vmem:[%s6788_s2 + $0xd0] sm:$0xff] }
  0xdc   :  { %v303_v47 = vpop.f32.mrf.mxu0 }
  0xdd   :  { %5389 = vmatmul.mubr.msk.f32.vlgmr.msra.gmra.mxu1 %vm312_vm1, %v133_v19  ;;  %v304_v48 = vadd.f32 %v4829_v45, %v303_v47  ;;  %5391 = vmatprep.subr.mxu0 %v309_v46  ;;  %v4868_v45 = vld [vmem:[%s6790_s4 + $0x8] sm:$0xff]  ;;  %v4881_v47 = vld [vmem:[%s6788_s2 + $0xc0] sm:$0xff] }
  0xde   :  { %5406 = vmatprep.mubr.msk.f32.mxu1 %vm54_vm0, %v5990_v2  ;;  %5392 = vmatpush3.msra.mxu0 %v309_v46  ;;  %v4882_v46 = vld [vmem:[%s6788_s2 + $0xc8] sm:$0xff] }
  0xdf   :  { %5393 = vmatprep.subr.mxu0 %v304_v48  ;;  %5399 = vmatpush3.msra.mxu1 %v4841_v50 }
  0xe0   :  { %5394 = vmatpush3.msra.mxu0 %v304_v48  ;;  %5400 = vmatprep.subr.mxu1 %v4840_v51 }
  0xe1   :  { %5409 = vmatprep.subr.mxu0 %v4849_v49  ;;  %5401 = vmatpush3.msra.mxu1 %v4840_v51 }
  0xe2   :  { %5402 = vmatprep.subr.mxu1 %v4839_v52 }
  0xe3   :  { %5403 = vmatpush3.msra.mxu1 %v4839_v52 }
  0xe4   :  { %5404 = vmatprep.subr.mxu1 %v4838_v53 }
  0xe5   :  { %5405 = vmatpush3.msra.mxu1 %v4838_v53 }
  0xe6   :  { %5407 = vmatmul.mubr.msk.f32.vlgmr.msra.gmra.mxu1 %vm54_vm0, %v6003_v5  ;;  %5420 = vmatprep.subr.mxu1 %v4857_v54 }
  0xe7   :  { %5421 = vmatpush3.msra.mxu1 %v4857_v54  ;;  %5428 = vmatprep.mubr.msk.f32.mxu1 %vm54_vm0, %v5990_v2  ;;  %v4876_v54 = vld [vmem:[%s6788_s2 + $0x58] sm:$0xff] }
  0xe8   :  { %5422 = vmatprep.subr.mxu1 %v4856_v55 }
  0xe9   :  { %5423 = vmatpush3.msra.mxu1 %v4856_v55 }
  0xea   :  { %5424 = vmatprep.subr.mxu1 %v4855_v56 }
  0xeb   :  { %5425 = vmatpush3.msra.mxu1 %v4855_v56 }
  0xec   :  { %5426 = vmatprep.subr.mxu1 %v4854_v57 }
  0xed   :  { %5427 = vmatpush3.msra.mxu1 %v4854_v57 }
  0xee   :  { %5429 = vmatmul.mubr.msk.f32.vlgmr.msra.gmra.mxu1 %vm54_vm0, %v6003_v5  ;;  %5450 = vmatprep.subr.mxu1 %v508_v4 }
  0xef   :  { %5451 = vmatpush3.msra.mxu1 %v508_v4 }
 0x19d   :  { %v5390_v24 = vpop.f32.mrf.mxu1 }
 0x19e   :  { %v401_v27 = vmul.f32 0.17677669, %v5390_v24 }
 0x19f   :  { %v391_v25 = vpop.f32.mrf.mxu1 }
 0x1a0   :  { %v400_v28 = vmul.f32 0.17677669, %v391_v25  ;;  %v403_v32 = vadd.f32 %v401_v27, %v6061_v29 }
 0x1a2   :  { %v402_v30 = vadd.f32 %v400_v28, %v6056_v26  ;;  %v408_v33 = vsel %vm404_vm2, %v403_v32, -inf }
 0x1a4   :  { %v405_v31 = vsel %vm404_vm2, %v402_v30, -inf }
 0x1a5   :  { %406 = vmax.xlane.f32.xlu0 %v405_v31 }
 0x1a6   :  { %v5408_v6 = vpop.f32.mrf.mxu1 }
 0x1a7   :  { %v594_v8 = vadd.f32 %v5408_v6, %v4843_v7 }
 0x1a8   :  { %v588_v9 = vpop.f32.mrf.mxu1 }
 0x1a9   :  { %409 = vmax.xlane.f32.xlu0 %v408_v33  ;;  %v589_v10 = vadd.f32 %v4843_v7, %v588_v9 }
 0x1ae   :  { %v5430_v19 = vpop.f32.mrf.mxu1 }
 0x1af   :  { %v770_v20 = vadd.f32 %v5430_v19, %v4859_v17 }
 0x1b0   :  { %v764_v21 = vpop.f32.mrf.mxu1 }
 0x1b1   :  { %v765_v22 = vadd.f32 %v4859_v17, %v764_v21 }
 0x22e   :  { %v407_v34 = vpop.xlane.xlu0 %406 }
 0x22f   :  { %v411_v35 = vsub.f32 %v402_v30, %v407_v34 }
 0x231   :  { %v413_v36 = vmul.f32 1.442695, %v411_v35 }
 0x232   :  { %v410_v37 = vpop.xlane.xlu0 %409 }
 0x233   :  { %5816 = vpow2.f32 %v413_v36  ;;  %v412_v38 = vsub.f32 %v403_v32, %v410_v37 }
 0x235   :  { %v415_v39 = vmul.f32 1.442695, %v412_v38 }
 0x237   :  { %5818 = vpow2.f32 %v415_v39 }
 0x240   :  { %v5817_v40 = vpop.eup %5816 }
 0x241   :  { %v417_v41 = vsel %vm404_vm2, %v5817_v40, 0.0 }
 0x242   :  { %418 = vadd.xlane.f32.xlu1 %v417_v41 }
 0x244   :  { %v5819_v42 = vpop.eup %5818 }
 0x245   :  { %v420_v43 = vsel %vm404_vm2, %v5819_v42, 0.0 }
 0x246   :  { %421 = vadd.xlane.f32.xlu1 %v420_v43  ;;  %v4884_v43 = vld [vmem:[%s6788_s2 + $0xd8] sm:$0xff] }
 0x247   :  { %5466 = vmatprep.subr.mxu1 %v4884_v43 }
 0x2cb   :  { %v419_v58 = vpop.xlane.xlu1 %418 }
 0x2cc   :  { %5820 = vrcp.f32 %v419_v58  ;;  %v4886_v58 = vld [vmem:[%s6789_s3 + $0x6] ss:$0 sm:$0xff] }
 0x2cf   :  { %v422_v59 = vpop.xlane.xlu1 %421 }
 0x2d0   :  { %5822 = vrcp.f32 %v422_v59 }
 0x2d9   :  { %v5821_v60 = vpop.eup %5820 }
 0x2da   :  { %v424_v61 = vmul.f32 %v5821_v60, %v5817_v40 }
 0x2dc   :  { %5395 = vmatprep.mubr.msk.f32.mxu0 %vm404_vm2, %v424_v61 }
 0x2dd   :  { %v5823_v62 = vpop.eup %5822 }
 0x2de   :  { %v426_v63 = vmul.f32 %v5823_v62, %v5819_v42  ;;  %v4875_v62 = vld [vmem:[%s6788_s2 + $0x50] sm:$0xff] }
 0x2e0   :  { %5396 = vmatmul.mubr.msk.f32.vlgmr.msra.gmra.mxu0 %vm404_vm2, %v426_v63  ;;  %v4874_v63 = vld [vmem:[%s6788_s2 + $0x48] sm:$0xff] }
 0x2e1   :  { %5410 = vmatpush3.msra.mxu0 %v4849_v49  ;;  %5417 = vmatprep.mubr.msk.f32.mxu0 %vm54_vm0, %v5990_v2 }
 0x2e2   :  { %5411 = vmatprep.subr.mxu0 %v4848_v0 }
 0x2e3   :  { %5412 = vmatpush3.msra.mxu0 %v4848_v0  ;;  %v4873_v0 = vld [vmem:[%s6788_s2 + $0x40] sm:$0xff] }
 0x2e4   :  { %5413 = vmatprep.subr.mxu0 %v4847_v1 }
 0x2e5   :  { %5414 = vmatpush3.msra.mxu0 %v4847_v1 }
 0x2e6   :  { %5415 = vmatprep.subr.mxu0 %v4846_v3 }
 0x2e7   :  { %5416 = vmatpush3.msra.mxu0 %v4846_v3 }
 0x2e8   :  { %5418 = vmatmul.mubr.msk.f32.vlgmr.msra.gmra.mxu0 %vm54_vm0, %v6003_v5 }
 0x2e9   :  { %5435 = vmatprep.mubr.msk.f32.mxu0 %vm312_vm1, %v589_v10 }
 0x3a0   :  { %v5397_v11 = vpop.f32.mrf.mxu0 }
 0x3a2   :  { %v499_v12 = vpop.f32.mrf.mxu0 }
 0x3a3   :  { %5452 = vmatprep.mubr.msk.f32.mxu1 %vm312_vm1, %v499_v12  ;;  %v4892_v12 = vld [vmem:[%s6788_s2 + $0x158] sm:$0xff] }
 0x3a4   :  { %5453 = vmatmul.mubr.msk.f32.vlgmr.msra.gmra.mxu1 %vm312_vm1, %v5397_v11 }
 0x3a5   :  { %5474 = vmatprep.mubr.msk.f32.mxu1 %vm54_vm0, %v5990_v2  ;;  %5467 = vmatpush3.msra.mxu1 %v4884_v43 }
 0x3a6   :  { %5468 = vmatprep.subr.mxu1 %v4883_v44 }
 0x3a7   :  { %5469 = vmatpush3.msra.mxu1 %v4883_v44 }
 0x3a8   :  { %v5419_v14 = vpop.f32.mrf.mxu0  ;;  %5470 = vmatprep.subr.mxu1 %v4882_v46 }
 0x3a9   :  { %v682_v15 = vadd.f32 %v5419_v14, %v4851_v13  ;;  %5471 = vmatpush3.msra.mxu1 %v4882_v46  ;;  %v4890_v14 = vld [vmem:[%s6788_s2 + $0x148] sm:$0xff] }
 0x3aa   :  { %v676_v16 = vpop.f32.mrf.mxu0  ;;  %5472 = vmatprep.subr.mxu1 %v4881_v47 }
 0x3ab   :  { %v677_v18 = vadd.f32 %v4851_v13, %v676_v16  ;;  %5431 = vmatprep.subr.msk.mxu0 %vm312_vm1, %v682_v15  ;;  %5473 = vmatpush3.msra.mxu1 %v4881_v47  ;;  %v4891_v13 = vld [vmem:[%s6788_s2 + $0x150] sm:$0xff] }
 0x3ac   :  { %5432 = vmatpush3.xpose.msk.msra.mxu0 %vm312_vm1, %v682_v15  ;;  %5475 = vmatmul.mubr.msk.f32.vlgmr.msra.gmra.mxu1 %vm54_vm0, %v6003_v5  ;;  %v4889_v15 = vld [vmem:[%s6788_s2 + $0x140] sm:$0xff] }
 0x3ad   :  { %5433 = vmatprep.subr.msk.mxu0 %vm312_vm1, %v677_v18 }
 0x3b0   :  { %5434 = vmatpush3.xpose.msk.msra.mxu0 %vm312_vm1, %v677_v18 }
 0x3b1   :  { %5438 = vmatprep.subr.mxu0 %v770_v20 }
 0x3b3   :  { %5436 = vmatmul.mubr.msk.f32.vlgmr.msra.gmra.mxu0 %vm312_vm1, %v594_v8  ;;  %v4878_v8 = vld [vmem:[%s6789_s3 + $0x2] ss:$0 sm:$0xff] }
 0x3b4   :  { %5439 = vmatpush3.msra.mxu0 %v770_v20 }
 0x3b5   :  { %5440 = vmatprep.subr.mxu0 %v765_v22 }
 0x3b6   :  { %5441 = vmatpush3.msra.mxu0 %v765_v22 }
 0x3b7   :  { %5445 = vmatprep.subr.mxu0 %v4868_v45 }
 0x464   :  { %v6170_v55 = vpop.f32.mrf.mxu1 }
 0x466   :  { %v6172_v56 = vpop.f32.mrf.mxu1 }
 0x46c   :  { %v5476_v57 = vpop.f32.mrf.mxu1 }
 0x46d   :  { %v1304_v59 = vadd.f32 %v5476_v57, %v4886_v58  ;;  %v4916_v57 = vld [vmem:[%s6788_s2 + $0xf0] sm:$0xff] }
 0x46e   :  { %v1298_v1 = vpop.f32.mrf.mxu1 }
 0x46f   :  { %5488 = vmatprep.subr.msk.mxu1 %vm312_vm1, %v1304_v59  ;;  %v1299_v3 = vadd.f32 %v4886_v58, %v1298_v1  ;;  %v4915_v58 = vld [vmem:[%s6788_s2 + $0xe8] sm:$0xff] }
 0x470   :  { %5489 = vmatpush3.xpose.msk.msra.mxu1 %vm312_vm1, %v1304_v59  ;;  %v4914_v59 = vld [vmem:[%s6788_s2 + $0xe0] sm:$0xff] }
 0x471   :  { %5490 = vmatprep.subr.msk.mxu1 %vm312_vm1, %v1299_v3 }
 0x473   :  { %v5437_v23 = vpop.f32.mrf.mxu0 }
 0x474   :  { %v861_v24 = vmul.f32 0.17677669, %v5437_v23  ;;  %5491 = vmatpush3.xpose.msk.msra.mxu1 %vm312_vm1, %v1299_v3 }
 0x475   :  { %v851_v25 = vpop.f32.mrf.mxu0 }
 0x476   :  { %v860_v27 = vmul.f32 0.17677669, %v851_v25  ;;  %v863_v28 = vadd.f32 %v861_v24, %v6061_v29 }
 0x478   :  { %v867_v30 = vsel %vm404_vm2, %v863_v28, -inf  ;;  %v862_v31 = vadd.f32 %v860_v27, %v6056_v26 }
 0x479   :  { %868 = vmax.xlane.f32.xlu1 %v867_v30 }
 0x47a   :  { %v864_v32 = vsel %vm404_vm2, %v862_v31, -inf }
 0x47b   :  { %865 = vmax.xlane.f32.xlu0 %v864_v32 }
 0x502   :  { %v869_v33 = vpop.xlane.xlu1 %868 }
 0x503   :  { %v871_v34 = vsub.f32 %v863_v28, %v869_v33 }
 0x504   :  { %v866_v35 = vpop.xlane.xlu0 %865 }
 0x505   :  { %v874_v36 = vmul.f32 1.442695, %v871_v34  ;;  %v870_v37 = vsub.f32 %v862_v31, %v866_v35 }
 0x507   :  { %5824 = vpow2.f32 %v874_v36  ;;  %v872_v38 = vmul.f32 1.442695, %v870_v37  ;;  %v4894_v37 = vld [vmem:[%s6789_s3 + $0xa] ss:$0 sm:$0xff] }
 0x509   :  { %5826 = vpow2.f32 %v872_v38 }
 0x514   :  { %v5825_v39 = vpop.eup %5824 }
 0x515   :  { %v879_v40 = vsel %vm404_vm2, %v5825_v39, 0.0 }
 0x516   :  { %v5827_v41 = vpop.eup %5826  ;;  %880 = vadd.xlane.f32.xlu1 %v879_v40 }
 0x517   :  { %v876_v42 = vsel %vm404_vm2, %v5827_v41, 0.0 }
 0x518   :  { %877 = vadd.xlane.f32.xlu0 %v876_v42 }
 0x59f   :  { %v881_v48 = vpop.xlane.xlu1 %880 }
 0x5a0   :  { %5828 = vrcp.f32 %v881_v48  ;;  %v4917_v48 = vld [vmem:[%s6788_s2 + $0xf8] sm:$0xff] }
 0x5a1   :  { %v878_v49 = vpop.xlane.xlu0 %877 }
 0x5a2   :  { %5830 = vrcp.f32 %v878_v49  ;;  %v4909_v49 = vld [vmem:[%s6788_s2 + $0x78] sm:$0xff] }
 0x5ad   :  { %v5829_v50 = vpop.eup %5828 }
 0x5ae   :  { %v885_v53 = vmul.f32 %v5829_v50, %v5825_v39  ;;  %v4908_v50 = vld [vmem:[%s6788_s2 + $0x70] sm:$0xff] }
 0x5af   :  { %v5831_v51 = vpop.eup %5830 }
 0x5b0   :  { %v883_v52 = vmul.f32 %v5831_v51, %v5827_v41  ;;  %v4903_v41 = vld [vmem:[%s6790_s4 + $0x10] sm:$0xff]  ;;  %v4907_v51 = vld [vmem:[%s6788_s2 + $0x68] sm:$0xff] }
 0x5b1   :  { %5502 = vmatprep.subr.mxu1 %v4903_v41 }
 0x5b2   :  { %5442 = vmatprep.mubr.msk.f32.mxu0 %vm404_vm2, %v883_v52  ;;  %v4906_v52 = vld [vmem:[%s6788_s2 + $0x60] sm:$0xff] }
 0x5b3   :  { %5443 = vmatmul.mubr.msk.f32.vlgmr.msra.gmra.mxu0 %vm404_vm2, %v885_v53 }
 0x5b4   :  { %5446 = vmatpush3.msra.mxu0 %v4868_v45 }
 0x5b5   :  { %5455 = vmatprep.subr.mxu0 %v4876_v54 }
 0x673   :  { %v5444_v60 = vpop.f32.mrf.mxu0 }
 0x675   :  { %v958_v61 = vpop.f32.mrf.mxu0 }
 0x676   :  { %5447 = vmatprep.mubr.msk.f32.mxu0 %vm312_vm1, %v958_v61  ;;  %v4911_v61 = vld [vmem:[%s6789_s3 + $0x3] ss:$0 sm:$0xff] }
 0x677   :  { %5448 = vmatmul.mubr.msk.f32.vlgmr.msra.gmra.mxu0 %vm312_vm1, %v5444_v60 }
 0x678   :  { %5456 = vmatpush3.msra.mxu0 %v4876_v54  ;;  %5463 = vmatprep.mubr.msk.f32.mxu0 %vm54_vm0, %v5990_v2 }
 0x679   :  { %5457 = vmatprep.subr.mxu0 %v4875_v62 }
 0x67a   :  { %5458 = vmatpush3.msra.mxu0 %v4875_v62 }
 0x67b   :  { %5459 = vmatprep.subr.mxu0 %v4874_v63 }
 0x67c   :  { %5460 = vmatpush3.msra.mxu0 %v4874_v63 }
 0x67d   :  { %5461 = vmatprep.subr.mxu0 %v4873_v0 }
 0x67e   :  { %5462 = vmatpush3.msra.mxu0 %v4873_v0 }
 0x67f   :  { %5464 = vmatmul.mubr.msk.f32.vlgmr.msra.gmra.mxu0 %vm54_vm0, %v6003_v5  ;;  %5477 = vmatprep.subr.mxu0 %v4892_v12 }
 0x680   :  { %5485 = vmatprep.mubr.msk.f32.mxu0 %vm54_vm0, %v5990_v2  ;;  %5478 = vmatpush3.msra.mxu0 %v4892_v12 }
 0x681   :  { %5479 = vmatprep.subr.mxu0 %v4891_v13 }
 0x682   :  { %5480 = vmatpush3.msra.mxu0 %v4891_v13 }
 0x683   :  { %5481 = vmatprep.subr.mxu0 %v4890_v14 }
 0x684   :  { %5482 = vmatpush3.msra.mxu0 %v4890_v14 }
 0x685   :  { %5483 = vmatprep.subr.mxu0 %v4889_v15 }
 0x686   :  { %5484 = vmatpush3.msra.mxu0 %v4889_v15 }
 0x687   :  { %5486 = vmatmul.mubr.msk.f32.vlgmr.msra.gmra.mxu0 %vm54_vm0, %v6003_v5 }
 0x737   :  { %v6198_v4 = vpop.f32.mrf.mxu0 }
 0x738   :  { %v1128_v1 = vadd.f32 %v6170_v55, %v6198_v4  ;;  %v4925_v55 = vld [vmem:[%s6788_s2 + $0x178] sm:$0xff]  ;;  %v4923_v4 = vld [vmem:[%s6788_s2 + $0x168] sm:$0xff] }
 0x739   :  { %v6200_v6 = vpop.f32.mrf.mxu0 }
 0x73f   :  { %v5465_v7 = vpop.f32.mrf.mxu0 }
 0x740   :  { %v1216_v11 = vadd.f32 %v5465_v7, %v4878_v8  ;;  %v1123_v7 = vadd.f32 %v6172_v56, %v6200_v6  ;;  %v4924_v56 = vld [vmem:[%s6788_s2 + $0x170] sm:$0xff]  ;;  %v4922_v6 = vld [vmem:[%s6788_s2 + $0x160] sm:$0xff] }
 0x741   :  { %v1210_v9 = vpop.f32.mrf.mxu0 }
 0x742   :  { %v1211_v10 = vadd.f32 %v4878_v8, %v1210_v9 }
 0x744   :  { %5492 = vmatprep.mubr.msk.f32.mxu1 %vm312_vm1, %v1211_v10 }
 0x745   :  { %5493 = vmatmul.mubr.msk.f32.vlgmr.msra.gmra.mxu1 %vm312_vm1, %v1216_v11  ;;  %v4919_v11 = vld [vmem:[%s6789_s3 + $0x7] ss:$0 sm:$0xff] }
 0x746   :  { %5503 = vmatpush3.msra.mxu1 %v4903_v41 }
 0x747   :  { %v5487_v36 = vpop.f32.mrf.mxu0  ;;  %5518 = vmatprep.subr.mxu1 %v4917_v48 }
 0x748   :  { %v1392_v38 = vadd.f32 %v5487_v36, %v4894_v37 }
 0x749   :  { %v1386_v39 = vpop.f32.mrf.mxu0 }
 0x74a   :  { %v1387_v40 = vadd.f32 %v4894_v37, %v1386_v39  ;;  %5495 = vmatprep.subr.mxu0 %v1392_v38  ;;  %v4936_v39 = vld [vmem:[%s6790_s4 + $0x18] sm:$0xff] }
 0x74b   :  { %5496 = vmatpush3.msra.mxu0 %v1392_v38 }
 0x74c   :  { %5497 = vmatprep.subr.mxu0 %v1387_v40 }
 0x74d   :  { %5498 = vmatpush3.msra.mxu0 %v1387_v40 }
 0x74e   :  { %5507 = vmatprep.subr.mxu0 %v4909_v49 }
 0x805   :  { %v5494_v16 = vpop.f32.mrf.mxu1 }
 0x806   :  { %v1483_v17 = vmul.f32 0.17677669, %v5494_v16 }
 0x807   :  { %v1473_v18 = vpop.f32.mrf.mxu1 }
 0x808   :  { %v1482_v19 = vmul.f32 0.17677669, %v1473_v18  ;;  %v1485_v20 = vadd.f32 %v1483_v17, %v6061_v29 }
 0x80a   :  { %v1489_v21 = vsel %vm404_vm2, %v1485_v20, -inf  ;;  %v1484_v22 = vadd.f32 %v1482_v19, %v6056_v26 }
 0x80b   :  { %1490 = vmax.xlane.f32.xlu1 %v1489_v21 }
 0x80c   :  { %v1486_v23 = vsel %vm404_vm2, %v1484_v22, -inf }
 0x80d   :  { %1487 = vmax.xlane.f32.xlu0 %v1486_v23 }
 0x894   :  { %v1491_v24 = vpop.xlane.xlu1 %1490 }
 0x895   :  { %v1493_v25 = vsub.f32 %v1485_v20, %v1491_v24 }
 0x896   :  { %v1488_v27 = vpop.xlane.xlu0 %1487 }
 0x897   :  { %v1496_v28 = vmul.f32 1.442695, %v1493_v25  ;;  %v1492_v30 = vsub.f32 %v1484_v22, %v1488_v27 }
 0x899   :  { %5832 = vpow2.f32 %v1496_v28  ;;  %v1494_v31 = vmul.f32 1.442695, %v1492_v30 }
 0x89b   :  { %5834 = vpow2.f32 %v1494_v31 }
 0x8a6   :  { %v5833_v32 = vpop.eup %5832 }
 0x8a7   :  { %v1501_v33 = vsel %vm404_vm2, %v5833_v32, 0.0 }
 0x8a8   :  { %v5835_v34 = vpop.eup %5834  ;;  %1502 = vadd.xlane.f32.xlu1 %v1501_v33 }
 0x8a9   :  { %v1498_v35 = vsel %vm404_vm2, %v5835_v34, 0.0 }
 0x8aa   :  { %1499 = vadd.xlane.f32.xlu0 %v1498_v35  ;;  %v4927_v35 = vld [vmem:[%s6789_s3 + $0xb] ss:$0 sm:$0xff] }
 0x931   :  { %v1503_v42 = vpop.xlane.xlu1 %1502 }
 0x932   :  { %5836 = vrcp.f32 %v1503_v42 }
 0x933   :  { %v1500_v43 = vpop.xlane.xlu0 %1499 }
 0x934   :  { %5838 = vrcp.f32 %v1500_v43 }
 0x93f   :  { %v5837_v44 = vpop.eup %5836 }
 0x940   :  { %v1507_v47 = vmul.f32 %v5837_v44, %v5833_v32 }
 0x941   :  { %v5839_v45 = vpop.eup %5838 }
 0x942   :  { %v1505_v46 = vmul.f32 %v5839_v45, %v5835_v34 }
 0x944   :  { %5499 = vmatprep.mubr.msk.f32.mxu0 %vm404_vm2, %v1505_v46 }
 0x945   :  { %5500 = vmatmul.mubr.msk.f32.vlgmr.msra.gmra.mxu0 %vm404_vm2, %v1507_v47 }
 0x946   :  { %5515 = vmatprep.mubr.msk.f32.mxu0 %vm54_vm0, %v5990_v2  ;;  %5508 = vmatpush3.msra.mxu0 %v4909_v49  ;;  %v4939_v49 = vld [vmem:[%s6791_s5] ss:$0 sm:$0xff] }
 0x947   :  { %5509 = vmatprep.subr.mxu0 %v4908_v50 }
 0x948   :  { %5510 = vmatpush3.msra.mxu0 %v4908_v50 }
 0x949   :  { %5511 = vmatprep.subr.mxu0 %v4907_v51 }
 0x94a   :  { %5512 = vmatpush3.msra.mxu0 %v4907_v51 }
 0x94b   :  { %5513 = vmatprep.subr.mxu0 %v4906_v52 }
 0x94c   :  { %5514 = vmatpush3.msra.mxu0 %v4906_v52 }
 0x94d   :  { %5516 = vmatmul.mubr.msk.f32.vlgmr.msra.gmra.mxu0 %vm54_vm0, %v6003_v5  ;;  %5529 = vmatprep.subr.mxu0 %v4925_v55 }
 0x94e   :  { %5537 = vmatprep.mubr.msk.f32.mxu0 %vm54_vm0, %v5990_v2  ;;  %5530 = vmatpush3.msra.mxu0 %v4925_v55  ;;  %v4953_v55 = vld [vmem:[%s6788_s2 + $0x200] sm:$0xff] }
 0x94f   :  { %5531 = vmatprep.subr.mxu0 %v4924_v56 }
 0x950   :  { %5532 = vmatpush3.msra.mxu0 %v4924_v56  ;;  %v4964_v56 = vld [vmem:[%s6788_s2 + $0x298] sm:$0xff] }
 0x951   :  { %5533 = vmatprep.subr.mxu0 %v4923_v4 }
 0x952   :  { %5534 = vmatpush3.msra.mxu0 %v4923_v4 }
 0x953   :  { %5535 = vmatprep.subr.mxu0 %v4922_v6 }
 0x954   :  { %5536 = vmatpush3.msra.mxu0 %v4922_v6 }
 0x955   :  { %5538 = vmatmul.mubr.msk.f32.vlgmr.msra.gmra.mxu0 %vm54_vm0, %v6003_v5 }
 0xa05   :  { %v5501_v53 = vpop.f32.mrf.mxu0 }
 0xa07   :  { %v1580_v54 = vpop.f32.mrf.mxu0 }
 0xa08   :  { %5504 = vmatprep.mubr.msk.f32.mxu1 %vm312_vm1, %v1580_v54 }
 0xa09   :  { %5505 = vmatmul.mubr.msk.f32.vlgmr.msra.gmra.mxu1 %vm312_vm1, %v5501_v53 }
 0xa0a   :  { %5519 = vmatpush3.msra.mxu1 %v4917_v48  ;;  %5526 = vmatprep.mubr.msk.f32.mxu1 %vm54_vm0, %v5990_v2 }
 0xa0b   :  { %5520 = vmatprep.subr.mxu1 %v4916_v57 }
 0xa0c   :  { %5521 = vmatpush3.msra.mxu1 %v4916_v57 }
 0xa0d   :  { %5522 = vmatprep.subr.mxu1 %v4915_v58  ;;  %v5517_v60 = vpop.f32.mrf.mxu0 }
 0xa0e   :  { %5523 = vmatpush3.msra.mxu1 %v4915_v58  ;;  %v1759_v62 = vadd.f32 %v5517_v60, %v4911_v61 }
 0xa0f   :  { %5524 = vmatprep.subr.mxu1 %v4914_v59  ;;  %v1753_v63 = vpop.f32.mrf.mxu0 }
 0xa10   :  { %5525 = vmatpush3.msra.mxu1 %v4914_v59  ;;  %v1754_v0 = vadd.f32 %v4911_v61, %v1753_v63 }
 0xa11   :  { %5527 = vmatmul.mubr.msk.f32.vlgmr.msra.gmra.mxu1 %vm54_vm0, %v6003_v5 }
 0xa12   :  { %5544 = vmatprep.mubr.msk.f32.mxu1 %vm312_vm1, %v1754_v0 }
 0xac9   :  { %v5506_v3 = vpop.f32.mrf.mxu1 }
 0xaca   :  { %v6279_v8 = vadd.f32 %v5506_v3, %v1128_v1 }
 0xacb   :  { %v1663_v9 = vpop.f32.mrf.mxu1 }
 0xacc   :  { %v6281_v10 = vadd.f32 %v1663_v9, %v1123_v7 }
 0xad1   :  { %v5528_v12 = vpop.f32.mrf.mxu1 }
 0xad2   :  { %v1847_v13 = vadd.f32 %v5528_v12, %v4919_v11  ;;  %v4955_v12 = vld [vmem:[%s6788_s2 + $0x210] sm:$0xff] }
 0xad3   :  { %v1841_v14 = vpop.f32.mrf.mxu1 }
 0xad4   :  { %v1842_v15 = vadd.f32 %v4919_v11, %v1841_v14  ;;  %5540 = vmatprep.subr.msk.mxu1 %vm312_vm1, %v1847_v13  ;;  %v4947_v11 = vld [vmem:[%s6788_s2 + $0x190] sm:$0xff]  ;;  %v4954_v14 = vld [vmem:[%s6788_s2 + $0x208] sm:$0xff] }
 0xad5   :  { %5541 = vmatpush3.xpose.msk.msra.mxu1 %vm312_vm1, %v1847_v13  ;;  %v4946_v13 = vld [vmem:[%s6788_s2 + $0x188] sm:$0xff] }
 0xad6   :  { %5542 = vmatprep.subr.msk.mxu1 %vm312_vm1, %v1842_v15 }
 0xad9   :  { %5543 = vmatpush3.xpose.msk.msra.mxu1 %vm312_vm1, %v1842_v15  ;;  %v4945_v15 = vld [vmem:[%s6788_s2 + $0x180] sm:$0xff] }
 0xada   :  { %5554 = vmatprep.subr.mxu1 %v4936_v39 }
 0xadc   :  { %5545 = vmatmul.mubr.msk.f32.vlgmr.msra.gmra.mxu1 %vm312_vm1, %v1759_v62 }
 0xadd   :  { %5555 = vmatpush3.msra.mxu1 %v4936_v39 }
 0xb9c   :  { %v5546_v16 = vpop.f32.mrf.mxu1 }
 0xb9d   :  { %v2026_v17 = vmul.f32 0.17677669, %v5546_v16 }
 0xb9e   :  { %v2016_v18 = vpop.f32.mrf.mxu1 }
 0xb9f   :  { %v2025_v19 = vmul.f32 0.17677669, %v2016_v18  ;;  %v2028_v20 = vadd.f32 %v2026_v17, %v6061_v29 }
 0xba1   :  { %v2032_v21 = vsel %vm404_vm2, %v2028_v20, -inf  ;;  %v2027_v22 = vadd.f32 %v2025_v19, %v6056_v26  ;;  %v5539_v26 = vpop.f32.mrf.mxu0 }
 0xba2   :  { %2033 = vmax.xlane.f32.xlu1 %v2032_v21  ;;  %v1935_v36 = vadd.f32 %v5539_v26, %v4927_v35  ;;  %v4940_v21 = vld [vmem:[%s6792_s6] ss:$0 sm:$0xff] }
 0xba3   :  { %v2029_v23 = vsel %vm404_vm2, %v2027_v22, -inf  ;;  %v1929_v37 = vpop.f32.mrf.mxu0 }
 0xba4   :  { %2030 = vmax.xlane.f32.xlu0 %v2029_v23  ;;  %v1930_v38 = vadd.f32 %v4927_v35, %v1929_v37  ;;  %5547 = vmatprep.subr.mxu0 %v1935_v36  ;;  %v4950_v37 = vld [vmem:[%s6789_s3 + $0xc] ss:$0 sm:$0xff] }
 0xba5   :  { %5548 = vmatpush3.msra.mxu0 %v1935_v36 }
 0xba6   :  { %5549 = vmatprep.subr.mxu0 %v1930_v38 }
 0xba7   :  { %5550 = vmatpush3.msra.mxu0 %v1930_v38 }
 0xc2b   :  { %v2034_v24 = vpop.xlane.xlu1 %2033 }
 0xc2c   :  { %v2036_v25 = vsub.f32 %v2028_v20, %v2034_v24 }
 0xc2d   :  { %v2031_v27 = vpop.xlane.xlu0 %2030 }
 0xc2e   :  { %v2039_v28 = vmul.f32 1.442695, %v2036_v25  ;;  %v2035_v30 = vsub.f32 %v2027_v22, %v2031_v27  ;;  %v4942_v27 = vld [vmem:[%s6792_s6 + $0x1] ss:$0 sm:$0xff] }
 0xc30   :  { %5840 = vpow2.f32 %v2039_v28  ;;  %v2037_v31 = vmul.f32 1.442695, %v2035_v30 }
 0xc32   :  { %5842 = vpow2.f32 %v2037_v31 }
 0xc3d   :  { %v5841_v32 = vpop.eup %5840 }
 0xc3e   :  { %v2044_v33 = vsel %vm404_vm2, %v5841_v32, 0.0 }
 0xc3f   :  { %v5843_v29 = vpop.eup %5842  ;;  %2045 = vadd.xlane.f32.xlu1 %v2044_v33  ;;  %v4962_v33 = vld [vmem:[%s6788_s2 + $0x288] sm:$0xff] }
 0xc40   :  { %v2041_v34 = vsel %vm404_vm2, %v5843_v29, 0.0 }
 0xc41   :  { %2042 = vadd.xlane.f32.xlu0 %v2041_v34  ;;  %v4958_v34 = vld [vmem:[%s6789_s3 + $0x10] ss:$0 sm:$0xff] }
 0xcc8   :  { %v2046_v40 = vpop.xlane.xlu1 %2045 }
 0xcc9   :  { %5844 = vrcp.f32 %v2046_v40 }
 0xcca   :  { %v2043_v41 = vpop.xlane.xlu0 %2042 }
 0xccb   :  { %5846 = vrcp.f32 %v2043_v41 }
 0xcd6   :  { %v5845_v42 = vpop.eup %5844 }
 0xcd7   :  { %v2050_v45 = vmul.f32 %v5845_v42, %v5841_v32  ;;  %v4963_v32 = vld [vmem:[%s6788_s2 + $0x290] sm:$0xff] }
 0xcd8   :  { %v5847_v43 = vpop.eup %5846  ;;  %v4966_v42 = vld [vmem:[%s6789_s3 + $0x14] ss:$0 sm:$0xff] }
 0xcd9   :  { %v2048_v44 = vmul.f32 %v5847_v43, %v5843_v29  ;;  %v4961_v29 = vld [vmem:[%s6788_s2 + $0x280] sm:$0xff]  ;;  %v4979_v43 = vld [vmem:[%s6788_s2 + $0x1b8] sm:$0xff] }
 0xcdb   :  { %5551 = vmatprep.mubr.msk.f32.mxu0 %vm404_vm2, %v2048_v44 }
 0xcdc   :  { %5552 = vmatmul.mubr.msk.f32.vlgmr.msra.gmra.mxu0 %vm404_vm2, %v2050_v45 }
 0xd9c   :  { %v5553_v46 = vpop.f32.mrf.mxu0 }
 0xd9e   :  { %v2123_v47 = vpop.f32.mrf.mxu0 }
 0xd9f   :  { %5556 = vmatprep.mubr.msk.f32.mxu1 %vm312_vm1, %v2123_v47 }
 0xda0   :  { %5557 = vmatmul.mubr.msk.f32.vlgmr.msra.gmra.mxu1 %vm312_vm1, %v5553_v46 }
 0xe60   :  { %v5558_v48 = vpop.f32.mrf.mxu1 }
 0xe61   :  { %v2216_v50 = vadd.f32 %v5558_v48, %v6279_v8 }
 0xe62   :  { %v2206_v51 = vpop.f32.mrf.mxu1 }
 0xe63   :  { %v2225_v52 = vadd.f32 %v4939_v49, %v2216_v50  ;;  %v2215_v53 = vadd.f32 %v2206_v51, %v6281_v10  ;;  %v4956_v10 = vld [vmem:[%s6788_s2 + $0x218] sm:$0xff]  ;;  %v4977_v50 = vld [vmem:[%s6788_s2 + $0x1a8] sm:$0xff]  ;;  %v4976_v51 = vld [vmem:[%s6788_s2 + $0x1a0] sm:$0xff] }
 0xe64   :  { %5570 = vmatprep.subr.mxu1 %v4956_v10 }
 0xe65   :  { %v2224_v54 = vadd.f32 %v4939_v49, %v2215_v53  ;;  %v2227_v57 = vadd.f32 %v2225_v52, %v6003_v5  ;;  %5571 = vmatpush3.msra.mxu1 %v4956_v10  ;;  %v4978_v49 = vld [vmem:[%s6788_s2 + $0x1b0] sm:$0xff]  ;;  %v4995_v52 = vld [vmem:[%s6788_s2 + $0x2b8] sm:$0xff] }
 0xe66   :  { %5572 = vmatprep.subr.mxu1 %v4955_v12  ;;  %v4994_v53 = vld [vmem:[%s6788_s2 + $0x2b0] sm:$0xff] }
 0xe67   :  { %v2231_v58 = vsel %vm54_vm0, %v2227_v57, 0.0  ;;  %v2226_v59 = vadd.f32 %v2224_v54, %v5990_v2  ;;  %v4948_v2 = vld [vmem:[%s6788_s2 + $0x198] sm:$0xff]  ;;  %5573 = vmatpush3.msra.mxu1 %v4955_v12  ;;  %v4993_v54 = vld [vmem:[%s6788_s2 + $0x2a8] sm:$0xff]  ;;  %v4997_v10 = vld [vmem:[%s6789_s3 + $0x15] ss:$0 sm:$0xff] }
 0xe68   :  { %2232 = vadd.xlane.f32.xlu1 %v2231_v58  ;;  %5559 = vmatprep.subr.mxu0 %v4948_v2 }
 0xe69   :  { %v2228_v60 = vsel %vm54_vm0, %v2226_v59, 0.0  ;;  %5560 = vmatpush3.msra.mxu0 %v4948_v2  ;;  %5574 = vmatprep.subr.mxu1 %v4954_v14 }
 0xe6a   :  { %2229 = vadd.xlane.f32.xlu0 %v2228_v60  ;;  %5561 = vmatprep.subr.mxu0 %v4947_v11 }
 0xe6b   :  { %5562 = vmatpush3.msra.mxu0 %v4947_v11  ;;  %5575 = vmatpush3.msra.mxu1 %v4954_v14 }
 0xe6c   :  { %5563 = vmatprep.subr.mxu0 %v4946_v13  ;;  %5576 = vmatprep.subr.mxu1 %v4953_v55 }
 0xe6d   :  { %5564 = vmatpush3.msra.mxu0 %v4946_v13  ;;  %5577 = vmatpush3.msra.mxu1 %v4953_v55 }
 0xe6e   :  { %5565 = vmatprep.subr.mxu0 %v4945_v15 }
 0xe6f   :  { %5566 = vmatpush3.msra.mxu0 %v4945_v15 }
 0xe70   :  { %5581 = vmatprep.subr.mxu0 %v4964_v56 }
 0xef1   :  { %v2233_v61 = vpop.xlane.xlu1 %2232 }
 0xef2   :  { %v2236_v62 = vmul.f32 0.03125, %v2233_v61 }
 0xef3   :  { %v2230_v63 = vpop.xlane.xlu0 %2229 }
 0xef4   :  { %v2238_v0 = vsub.f32 %v2227_v57, %v2236_v62  ;;  %v2235_v1 = vmul.f32 0.03125, %v2230_v63  ;;  %v4992_v57 = vld [vmem:[%s6788_s2 + $0x2a0] sm:$0xff]  ;;  %v6445_v62 = vld [vmem:[%s6787_s1 + $0x10] sm:$0xff] }
 0xef6   :  { %v2237_v3 = vsub.f32 %v2226_v59, %v2235_v1  ;;  %v2240_v7 = vmul.f32 %v2238_v0, %v2238_v0  ;;  %v6440_v59 = vld [vmem:[%s6787_s1 + $0x18] sm:$0xff] }
 0xef8   :  { %v2244_v8 = vsel %vm54_vm0, %v2240_v7, 0.0  ;;  %v2239_v9 = vmul.f32 %v2237_v3, %v2237_v3  ;;  %v4981_v7 = vld [vmem:[%s6789_s3 + $0xd] ss:$0 sm:$0xff] }
 0xef9   :  { %2245 = vadd.xlane.f32.xlu1 %v2244_v8 }
 0xefa   :  { %v2241_v5 = vsel %vm54_vm0, %v2239_v9, 0.0 }
 0xefb   :  { %2242 = vadd.xlane.f32.xlu0 %v2241_v5 }
 0xf82   :  { %v2246_v4 = vpop.xlane.xlu1 %2245 }
 0xf83   :  { %v2248_v6 = vmul.f32 0.03125, %v2246_v4 }
 0xf84   :  { %v2243_v16 = vpop.xlane.xlu0 %2242 }
 0xf85   :  { %v2250_v17 = vadd.f32 1e-05, %v2248_v6  ;;  %v2247_v18 = vmul.f32 0.03125, %v2243_v16 }
 0xf87   :  { %5848 = vrsqrt.f32 %v2250_v17  ;;  %v2249_v19 = vadd.f32 1e-05, %v2247_v18 }
 0xf89   :  { %5850 = vrsqrt.f32 %v2249_v19 }
 0xf94   :  { %v5849_v20 = vpop.eup %5848 }
 0xf95   :  { %v2254_v22 = vmul.f32 %v5849_v20, %v2238_v0 }
 0xf96   :  { %v5851_v23 = vpop.eup %5850 }
 0xf97   :  { %v2253_v24 = vmul.f32 %v5851_v23, %v2237_v3  ;;  %v2263_v25 = vmul.f32 %v4940_v21, %v2254_v22 }
 0xf99   :  { %v2262_v28 = vmul.f32 %v4940_v21, %v2253_v24  ;;  %v6367_v31 = vadd.f32 %v4942_v27, %v2263_v25  ;;  %v4987_v21 = vld [vmem:[%s6788_s2 + $0x238] sm:$0xff] }
 0xf9b   :  { %v6365_v30 = vadd.f32 %v4942_v27, %v2262_v28 }
 0xf9d   :  { %5567 = vmatprep.mubr.msk.f32.mxu0 %vm54_vm0, %v6365_v30  ;;  %5578 = vmatprep.mubr.msk.f32.mxu1 %vm54_vm0, %v6365_v30 }
 0xf9e   :  { %5568 = vmatmul.mubr.msk.f32.vlgmr.msra.gmra.mxu0 %vm54_vm0, %v6367_v31  ;;  %5579 = vmatmul.mubr.msk.f32.vlgmr.msra.gmra.mxu1 %vm54_vm0, %v6367_v31 }
 0xf9f   :  { %5582 = vmatpush3.msra.mxu0 %v4964_v56  ;;  %5589 = vmatprep.mubr.msk.f32.mxu0 %vm54_vm0, %v6365_v30 }
 0xfa0   :  { %5583 = vmatprep.subr.mxu0 %v4963_v32 }
 0xfa1   :  { %5584 = vmatpush3.msra.mxu0 %v4963_v32  ;;  %v4986_v32 = vld [vmem:[%s6788_s2 + $0x230] sm:$0xff] }
 0xfa2   :  { %5585 = vmatprep.subr.mxu0 %v4962_v33 }
 0xfa3   :  { %5586 = vmatpush3.msra.mxu0 %v4962_v33  ;;  %v4985_v33 = vld [vmem:[%s6788_s2 + $0x228] sm:$0xff] }
 0xfa4   :  { %5587 = vmatprep.subr.mxu0 %v4961_v29 }
 0xfa5   :  { %5588 = vmatpush3.msra.mxu0 %v4961_v29  ;;  %v4984_v29 = vld [vmem:[%s6788_s2 + $0x220] sm:$0xff] }
 0xfa6   :  { %5590 = vmatmul.mubr.msk.f32.vlgmr.msra.gmra.mxu0 %vm54_vm0, %v6367_v31 }
0x105e   :  { %v5569_v26 = vpop.f32.mrf.mxu0  ;;  %v5580_v35 = vpop.f32.mrf.mxu1 }
0x105f   :  { %v2456_v36 = vadd.f32 %v5580_v35, %v4958_v34  ;;  %v2368_v45 = vadd.f32 %v5569_v26, %v4950_v37 }
0x1060   :  { %v2362_v38 = vpop.f32.mrf.mxu0  ;;  %v2450_v39 = vpop.f32.mrf.mxu1 }
0x1061   :  { %v2363_v40 = vadd.f32 %v4950_v37, %v2362_v38  ;;  %v2451_v41 = vadd.f32 %v4958_v34, %v2450_v39  ;;  %5592 = vmatprep.subr.msk.mxu1 %vm312_vm1, %v2456_v36 }
0x1062   :  { %5593 = vmatpush3.xpose.msk.msra.mxu1 %vm312_vm1, %v2456_v36  ;;  %v4989_v36 = vld [vmem:[%s6789_s3 + $0x11] ss:$0 sm:$0xff] }
0x1063   :  { %5594 = vmatprep.subr.msk.mxu1 %vm312_vm1, %v2451_v41  ;;  %5596 = vmatprep.mubr.msk.f32.mxu1 %vm312_vm1, %v2363_v40 }
0x1066   :  { %v5591_v44 = vpop.f32.mrf.mxu0  ;;  %5595 = vmatpush3.xpose.msk.msra.mxu1 %vm312_vm1, %v2451_v41 }
0x1067   :  { %v2544_v46 = vadd.f32 %v5591_v44, %v4966_v42  ;;  %5606 = vmatprep.subr.mxu1 %v4979_v43 }
0x1068   :  { %v2538_v47 = vpop.f32.mrf.mxu0 }
0x1069   :  { %v2539_v48 = vadd.f32 %v4966_v42, %v2538_v47  ;;  %5599 = vmatprep.subr.mxu0 %v2544_v46  ;;  %5597 = vmatmul.mubr.msk.f32.vlgmr.msra.gmra.mxu1 %vm312_vm1, %v2368_v45 }
0x106a   :  { %5600 = vmatpush3.msra.mxu0 %v2544_v46  ;;  %5607 = vmatpush3.msra.mxu1 %v4979_v43 }
0x106b   :  { %5601 = vmatprep.subr.mxu0 %v2539_v48  ;;  %5614 = vmatprep.mubr.msk.f32.mxu1 %vm54_vm0, %v6365_v30 }
0x106c   :  { %5602 = vmatpush3.msra.mxu0 %v2539_v48  ;;  %5608 = vmatprep.subr.mxu1 %v4978_v49 }
0x106d   :  { %5609 = vmatpush3.msra.mxu1 %v4978_v49  ;;  %5617 = vmatprep.subr.mxu0 %v4987_v21 }
0x106e   :  { %5610 = vmatprep.subr.mxu1 %v4977_v50 }
0x106f   :  { %5611 = vmatpush3.msra.mxu1 %v4977_v50 }
0x1070   :  { %5612 = vmatprep.subr.mxu1 %v4976_v51 }
0x1071   :  { %5613 = vmatpush3.msra.mxu1 %v4976_v51 }
0x1072   :  { %5615 = vmatmul.mubr.msk.f32.vlgmr.msra.gmra.mxu1 %vm54_vm0, %v6367_v31  ;;  %5628 = vmatprep.subr.mxu1 %v4995_v52 }
0x1073   :  { %5629 = vmatpush3.msra.mxu1 %v4995_v52  ;;  %5636 = vmatprep.mubr.msk.f32.mxu1 %vm54_vm0, %v6365_v30 }
0x1074   :  { %5630 = vmatprep.subr.mxu1 %v4994_v53 }
0x1075   :  { %5631 = vmatpush3.msra.mxu1 %v4994_v53 }
0x1076   :  { %5632 = vmatprep.subr.mxu1 %v4993_v54 }
0x1077   :  { %5633 = vmatpush3.msra.mxu1 %v4993_v54 }
0x1078   :  { %5634 = vmatprep.subr.mxu1 %v4992_v57 }
0x1079   :  { %5635 = vmatpush3.msra.mxu1 %v4992_v57 }
0x107a   :  { %5637 = vmatmul.mubr.msk.f32.vlgmr.msra.gmra.mxu1 %vm54_vm0, %v6367_v31 }
0x1129   :  { %v5598_v58 = vpop.f32.mrf.mxu1 }
0x112a   :  { %v2635_v60 = vmul.f32 0.17677669, %v5598_v58 }
0x112b   :  { %v2625_v61 = vpop.f32.mrf.mxu1 }
0x112c   :  { %v2634_v63 = vmul.f32 0.17677669, %v2625_v61  ;;  %v2637_v0 = vadd.f32 %v6440_v59, %v2635_v60 }
0x112e   :  { %v2641_v1 = vsel %vm404_vm2, %v2637_v0, -inf  ;;  %v2636_v3 = vadd.f32 %v6445_v62, %v2634_v63  ;;  %v4975_v63 = vld [vmem:[%s6790_s4 + $0x20] sm:$0xff] }
0x112f   :  { %2642 = vmax.xlane.f32.xlu1 %v2641_v1 }
0x1130   :  { %v2638_v8 = vsel %vm404_vm2, %v2636_v3, -inf }
0x1131   :  { %2639 = vmax.xlane.f32.xlu0 %v2638_v8 }
0x1132   :  { %v5616_v9 = vpop.f32.mrf.mxu1 }
0x1133   :  { %v2828_v5 = vadd.f32 %v5616_v9, %v4981_v7 }
0x1134   :  { %v2822_v2 = vpop.f32.mrf.mxu1 }
0x1135   :  { %v2823_v34 = vadd.f32 %v4981_v7, %v2822_v2  ;;  %v5022_v2 = vld [vmem:[%s6788_s2 + $0x258] sm:$0xff] }
0x113a   :  { %v5638_v11 = vpop.f32.mrf.mxu1 }
0x113b   :  { %v3004_v12 = vadd.f32 %v5638_v11, %v4997_v10  ;;  %v5020_v11 = vld [vmem:[%s6788_s2 + $0x248] sm:$0xff] }
0x113c   :  { %v2998_v13 = vpop.f32.mrf.mxu1 }
0x113d   :  { %v2999_v14 = vadd.f32 %v4997_v10, %v2998_v13  ;;  %5646 = vmatprep.subr.mxu1 %v3004_v12  ;;  %v5021_v10 = vld [vmem:[%s6788_s2 + $0x250] sm:$0xff]  ;;  %v5014_v13 = vld [vmem:[%s6788_s2 + $0x1d8] sm:$0xff] }
0x113e   :  { %5647 = vmatpush3.msra.mxu1 %v3004_v12  ;;  %v5019_v12 = vld [vmem:[%s6788_s2 + $0x240] sm:$0xff] }
0x113f   :  { %5648 = vmatprep.subr.mxu1 %v2999_v14 }
0x1140   :  { %5649 = vmatpush3.msra.mxu1 %v2999_v14 }
0x1141   :  { %5658 = vmatprep.subr.mxu1 %v4975_v63 }
0x11b8   :  { %v2643_v15 = vpop.xlane.xlu1 %2642 }
0x11b9   :  { %v2645_v55 = vsub.f32 %v2637_v0, %v2643_v15  ;;  %v5006_v0 = vld [vmem:[%s6790_s4 + $0x28] sm:$0xff] }
0x11ba   :  { %v2640_v56 = vpop.xlane.xlu0 %2639 }
0x11bb   :  { %v2648_v4 = vmul.f32 1.442695, %v2645_v55  ;;  %v2644_v6 = vsub.f32 %v2636_v3, %v2640_v56  ;;  %v5013_v55 = vld [vmem:[%s6788_s2 + $0x1d0] sm:$0xff]  ;;  %v5012_v56 = vld [vmem:[%s6788_s2 + $0x1c8] sm:$0xff] }
0x11bd   :  { %5852 = vpow2.f32 %v2648_v4  ;;  %v2646_v16 = vmul.f32 1.442695, %v2644_v6  ;;  %v5011_v6 = vld [vmem:[%s6788_s2 + $0x1c0] sm:$0xff] }
0x11bf   :  { %5854 = vpow2.f32 %v2646_v16  ;;  %v5030_v16 = vld [vmem:[%s6788_s2 + $0x2d8] sm:$0xff] }
0x11ca   :  { %v5853_v17 = vpop.eup %5852 }
0x11cb   :  { %v2653_v18 = vsel %vm404_vm2, %v5853_v17, 0.0 }
0x11cc   :  { %v5855_v19 = vpop.eup %5854  ;;  %2654 = vadd.xlane.f32.xlu1 %v2653_v18  ;;  %v5024_v18 = vld [vmem:[%s6789_s3 + $0x12] ss:$0 sm:$0xff] }
0x11cd   :  { %v2650_v20 = vsel %vm404_vm2, %v5855_v19, 0.0 }
0x11ce   :  { %2651 = vadd.xlane.f32.xlu0 %v2650_v20 }
0x1255   :  { %v2655_v22 = vpop.xlane.xlu1 %2654 }
0x1256   :  { %5856 = vrcp.f32 %v2655_v22  ;;  %v5028_v22 = vld [vmem:[%s6788_s2 + $0x2c8] sm:$0xff] }
0x1257   :  { %v2652_v23 = vpop.xlane.xlu0 %2651 }
0x1258   :  { %5858 = vrcp.f32 %v2652_v23 }
0x1263   :  { %v5857_v24 = vpop.eup %5856 }
0x1264   :  { %v2659_v28 = vmul.f32 %v5857_v24, %v5853_v17 }
0x1265   :  { %v5859_v25 = vpop.eup %5858 }
0x1266   :  { %v2657_v27 = vmul.f32 %v5859_v25, %v5855_v19  ;;  %v5029_v19 = vld [vmem:[%s6788_s2 + $0x2d0] sm:$0xff]  ;;  %v5027_v25 = vld [vmem:[%s6788_s2 + $0x2c0] sm:$0xff] }
0x1268   :  { %5603 = vmatprep.mubr.msk.f32.mxu0 %vm404_vm2, %v2657_v27 }
0x1269   :  { %5604 = vmatmul.mubr.msk.f32.vlgmr.msra.gmra.mxu0 %vm404_vm2, %v2659_v28 }
0x126a   :  { %5618 = vmatpush3.msra.mxu0 %v4987_v21  ;;  %5625 = vmatprep.mubr.msk.f32.mxu0 %vm54_vm0, %v6365_v30 }
0x126b   :  { %5619 = vmatprep.subr.mxu0 %v4986_v32 }
0x126c   :  { %5620 = vmatpush3.msra.mxu0 %v4986_v32 }
0x126d   :  { %5621 = vmatprep.subr.mxu0 %v4985_v33 }
0x126e   :  { %5622 = vmatpush3.msra.mxu0 %v4985_v33  ;;  %v5016_v33 = vld [vmem:[%s6789_s3 + $0xe] ss:$0 sm:$0xff] }
0x126f   :  { %5623 = vmatprep.subr.mxu0 %v4984_v29 }
0x1270   :  { %5624 = vmatpush3.msra.mxu0 %v4984_v29 }
0x1271   :  { %5626 = vmatmul.mubr.msk.f32.vlgmr.msra.gmra.mxu0 %vm54_vm0, %v6367_v31 }
0x1272   :  { %5643 = vmatprep.mubr.msk.f32.mxu0 %vm312_vm1, %v2823_v34 }
0x1329   :  { %v5605_v26 = vpop.f32.mrf.mxu0 }
0x132b   :  { %v2732_v35 = vpop.f32.mrf.mxu0 }
0x1331   :  { %v5627_v37 = vpop.f32.mrf.mxu0 }
0x1332   :  { %v2916_v38 = vadd.f32 %v5627_v37, %v4989_v36 }
0x1333   :  { %v2910_v39 = vpop.f32.mrf.mxu0 }
0x1334   :  { %v2911_v40 = vadd.f32 %v4989_v36, %v2910_v39  ;;  %5639 = vmatprep.subr.msk.mxu0 %vm312_vm1, %v2916_v38 }
0x1335   :  { %5640 = vmatpush3.xpose.msk.msra.mxu0 %vm312_vm1, %v2916_v38 }
0x1336   :  { %5641 = vmatprep.subr.msk.mxu0 %vm312_vm1, %v2911_v40 }
0x1339   :  { %5642 = vmatpush3.xpose.msk.msra.mxu0 %vm312_vm1, %v2911_v40 }
0x133a   :  { %5653 = vmatprep.subr.mxu0 %v5006_v0 }
0x133c   :  { %5644 = vmatmul.mubr.msk.f32.vlgmr.msra.gmra.mxu0 %vm312_vm1, %v2828_v5 }
0x133d   :  { %5654 = vmatpush3.msra.mxu0 %v5006_v0 }
0x133e   :  { %5663 = vmatprep.subr.mxu0 %v5014_v13 }
0x13fc   :  { %v5645_v41 = vpop.f32.mrf.mxu0 }
0x13fd   :  { %v3095_v42 = vmul.f32 0.17677669, %v5645_v41 }
0x13fe   :  { %v3085_v43 = vpop.f32.mrf.mxu0 }
0x13ff   :  { %v3094_v44 = vmul.f32 0.17677669, %v3085_v43  ;;  %v3097_v45 = vadd.f32 %v6440_v59, %v3095_v42 }
0x1401   :  { %v3101_v46 = vsel %vm404_vm2, %v3097_v45, -inf  ;;  %v3096_v47 = vadd.f32 %v6445_v62, %v3094_v44 }
0x1402   :  { %3102 = vmax.xlane.f32.xlu1 %v3101_v46 }
0x1403   :  { %v3098_v48 = vsel %vm404_vm2, %v3096_v47, -inf }
0x1404   :  { %3099 = vmax.xlane.f32.xlu0 %v3098_v48 }
0x148b   :  { %v3103_v49 = vpop.xlane.xlu1 %3102 }
0x148c   :  { %v3105_v50 = vsub.f32 %v3097_v45, %v3103_v49 }
0x148d   :  { %v3100_v51 = vpop.xlane.xlu0 %3099 }
0x148e   :  { %v3108_v52 = vmul.f32 1.442695, %v3105_v50  ;;  %v3104_v53 = vsub.f32 %v3096_v47, %v3100_v51 }
0x1490   :  { %5860 = vpow2.f32 %v3108_v52  ;;  %v3106_v54 = vmul.f32 1.442695, %v3104_v53 }
0x1492   :  { %5862 = vpow2.f32 %v3106_v54 }
0x149d   :  { %v5861_v57 = vpop.eup %5860 }
0x149e   :  { %v3113_v58 = vsel %vm404_vm2, %v5861_v57, 0.0 }
0x149f   :  { %v5863_v60 = vpop.eup %5862  ;;  %3114 = vadd.xlane.f32.xlu1 %v3113_v58 }
0x14a0   :  { %v3110_v61 = vsel %vm404_vm2, %v5863_v60, 0.0 }
0x14a1   :  { %3111 = vadd.xlane.f32.xlu0 %v3110_v61  ;;  %v5047_v61 = vld [vmem:[%s6788_s2 + $0x1f8] sm:$0xff] }
0x1528   :  { %v3115_v1 = vpop.xlane.xlu1 %3114 }
0x1529   :  { %5864 = vrcp.f32 %v3115_v1 }
0x152a   :  { %v3112_v3 = vpop.xlane.xlu0 %3111 }
0x152b   :  { %5866 = vrcp.f32 %v3112_v3 }
0x1536   :  { %v5865_v7 = vpop.eup %5864 }
0x1537   :  { %v3119_v5 = vmul.f32 %v5865_v7, %v5861_v57 }
0x1538   :  { %v5867_v8 = vpop.eup %5866 }
0x1539   :  { %v3117_v9 = vmul.f32 %v5867_v8, %v5863_v60 }
0x153b   :  { %5650 = vmatprep.mubr.msk.f32.mxu1 %vm404_vm2, %v3117_v9 }
0x153c   :  { %5651 = vmatmul.mubr.msk.f32.vlgmr.msra.gmra.mxu1 %vm404_vm2, %v3119_v5  ;;  %v5046_v5 = vld [vmem:[%s6788_s2 + $0x1f0] sm:$0xff] }
0x153d   :  { %5660 = vmatprep.mubr.msk.f32.mxu1 %vm312_vm1, %v2732_v35  ;;  %5659 = vmatpush3.msra.mxu1 %v4975_v63  ;;  %v5032_v35 = vld [vmem:[%s6789_s3 + $0x16] ss:$0 sm:$0xff] }
0x153e   :  { %5674 = vmatprep.subr.mxu1 %v5022_v2  ;;  %v5041_v63 = vld [vmem:[%s6790_s4 + $0x30] sm:$0xff] }
0x1540   :  { %5661 = vmatmul.mubr.msk.f32.vlgmr.msra.gmra.mxu1 %vm312_vm1, %v5605_v26 }
0x1541   :  { %5675 = vmatpush3.msra.mxu1 %v5022_v2  ;;  %5682 = vmatprep.mubr.msk.f32.mxu1 %vm54_vm0, %v6365_v30  ;;  %v5045_v2 = vld [vmem:[%s6788_s2 + $0x1e8] sm:$0xff] }
0x1542   :  { %5676 = vmatprep.subr.mxu1 %v5021_v10 }
0x1543   :  { %5677 = vmatpush3.msra.mxu1 %v5021_v10  ;;  %v5044_v10 = vld [vmem:[%s6788_s2 + $0x1e0] sm:$0xff] }
0x1544   :  { %5678 = vmatprep.subr.mxu1 %v5020_v11 }
0x1545   :  { %5679 = vmatpush3.msra.mxu1 %v5020_v11  ;;  %v5063_v11 = vld [vmem:[%s6788_s2 + $0x2f8] sm:$0xff] }
0x1546   :  { %5680 = vmatprep.subr.mxu1 %v5019_v12 }
0x1547   :  { %5681 = vmatpush3.msra.mxu1 %v5019_v12  ;;  %v5062_v12 = vld [vmem:[%s6788_s2 + $0x2f0] sm:$0xff] }
0x1548   :  { %5683 = vmatmul.mubr.msk.f32.vlgmr.msra.gmra.mxu1 %vm54_vm0, %v6367_v31 }
0x15fc   :  { %v5652_v14 = vpop.f32.mrf.mxu1 }
0x15fe   :  { %v3192_v15 = vpop.f32.mrf.mxu1 }
0x15ff   :  { %5655 = vmatprep.mubr.msk.f32.mxu0 %vm312_vm1, %v3192_v15  ;;  %v5055_v15 = vld [vmem:[%s6788_s2 + $0x278] sm:$0xff] }
0x1600   :  { %5656 = vmatmul.mubr.msk.f32.vlgmr.msra.gmra.mxu0 %vm312_vm1, %v5652_v14  ;;  %v6531_v4 = vpop.f32.mrf.mxu1  ;;  %v5060_v14 = vld [vmem:[%s6788_s2 + $0x2e0] sm:$0xff] }
0x1601   :  { %5664 = vmatpush3.msra.mxu0 %v5014_v13  ;;  %5671 = vmatprep.mubr.msk.f32.mxu0 %vm54_vm0, %v6365_v30  ;;  %v5061_v13 = vld [vmem:[%s6788_s2 + $0x2e8] sm:$0xff] }
0x1602   :  { %5665 = vmatprep.subr.mxu0 %v5013_v55  ;;  %v6539_v17 = vpop.f32.mrf.mxu1 }
0x1603   :  { %5666 = vmatpush3.msra.mxu0 %v5013_v55 }
0x1604   :  { %5667 = vmatprep.subr.mxu0 %v5012_v56 }
0x1605   :  { %5668 = vmatpush3.msra.mxu0 %v5012_v56 }
0x1606   :  { %5669 = vmatprep.subr.mxu0 %v5011_v6 }
0x1607   :  { %5670 = vmatpush3.msra.mxu0 %v5011_v6  ;;  %v5054_v6 = vld [vmem:[%s6788_s2 + $0x270] sm:$0xff] }
0x1608   :  { %5672 = vmatmul.mubr.msk.f32.vlgmr.msra.gmra.mxu0 %vm54_vm0, %v6367_v31  ;;  %v5684_v20 = vpop.f32.mrf.mxu1  ;;  %5685 = vmatprep.subr.mxu0 %v5030_v16 }
0x1609   :  { %v3538_v21 = vadd.f32 %v5684_v20, %v5024_v18  ;;  %5686 = vmatpush3.msra.mxu0 %v5030_v16  ;;  %5693 = vmatprep.mubr.msk.f32.mxu0 %vm54_vm0, %v6365_v30  ;;  %v5053_v16 = vld [vmem:[%s6788_s2 + $0x268] sm:$0xff] }
0x160a   :  { %v3532_v23 = vpop.f32.mrf.mxu1  ;;  %5687 = vmatprep.subr.mxu0 %v5029_v19 }
0x160b   :  { %v3533_v24 = vadd.f32 %v5024_v18, %v3532_v23  ;;  %5688 = vmatpush3.msra.mxu0 %v5029_v19  ;;  %5696 = vmatprep.subr.msk.mxu1 %vm312_vm1, %v3538_v21  ;;  %v5049_v18 = vld [vmem:[%s6789_s3 + $0xf] ss:$0 sm:$0xff]  ;;  %v5052_v19 = vld [vmem:[%s6788_s2 + $0x260] sm:$0xff] }
0x160c   :  { %5689 = vmatprep.subr.mxu0 %v5028_v22  ;;  %5697 = vmatpush3.xpose.msk.msra.mxu1 %vm312_vm1, %v3538_v21 }
0x160d   :  { %5690 = vmatpush3.msra.mxu0 %v5028_v22  ;;  %5698 = vmatprep.subr.msk.mxu1 %vm312_vm1, %v3533_v24 }
0x160e   :  { %5691 = vmatprep.subr.mxu0 %v5027_v25 }
0x160f   :  { %5692 = vmatpush3.msra.mxu0 %v5027_v25 }
0x1610   :  { %5694 = vmatmul.mubr.msk.f32.vlgmr.msra.gmra.mxu0 %vm54_vm0, %v6367_v31  ;;  %5699 = vmatpush3.xpose.msk.msra.mxu1 %vm312_vm1, %v3533_v24  ;;  %v5065_v24 = vld [vmem:[%s6789_s3 + $0x17] ss:$0 sm:$0xff] }
0x1611   :  { %5710 = vmatprep.subr.mxu1 %v5041_v63 }
0x16c0   :  { %v6563_v27 = vpop.f32.mrf.mxu0 }
0x16c2   :  { %v6565_v28 = vpop.f32.mrf.mxu0 }
0x16c8   :  { %v5673_v32 = vpop.f32.mrf.mxu0 }
0x16c9   :  { %v3450_v26 = vadd.f32 %v5673_v32, %v5016_v33 }
0x16ca   :  { %v3444_v29 = vpop.f32.mrf.mxu0 }
0x16cb   :  { %v3445_v34 = vadd.f32 %v5016_v33, %v3444_v29 }
0x16cd   :  { %5700 = vmatprep.mubr.msk.f32.mxu1 %vm312_vm1, %v3445_v34  ;;  %v3362_v34 = vadd.f32 %v6531_v4, %v6563_v27 }
0x16ce   :  { %5701 = vmatmul.mubr.msk.f32.vlgmr.msra.gmra.mxu1 %vm312_vm1, %v3450_v26 }
0x16cf   :  { %5711 = vmatpush3.msra.mxu1 %v5041_v63 }
0x16d0   :  { %v5695_v36 = vpop.f32.mrf.mxu0  ;;  %5726 = vmatprep.subr.mxu1 %v5055_v15 }
0x16d1   :  { %v3626_v37 = vadd.f32 %v5695_v36, %v5032_v35 }
0x16d2   :  { %v3620_v38 = vpop.f32.mrf.mxu0 }
0x16d3   :  { %v3621_v39 = vadd.f32 %v5032_v35, %v3620_v38  ;;  %5703 = vmatprep.subr.mxu0 %v3626_v37  ;;  %v3357_v35 = vadd.f32 %v6539_v17, %v6565_v28 }
0x16d4   :  { %5704 = vmatpush3.msra.mxu0 %v3626_v37 }
0x16d5   :  { %5705 = vmatprep.subr.mxu0 %v3621_v39 }
0x16d6   :  { %5706 = vmatpush3.msra.mxu0 %v3621_v39  ;;  %v5057_v39 = vld [vmem:[%s6789_s3 + $0x13] ss:$0 sm:$0xff] }
0x16d7   :  { %5715 = vmatprep.subr.mxu0 %v5047_v61 }
0x178e   :  { %v5702_v40 = vpop.f32.mrf.mxu1 }
0x178f   :  { %v3717_v41 = vmul.f32 0.17677669, %v5702_v40 }
0x1790   :  { %v3707_v42 = vpop.f32.mrf.mxu1 }
0x1791   :  { %v3716_v43 = vmul.f32 0.17677669, %v3707_v42  ;;  %v3719_v44 = vadd.f32 %v6440_v59, %v3717_v41 }
0x1793   :  { %v3723_v45 = vsel %vm404_vm2, %v3719_v44, -inf  ;;  %v3718_v46 = vadd.f32 %v6445_v62, %v3716_v43 }
0x1794   :  { %3724 = vmax.xlane.f32.xlu1 %v3723_v45 }
0x1795   :  { %v3720_v47 = vsel %vm404_vm2, %v3718_v46, -inf }
0x1796   :  { %3721 = vmax.xlane.f32.xlu0 %v3720_v47 }
0x181d   :  { %v3725_v48 = vpop.xlane.xlu1 %3724 }
0x181e   :  { %v3727_v49 = vsub.f32 %v3719_v44, %v3725_v48 }
0x181f   :  { %v3722_v50 = vpop.xlane.xlu0 %3721 }
0x1820   :  { %v3730_v51 = vmul.f32 1.442695, %v3727_v49  ;;  %v3726_v52 = vsub.f32 %v3718_v46, %v3722_v50 }
0x1822   :  { %5868 = vpow2.f32 %v3730_v51  ;;  %v3728_v53 = vmul.f32 1.442695, %v3726_v52 }
0x1824   :  { %5870 = vpow2.f32 %v3728_v53 }
0x182f   :  { %v5869_v54 = vpop.eup %5868 }
0x1830   :  { %v3735_v57 = vsel %vm404_vm2, %v5869_v54, 0.0 }
0x1831   :  { %v5871_v58 = vpop.eup %5870  ;;  %3736 = vadd.xlane.f32.xlu1 %v3735_v57 }
0x1832   :  { %v3732_v60 = vsel %vm404_vm2, %v5871_v58, 0.0 }
0x1833   :  { %3733 = vadd.xlane.f32.xlu0 %v3732_v60 }
0x18ba   :  { %v3737_v0 = vpop.xlane.xlu1 %3736 }
0x18bb   :  { %5872 = vrcp.f32 %v3737_v0 }
0x18bc   :  { %v3734_v1 = vpop.xlane.xlu0 %3733 }
0x18bd   :  { %5874 = vrcp.f32 %v3734_v1 }
0x18c8   :  { %v5873_v3 = vpop.eup %5872 }
0x18c9   :  { %v3741_v9 = vmul.f32 %v5873_v3, %v5869_v54 }
0x18ca   :  { %v5875_v7 = vpop.eup %5874 }
0x18cb   :  { %v3739_v8 = vmul.f32 %v5875_v7, %v5871_v58 }
0x18cd   :  { %5707 = vmatprep.mubr.msk.f32.mxu0 %vm404_vm2, %v3739_v8 }
0x18ce   :  { %5708 = vmatmul.mubr.msk.f32.vlgmr.msra.gmra.mxu0 %vm404_vm2, %v3741_v9 }
0x18cf   :  { %5716 = vmatpush3.msra.mxu0 %v5047_v61  ;;  %5723 = vmatprep.mubr.msk.f32.mxu0 %vm54_vm0, %v6365_v30 }
0x18d0   :  { %5717 = vmatprep.subr.mxu0 %v5046_v5 }
0x18d1   :  { %5718 = vmatpush3.msra.mxu0 %v5046_v5  ;;  %v5078_v5 = vld [vmem:[%s6791_s5 + $0x1] ss:$0 sm:$0xff] }
0x18d2   :  { %5719 = vmatprep.subr.mxu0 %v5045_v2 }
0x18d3   :  { %5720 = vmatpush3.msra.mxu0 %v5045_v2 }
0x18d4   :  { %5721 = vmatprep.subr.mxu0 %v5044_v10 }
0x18d5   :  { %5722 = vmatpush3.msra.mxu0 %v5044_v10 }
0x18d6   :  { %5724 = vmatmul.mubr.msk.f32.vlgmr.msra.gmra.mxu0 %vm54_vm0, %v6367_v31  ;;  %5737 = vmatprep.subr.mxu0 %v5063_v11 }
0x18d7   :  { %5738 = vmatpush3.msra.mxu0 %v5063_v11  ;;  %5745 = vmatprep.mubr.msk.f32.mxu0 %vm54_vm0, %v6365_v30 }
0x18d8   :  { %5739 = vmatprep.subr.mxu0 %v5062_v12 }
0x18d9   :  { %5740 = vmatpush3.msra.mxu0 %v5062_v12 }
0x18da   :  { %5741 = vmatprep.subr.mxu0 %v5061_v13 }
0x18db   :  { %5742 = vmatpush3.msra.mxu0 %v5061_v13 }
0x18dc   :  { %5743 = vmatprep.subr.mxu0 %v5060_v14 }
0x18dd   :  { %5744 = vmatpush3.msra.mxu0 %v5060_v14 }
0x18de   :  { %5746 = vmatmul.mubr.msk.f32.vlgmr.msra.gmra.mxu0 %vm54_vm0, %v6367_v31 }
0x198e   :  { %v5709_v55 = vpop.f32.mrf.mxu0 }
0x1990   :  { %v3814_v56 = vpop.f32.mrf.mxu0 }
0x1991   :  { %5712 = vmatprep.mubr.msk.f32.mxu1 %vm312_vm1, %v3814_v56 }
0x1992   :  { %5713 = vmatmul.mubr.msk.f32.vlgmr.msra.gmra.mxu1 %vm312_vm1, %v5709_v55 }
0x1993   :  { %5727 = vmatpush3.msra.mxu1 %v5055_v15  ;;  %5734 = vmatprep.mubr.msk.f32.mxu1 %vm54_vm0, %v6365_v30 }
0x1994   :  { %5728 = vmatprep.subr.mxu1 %v5054_v6 }
0x1995   :  { %5729 = vmatpush3.msra.mxu1 %v5054_v6 }
0x1996   :  { %v5725_v20 = vpop.f32.mrf.mxu0  ;;  %5730 = vmatprep.subr.mxu1 %v5053_v16 }
0x1997   :  { %v3993_v21 = vadd.f32 %v5725_v20, %v5049_v18  ;;  %5731 = vmatpush3.msra.mxu1 %v5053_v16 }
0x1998   :  { %v3987_v22 = vpop.f32.mrf.mxu0  ;;  %5732 = vmatprep.subr.mxu1 %v5052_v19 }
0x1999   :  { %v3988_v23 = vadd.f32 %v5049_v18, %v3987_v22  ;;  %5733 = vmatpush3.msra.mxu1 %v5052_v19 }
0x199a   :  { %5735 = vmatmul.mubr.msk.f32.vlgmr.msra.gmra.mxu1 %vm54_vm0, %v6367_v31 }
0x199b   :  { %5752 = vmatprep.mubr.msk.f32.mxu1 %vm312_vm1, %v3988_v23 }
0x199e   :  { %v5747_v25 = vpop.f32.mrf.mxu0 }
0x199f   :  { %v4169_v32 = vadd.f32 %v5747_v25, %v5065_v24  ;;  %v4511_v25 = vld [vmem:[%s6793_s7 + $0x10] sm:$0xff] }
0x19a0   :  { %v4163_v33 = vpop.f32.mrf.mxu0 }
0x19a1   :  { %v4164_v29 = vadd.f32 %v5065_v24, %v4163_v33  ;;  %5755 = vmatprep.subr.mxu0 %v4169_v32  ;;  %v4512_v24 = vld [vmem:[%s6793_s7 + $0x18] sm:$0xff]  ;;  %v4509_v33 = vld [vmem:[%s6793_s7] sm:$0xff] }
0x19a2   :  { %5756 = vmatpush3.msra.mxu0 %v4169_v32  ;;  %v4510_v32 = vld [vmem:[%s6793_s7 + $0x8] sm:$0xff] }
0x19a3   :  { %5757 = vmatprep.subr.mxu0 %v4164_v29 }
0x19a4   :  { %5758 = vmatpush3.msra.mxu0 %v4164_v29  ;;  %v4618_v29 = vld [vmem:[%s6795_s9 + $0x78] sm:$0xff] }
0x19a5   :  { %5767 = vmatprep.subr.mxu0 %v4512_v24 }
0x1a52   :  { %v5714_v26 = vpop.f32.mrf.mxu1 }
0x1a53   :  { %v3907_v36 = vadd.f32 %v5714_v26, %v3362_v34  ;;  %v4617_v34 = vld [vmem:[%s6795_s9 + $0x70] sm:$0xff]  ;;  %v4616_v26 = vld [vmem:[%s6795_s9 + $0x68] sm:$0xff] }
0x1a54   :  { %v3897_v37 = vpop.f32.mrf.mxu1 }
0x1a55   :  { %v3906_v38 = vadd.f32 %v3897_v37, %v3357_v35  ;;  %v4615_v35 = vld [vmem:[%s6795_s9 + $0x60] sm:$0xff]  ;;  %v4613_v37 = vld [vmem:[%s6795_s9 + $0x50] sm:$0xff] }
0x1a5a   :  { %v5736_v40 = vpop.f32.mrf.mxu1 }
0x1a5b   :  { %v4081_v41 = vadd.f32 %v5736_v40, %v5057_v39  ;;  %v4610_v40 = vld [vmem:[%s6795_s9 + $0x38] sm:$0xff] }
0x1a5c   :  { %v4075_v42 = vpop.f32.mrf.mxu1 }
0x1a5d   :  { %v4076_v43 = vadd.f32 %v5057_v39, %v4075_v42  ;;  %5748 = vmatprep.subr.msk.mxu1 %vm312_vm1, %v4081_v41  ;;  %v4611_v39 = vld [vmem:[%s6795_s9 + $0x40] sm:$0xff]  ;;  %v4608_v42 = vld [vmem:[%s6795_s9 + $0x28] sm:$0xff] }
0x1a5e   :  { %5749 = vmatpush3.xpose.msk.msra.mxu1 %vm312_vm1, %v4081_v41  ;;  %v4609_v41 = vld [vmem:[%s6795_s9 + $0x30] sm:$0xff] }
0x1a5f   :  { %5750 = vmatprep.subr.msk.mxu1 %vm312_vm1, %v4076_v43 }
0x1a62   :  { %5751 = vmatpush3.xpose.msk.msra.mxu1 %vm312_vm1, %v4076_v43  ;;  %v4607_v43 = vld [vmem:[%s6795_s9 + $0x20] sm:$0xff] }
0x1a65   :  { %5753 = vmatmul.mubr.msk.f32.vlgmr.msra.gmra.mxu1 %vm312_vm1, %v3993_v21 }
0x1b25   :  { %v5754_v4 = vpop.f32.mrf.mxu1 }
0x1b26   :  { %v4260_v17 = vmul.f32 0.17677669, %v5754_v4 }
0x1b27   :  { %v4250_v27 = vpop.f32.mrf.mxu1 }
0x1b28   :  { %v4259_v28 = vmul.f32 0.17677669, %v4250_v27  ;;  %v4262_v44 = vadd.f32 %v6440_v59, %v4260_v17 }
0x1b2a   :  { %v4266_v45 = vsel %vm404_vm2, %v4262_v44, -inf  ;;  %v4261_v46 = vadd.f32 %v6445_v62, %v4259_v28  ;;  %v5074_v62 = vld [vmem:[%s6790_s4 + $0x38] sm:$0xff] }
0x1b2b   :  { %4267 = vmax.xlane.f32.xlu1 %v4266_v45  ;;  %5762 = vmatprep.subr.mxu1 %v5074_v62 }
0x1b2c   :  { %v4263_v47 = vsel %vm404_vm2, %v4261_v46, -inf  ;;  %5763 = vmatpush3.msra.mxu1 %v5074_v62  ;;  %v4604_v62 = vld [vmem:[%s6795_s9 + $0x8] sm:$0xff] }
0x1b2d   :  { %4264 = vmax.xlane.f32.xlu0 %v4263_v47  ;;  %5778 = vmatprep.subr.mxu1 %v4618_v29 }
0x1bb4   :  { %v4268_v48 = vpop.xlane.xlu1 %4267 }
0x1bb5   :  { %v4270_v49 = vsub.f32 %v4262_v44, %v4268_v48  ;;  %v5080_v48 = vld [vmem:[%s6792_s6 + $0x2] ss:$0 sm:$0xff] }
0x1bb6   :  { %v4265_v50 = vpop.xlane.xlu0 %4264 }
0x1bb7   :  { %v4273_v51 = vmul.f32 1.442695, %v4270_v49  ;;  %v4269_v52 = vsub.f32 %v4261_v46, %v4265_v50 }
0x1bb9   :  { %5876 = vpow2.f32 %v4273_v51  ;;  %v4271_v53 = vmul.f32 1.442695, %v4269_v52 }
0x1bbb   :  { %5878 = vpow2.f32 %v4271_v53  ;;  %v5082_v53 = vld [vmem:[%s6792_s6 + $0x3] ss:$0 sm:$0xff] }
0x1bc6   :  { %v5877_v54 = vpop.eup %5876 }
0x1bc7   :  { %v4278_v57 = vsel %vm404_vm2, %v5877_v54, 0.0 }
0x1bc8   :  { %v5879_v59 = vpop.eup %5878  ;;  %4279 = vadd.xlane.f32.xlu1 %v4278_v57 }
0x1bc9   :  { %v4275_v58 = vsel %vm404_vm2, %v5879_v59, 0.0 }
0x1bca   :  { %4276 = vadd.xlane.f32.xlu0 %v4275_v58  ;;  %v4605_v58 = vld [vmem:[%s6795_s9 + $0x10] sm:$0xff] }
0x1c51   :  { %v4280_v60 = vpop.xlane.xlu1 %4279 }
0x1c52   :  { %5880 = vrcp.f32 %v4280_v60  ;;  %v4603_v60 = vld [vmem:[%s6795_s9] sm:$0xff] }
0x1c53   :  { %v4277_v61 = vpop.xlane.xlu0 %4276 }
0x1c54   :  { %5882 = vrcp.f32 %v4277_v61  ;;  %v5083_v61 = vld [vmem:[%s6794_s8] ss:$0 sm:$0xff] }
0x1c5f   :  { %v5881_v63 = vpop.eup %5880 }
0x1c60   :  { %v4284_v3 = vmul.f32 %v5881_v63, %v5877_v54 }
0x1c61   :  { %v5883_v0 = vpop.eup %5882 }
0x1c62   :  { %v4282_v1 = vmul.f32 %v5883_v0, %v5879_v59  ;;  %v4606_v59 = vld [vmem:[%s6795_s9 + $0x18] sm:$0xff] }
0x1c64   :  { %5759 = vmatprep.mubr.msk.f32.mxu0 %vm404_vm2, %v4282_v1 }
0x1c65   :  { %5760 = vmatmul.mubr.msk.f32.vlgmr.msra.gmra.mxu0 %vm404_vm2, %v4284_v3 }
0x1c66   :  { %5768 = vmatpush3.msra.mxu0 %v4512_v24 }
0x1c67   :  { %5769 = vmatprep.subr.mxu0 %v4511_v25 }
0x1c68   :  { %5770 = vmatpush3.msra.mxu0 %v4511_v25 }
0x1c69   :  { %5771 = vmatprep.subr.mxu0 %v4510_v32 }
0x1c6a   :  { %5772 = vmatpush3.msra.mxu0 %v4510_v32 }
0x1c6b   :  { %5773 = vmatprep.subr.mxu0 %v4509_v33 }
0x1c6c   :  { %5774 = vmatpush3.msra.mxu0 %v4509_v33 }
0x1d25   :  { %v5761_v7 = vpop.f32.mrf.mxu0 }
0x1d27   :  { %v4357_v8 = vpop.f32.mrf.mxu0 }
0x1d28   :  { %5764 = vmatprep.mubr.msk.f32.mxu1 %vm312_vm1, %v4357_v8 }
0x1d29   :  { %5765 = vmatmul.mubr.msk.f32.vlgmr.msra.gmra.mxu1 %vm312_vm1, %v5761_v7 }
0x1d2a   :  { %5779 = vmatpush3.msra.mxu1 %v4618_v29 }
0x1d2b   :  { %5780 = vmatprep.subr.mxu1 %v4617_v34 }
0x1d2c   :  { %5781 = vmatpush3.msra.mxu1 %v4617_v34  ;;  %v5088_v34 = vld [vmem:[%s6792_s6 + $0x4] ss:$0 sm:$0xff] }
0x1d2d   :  { %5782 = vmatprep.subr.mxu1 %v4616_v26 }
0x1d2e   :  { %5783 = vmatpush3.msra.mxu1 %v4616_v26 }
0x1d2f   :  { %5784 = vmatprep.subr.mxu1 %v4615_v35 }
0x1d30   :  { %5785 = vmatpush3.msra.mxu1 %v4615_v35 }
0x1de9   :  { %v5766_v9 = vpop.f32.mrf.mxu1 }
0x1dea   :  { %v4450_v2 = vadd.f32 %v5766_v9, %v3907_v36  ;;  %v4614_v36 = vld [vmem:[%s6795_s9 + $0x58] sm:$0xff]  ;;  %v5086_v9 = vld [vmem:[%s6796_s10] ss:$0 sm:$0xff] }
0x1deb   :  { %v4440_v10 = vpop.f32.mrf.mxu1  ;;  %5786 = vmatprep.subr.mxu1 %v4614_v36 }
0x1dec   :  { %v4460_v11 = vadd.f32 %v5078_v5, %v4450_v2  ;;  %v4449_v12 = vadd.f32 %v4440_v10, %v3906_v38  ;;  %5787 = vmatpush3.msra.mxu1 %v4614_v36  ;;  %v4612_v38 = vld [vmem:[%s6795_s9 + $0x48] sm:$0xff]  ;;  %v5090_v36 = vld [vmem:[%s6792_s6 + $0x5] ss:$0 sm:$0xff] }
0x1ded   :  { %5788 = vmatprep.subr.mxu1 %v4613_v37 }
0x1dee   :  { %v4459_v13 = vadd.f32 %v5078_v5, %v4449_v12  ;;  %v4462_v14 = vadd.f32 %v4460_v11, %v6367_v31  ;;  %5789 = vmatpush3.msra.mxu1 %v4613_v37 }
0x1def   :  { %5790 = vmatprep.subr.mxu1 %v4612_v38 }
0x1df0   :  { %v4466_v15 = vsel %vm54_vm0, %v4462_v14, 0.0  ;;  %v4461_v55 = vadd.f32 %v4459_v13, %v6365_v30  ;;  %5791 = vmatpush3.msra.mxu1 %v4612_v38 }
0x1df1   :  { %4467 = vadd.xlane.f32.xlu1 %v4466_v15  ;;  %5792 = vmatprep.subr.mxu1 %v4611_v39 }
0x1df2   :  { %v4463_v56 = vsel %vm54_vm0, %v4461_v55, 0.0  ;;  %5793 = vmatpush3.msra.mxu1 %v4611_v39 }
0x1df3   :  { %4464 = vadd.xlane.f32.xlu0 %v4463_v56  ;;  %5794 = vmatprep.subr.mxu1 %v4610_v40 }
0x1df4   :  { %5795 = vmatpush3.msra.mxu1 %v4610_v40 }
0x1df5   :  { %5796 = vmatprep.subr.mxu1 %v4609_v41 }
0x1df6   :  { %5797 = vmatpush3.msra.mxu1 %v4609_v41 }
0x1df7   :  { %5798 = vmatprep.subr.mxu1 %v4608_v42 }
0x1df8   :  { %5799 = vmatpush3.msra.mxu1 %v4608_v42 }
0x1df9   :  { %5800 = vmatprep.subr.mxu1 %v4607_v43 }
0x1dfa   :  { %5801 = vmatpush3.msra.mxu1 %v4607_v43 }
0x1dfb   :  { %5802 = vmatprep.subr.mxu1 %v4606_v59 }
0x1dfc   :  { %5803 = vmatpush3.msra.mxu1 %v4606_v59 }
0x1dfd   :  { %5804 = vmatprep.subr.mxu1 %v4605_v58 }
0x1dfe   :  { %5805 = vmatpush3.msra.mxu1 %v4605_v58  ;;  %v5092_v58 = vld [vmem:[%s6792_s6 + $0x6] ss:$0 sm:$0xff] }
0x1dff   :  { %5806 = vmatprep.subr.mxu1 %v4604_v62 }
0x1e00   :  { %5807 = vmatpush3.msra.mxu1 %v4604_v62 }
0x1e01   :  { %5808 = vmatprep.subr.mxu1 %v4603_v60 }
0x1e02   :  { %5809 = vmatpush3.msra.mxu1 %v4603_v60 }
0x1e7a   :  { %v4468_v6 = vpop.xlane.xlu1 %4467 }
0x1e7b   :  { %v4470_v16 = vmul.f32 0.03125, %v4468_v6 }
0x1e7c   :  { %v4465_v18 = vpop.xlane.xlu0 %4464 }
0x1e7d   :  { %v6675_v19 = vsub.f32 %v4462_v14, %v4470_v16  ;;  %v4469_v20 = vmul.f32 0.03125, %v4465_v18 }
0x1e7f   :  { %v6677_v21 = vsub.f32 %v4461_v55, %v4469_v20  ;;  %v4474_v22 = vmul.f32 %v6675_v19, %v6675_v19 }
0x1e81   :  { %v4478_v31 = vsel %vm54_vm0, %v4474_v22, 0.0  ;;  %v4473_v30 = vmul.f32 %v6677_v21, %v6677_v21 }
0x1e82   :  { %4479 = vadd.xlane.f32.xlu1 %v4478_v31 }
0x1e83   :  { %v4475_v23 = vsel %vm54_vm0, %v4473_v30, 0.0 }
0x1e84   :  { %4476 = vadd.xlane.f32.xlu0 %v4475_v23 }
0x1f0b   :  { %v4480_v4 = vpop.xlane.xlu1 %4479 }
0x1f0c   :  { %v4482_v17 = vmul.f32 0.03125, %v4480_v4 }
0x1f0d   :  { %v4477_v27 = vpop.xlane.xlu0 %4476 }
0x1f0e   :  { %v4484_v28 = vadd.f32 1e-05, %v4482_v17  ;;  %v4481_v44 = vmul.f32 0.03125, %v4477_v27 }
0x1f10   :  { %5884 = vrsqrt.f32 %v4484_v28  ;;  %v4483_v45 = vadd.f32 1e-05, %v4481_v44 }
0x1f12   :  { %5886 = vrsqrt.f32 %v4483_v45 }
0x1f1d   :  { %v5885_v46 = vpop.eup %5884 }
0x1f1e   :  { %v4488_v47 = vmul.f32 %v5885_v46, %v6675_v19 }
0x1f1f   :  { %v5887_v49 = vpop.eup %5886 }
0x1f20   :  { %v4487_v50 = vmul.f32 %v5887_v49, %v6677_v21  ;;  %v4498_v51 = vmul.f32 %v5080_v48, %v4488_v47 }
0x1f22   :  { %v4497_v52 = vmul.f32 %v5080_v48, %v4487_v50  ;;  %v4508_v57 = vadd.f32 %v5082_v53, %v4498_v51 }
0x1f24   :  { %v4507_v54 = vadd.f32 %v5082_v53, %v4497_v52 }
0x1f26   :  { %5775 = vmatprep.mubr.msk.f32.mxu0 %vm54_vm0, %v4507_v54 }
0x1f27   :  { %5776 = vmatmul.mubr.msk.f32.vlgmr.msra.gmra.mxu0 %vm54_vm0, %v4508_v57 }
0x1fe7   :  { %v5777_v63 = vpop.f32.mrf.mxu0 }
0x1fe8   :  { %v4598_v0 = vadd.f32 %v5777_v63, %v5083_v61 }
0x1fe9   :  { %v4592_v1 = vpop.f32.mrf.mxu0 }
0x1fea   :  { %v4593_v3 = vadd.f32 %v5083_v61, %v4592_v1  ;;  %v4602_v8 = vmax.f32 %v4598_v0, 0.0  ;;  %v5094_v61 = vld [vmem:[%s6792_s6 + $0x7] ss:$0 sm:$0xff] }
0x1fec   :  { %v4601_v7 = vmax.f32 %v4593_v3, 0.0 }
0x1fee   :  { %5810 = vmatprep.mubr.f32.mxu1 %v4601_v7 }
0x1fef   :  { %5811 = vmatmul.mubr.f32.vlgmr.msra.gmra.mxu1 %v4602_v8 }
0x20af   :  { %v5812_v5 = vpop.f32.mrf.mxu1 }
0x20b0   :  { %v4698_v2 = vadd.f32 %v5812_v5, %v5086_v9 }
0x20b1   :  { %v4692_v10 = vpop.f32.mrf.mxu1 }
0x20b2   :  { %v4693_v11 = vadd.f32 %v5086_v9, %v4692_v10  ;;  %v4702_v12 = vadd.f32 %v4698_v2, %v4508_v57 }
0x20b4   :  { %v4706_v13 = vsel %vm54_vm0, %v4702_v12, 0.0  ;;  %v4701_v14 = vadd.f32 %v4693_v11, %v4507_v54 }
0x20b5   :  { %4707 = vadd.xlane.f32.xlu1 %v4706_v13 }
0x20b6   :  { %v4703_v15 = vsel %vm54_vm0, %v4701_v14, 0.0 }
0x20b7   :  { %4704 = vadd.xlane.f32.xlu0 %v4703_v15 }
0x213e   :  { %v4708_v55 = vpop.xlane.xlu1 %4707 }
0x213f   :  { %v4710_v56 = vmul.f32 0.03125, %v4708_v55 }
0x2140   :  { %v4705_v6 = vpop.xlane.xlu0 %4704 }
0x2141   :  { %v4712_v16 = vsub.f32 %v4702_v12, %v4710_v56  ;;  %v4709_v18 = vmul.f32 0.03125, %v4705_v6 }
0x2143   :  { %v4711_v19 = vsub.f32 %v4701_v14, %v4709_v18  ;;  %v4714_v20 = vmul.f32 %v4712_v16, %v4712_v16 }
0x2145   :  { %v4718_v21 = vsel %vm54_vm0, %v4714_v20, 0.0  ;;  %v4713_v22 = vmul.f32 %v4711_v19, %v4711_v19 }
0x2146   :  { %4719 = vadd.xlane.f32.xlu1 %v4718_v21 }
0x2147   :  { %v4715_v31 = vsel %vm54_vm0, %v4713_v22, 0.0 }
0x2148   :  { %4716 = vadd.xlane.f32.xlu0 %v4715_v31 }
0x21cf   :  { %v4720_v30 = vpop.xlane.xlu1 %4719 }
0x21d0   :  { %v4722_v23 = vmul.f32 0.03125, %v4720_v30 }
0x21d1   :  { %v4717_v24 = vpop.xlane.xlu0 %4716 }
0x21d2   :  { %v4724_v25 = vadd.f32 1e-05, %v4722_v23  ;;  %v4721_v32 = vmul.f32 0.03125, %v4717_v24 }
0x21d4   :  { %5888 = vrsqrt.f32 %v4724_v25  ;;  %v4723_v33 = vadd.f32 1e-05, %v4721_v32 }
0x21d6   :  { %5890 = vrsqrt.f32 %v4723_v33 }
0x21e1   :  { %v5889_v29 = vpop.eup %5888 }
0x21e2   :  { %v4728_v26 = vmul.f32 %v5889_v29, %v4712_v16 }
0x21e3   :  { %v5891_v35 = vpop.eup %5890 }
0x21e4   :  { %v4738_v37 = vmul.f32 %v5088_v34, %v4728_v26  ;;  %v4727_v38 = vmul.f32 %v5891_v35, %v4711_v19 }
0x21e6   :  { %v4748_v39 = vadd.f32 %v5090_v36, %v4738_v37  ;;  %v4737_v40 = vmul.f32 %v5088_v34, %v4727_v38 }
0x21e8   :  { %v4752_v41 = vsel %vm54_vm0, %v4748_v39, 0.0  ;;  %v4747_v42 = vadd.f32 %v5090_v36, %v4737_v40 }
0x21e9   :  { %4753 = vadd.xlane.f32.xlu1 %v4752_v41 }
0x21ea   :  { %v4749_v43 = vsel %vm54_vm0, %v4747_v42, 0.0 }
0x21eb   :  { %4750 = vadd.xlane.f32.xlu0 %v4749_v43 }
0x2272   :  { %v4754_v4 = vpop.xlane.xlu1 %4753 }
0x2273   :  { %v4756_v17 = vmul.f32 0.03125, %v4754_v4 }
0x2274   :  { %v4751_v27 = vpop.xlane.xlu0 %4750 }
0x2275   :  { %v4758_v28 = vsub.f32 %v4748_v39, %v4756_v17  ;;  %v4755_v44 = vmul.f32 0.03125, %v4751_v27 }
0x2277   :  { %v4757_v45 = vsub.f32 %v4747_v42, %v4755_v44  ;;  %v4760_v46 = vmul.f32 %v4758_v28, %v4758_v28 }
0x2279   :  { %v4764_v47 = vsel %vm54_vm0, %v4760_v46, 0.0  ;;  %v4759_v48 = vmul.f32 %v4757_v45, %v4757_v45 }
0x227a   :  { %4765 = vadd.xlane.f32.xlu1 %v4764_v47 }
0x227b   :  { %v4761_v49 = vsel %vm54_vm0, %v4759_v48, 0.0 }
0x227c   :  { %4762 = vadd.xlane.f32.xlu0 %v4761_v49 }
0x2303   :  { %v4766_v50 = vpop.xlane.xlu1 %4765 }
0x2304   :  { %v4768_v51 = vmul.f32 0.03125, %v4766_v50 }
0x2305   :  { %v4763_v52 = vpop.xlane.xlu0 %4762 }
0x2306   :  { %v4770_v53 = vadd.f32 1e-05, %v4768_v51  ;;  %v4767_v54 = vmul.f32 0.03125, %v4763_v52 }
0x2308   :  { %5892 = vrsqrt.f32 %v4770_v53  ;;  %v4769_v57 = vadd.f32 1e-05, %v4767_v54 }
0x230a   :  { %5894 = vrsqrt.f32 %v4769_v57 }
0x2315   :  { %v5893_v59 = vpop.eup %5892 }
0x2316   :  { %v4774_v62 = vmul.f32 %v5893_v59, %v4758_v28 }
0x2317   :  { %v5895_v60 = vpop.eup %5894 }
0x2318   :  { %v4773_v63 = vmul.f32 %v5895_v60, %v4757_v45  ;;  %v4784_v0 = vmul.f32 %v5092_v58, %v4774_v62 }
0x231a   :  { %v4783_v1 = vmul.f32 %v5092_v58, %v4773_v63  ;;  %v4794_v3 = vadd.f32 %v5094_v61, %v4784_v0 }
0x231c   :  { %v4793_v7 = vadd.f32 %v5094_v61, %v4783_v1  ;;  %4796 = vst.msk [vmem:[#allocation2 + $0x8] sm:$0xff] %vm54_vm0, %v4794_v3 }
0x231e   :  { %4795 = vst.msk [vmem:[#allocation2] sm:$0xff] %vm54_vm0, %v4793_v7 }
0x231f   :  { %5907 = shalt.err (!%p5904_p4)
}
0x2320   :  { %s5919_s6 = smov 128   ;;  %s5920_s29 = smov 8  }
0x2321   :  { %4808 = dma.vmem_to_hbm [thread:$0]  %s4803_s27, 256, %s6797_s11, [#allocation3], %s5919_s6, %s5919_s6, %s5920_s29  }
0x2322   :  { %5916 = dma.done.wait [#allocation3], 256  }
0x2323   :  { %5917 = vsyncadd [#allocation3], 4294967040 }
0x2324   :  { %4812 = vsyncpa [#allocation3], 1 }

</bundles_post_ra>
